<compile_context>
chip_gen: v5e
topology: v5e:2x2
jax: 0.10.0
libtpu: 0.0.40
codegen_flags: <defaults>
</compile_context>

<pallas_src>
import functools

import jax
import jax.numpy as jnp
from jax import lax
from jax.experimental import pallas as pl
from jax.experimental.pallas import tpu as pltpu

_BN_EPS = 1e-5
_LEAKY_SLOPE = 0.1


def _round_up(x, m):
    return (x + m - 1) // m * m


def _vmem_capacity_bytes():
    try:
        return int(pltpu.get_tpu_info().vmem_capacity_bytes)
    except Exception:
        return 64 * 1024 * 1024        # conservative: v7x per-TC VMEM


def _pick_tile_rows(oh, ow, n, hp, wp, cin, cout_p, k, vmem_budget,
                    target_m=768):
    """Output rows per pass-1 grid step (M tile = rows * OW)."""
    divs16 = [d for d in range(1, oh + 1) if oh % d == 0 and (d * ow) % 16 == 0]
    divs8 = [d for d in range(1, oh + 1) if oh % d == 0 and (d * ow) % 8 == 0]
    divs = divs16 or divs8
    assert divs, "need a divisor d of OH with (d*OW) % 8 == 0"
    cands = [d for d in divs if d * ow <= max(target_m, divs[0] * ow)]
    d = max(cands)
    if n == 1:                           # keep >= 2 M tiles for megacore
        smaller = [x for x in divs if oh // x >= 2]
        if smaller:
            d = min(d, max(smaller))

    def fits(rows):
        tile_m = rows * ow
        img = hp * wp * cin * 2          # bf16 padded image block
        wgt = k * k * cin * cout_p * 2   # resident weight
        y = tile_m * cout_p * 2          # bf16 y block
        acc = tile_m * cout_p * 4        # f32 accumulator scratch
        # 2x double-buffering on streamed blocks, 2x slack for layout padding.
        return 2 * (2 * img + 2 * y + wgt + acc) < vmem_budget

    while not fits(d) and d > divs[0]:
        d = max(x for x in divs if x < d)
    return d


# ---------------------------------------------------------------------------
# Pass 1: fused im2col conv (K*K shifted-window MXU matmuls) + per-tile BN
# partial moments.  grid = (N, OH // tile_rows); no reduction axis in the grid
# (the K*K reduction is an in-kernel static loop over a resident weight).
# ---------------------------------------------------------------------------
def _conv_stats_kernel(x_ref, w_ref, y_ref, stats_ref, acc_ref, *,
                       kernel_size, stride, tile_rows, ow):
    k, s = kernel_size, stride
    tile_m = tile_rows * ow
    row0 = pl.multiple_of(pl.program_id(1) * (tile_rows * s), tile_rows * s)

    acc_ref[...] = jnp.zeros_like(acc_ref)
    for ki in range(k):
        for kj in range(k):
            if s == 1:
                win = x_ref[0, pl.ds(row0 + ki, tile_rows), pl.ds(kj, ow), :]
            else:
                raw = x_ref[0, pl.ds(row0 + ki, (tile_rows - 1) * s + 1),
                            pl.ds(kj, (ow - 1) * s + 1), :]
                win = raw[::s, ::s, :]
            p = win.reshape(tile_m, win.shape[-1])          # (tile_m, Cin) bf16
            acc_ref[...] += jnp.dot(p, w_ref[ki * k + kj],
                                    preferred_element_type=jnp.float32)

    acc = acc_ref[...]
    y_ref[...] = acc.astype(y_ref.dtype)                    # bf16 intermediate
    # Direct row stores (no concatenate); stats from the f32 accumulator.
    stats_ref[0, 0:1, :] = jnp.sum(acc, axis=0, keepdims=True)
    stats_ref[0, 1:2, :] = jnp.sum(acc * acc, axis=0, keepdims=True)


# ---------------------------------------------------------------------------
# Pass 2: y * scale + shift, then LeakyReLU(0.1).  grid = (nm2,), parallel.
# ---------------------------------------------------------------------------
def _bn_leaky_kernel(y_ref, params_ref, out_ref):
    scale = params_ref[0:1, :]          # (1, Cout_pad)
    shift = params_ref[1:2, :]
    t = y_ref[...].astype(jnp.float32) * scale + shift
    out_ref[...] = jnp.where(t >= 0.0, t, _LEAKY_SLOPE * t)


@functools.partial(jax.jit, static_argnames=("kernel_size", "stride", "padding"))
def cnn_block_forward(x_nchw, conv_w, gamma, beta, *, kernel_size, stride, padding):
    """x_nchw: (N, Cin, H, W); conv_w: (Cout, Cin, K, K); gamma/beta: (Cout,)."""
    n, cin, h, w = x_nchw.shape
    cout = conv_w.shape[0]
    k, s, p = kernel_size, stride, padding
    oh = (h + 2 * p - k) // s + 1
    ow = (w + 2 * p - k) // s + 1
    hp, wp = h + 2 * p, w + 2 * p
    m = n * oh * ow

    # Lane-dense Cout; 256-multiples when channels allow (256-wide MXU on v6e/v7x).
    cout_p = _round_up(cout, 256) if cout > 128 else _round_up(cout, 128)

    vmem_cap = _vmem_capacity_bytes()
    vmem_limit = min(vmem_cap * 3 // 4, 96 * 1024 * 1024)
    tile_rows = _pick_tile_rows(oh, ow, n, hp, wp, cin, cout_p, k,
                                vmem_budget=vmem_limit // 2)
    nj = oh // tile_rows
    tile_m1 = tile_rows * ow
    nm = n * nj

    # bf16 early (before layout work) to halve wrapper-side HBM traffic.
    # TODO(synk): keep the whole network NHWC/bf16 to drop both transposes.
    x_nhwc = jnp.transpose(x_nchw.astype(jnp.bfloat16), (0, 2, 3, 1))
    x_pad = jnp.pad(x_nhwc, ((0, 0), (p, p), (p, p), (0, 0)))      # (N,Hp,Wp,Cin)

    # PyTorch (Cout,Cin,K,K) -> (K,K,Cin,Cout) -> pad Cout -> (K*K, Cin, Cout_p)
    w_khwc = jnp.transpose(conv_w.astype(jnp.bfloat16), (2, 3, 1, 0))
    w_p = jnp.pad(w_khwc, ((0, 0), (0, 0), (0, 0), (0, cout_p - cout)))
    w_p = w_p.reshape(k * k, cin, cout_p)

    kern1 = functools.partial(_conv_stats_kernel, kernel_size=k, stride=s,
                              tile_rows=tile_rows, ow=ow)
    y, partial_stats = pl.pallas_call(
        kern1,
        grid=(n, nj),
        in_specs=[
            # whole padded image, resident across the row-tile axis (fetched once / image)
            pl.BlockSpec((1, hp, wp, cin), lambda b, j: (b, 0, 0, 0)),
            # fully-resident weight (fetched once)
            pl.BlockSpec((k * k, cin, cout_p), lambda b, j: (0, 0, 0)),
        ],
        out_specs=(
            pl.BlockSpec((tile_m1, cout_p), lambda b, j: (b * nj + j, 0)),
            pl.BlockSpec((1, 2, cout_p), lambda b, j: (b * nj + j, 0, 0)),
        ),
        out_shape=(
            jax.ShapeDtypeStruct((m, cout_p), jnp.bfloat16),       # bf16 y
            jax.ShapeDtypeStruct((nm, 2, cout_p), jnp.float32),    # partial moments
        ),
        scratch_shapes=[pltpu.VMEM((tile_m1, cout_p), jnp.float32)],
        compiler_params=pltpu.CompilerParams(
            dimension_semantics=("parallel", "parallel"),
            vmem_limit_bytes=vmem_limit),
        cost_estimate=pl.CostEstimate(
            flops=2 * m * k * k * cin * cout_p,
            transcendentals=0,
            bytes_accessed=(n * hp * wp * cin * 2 + k * k * cin * cout_p * 2
                            + m * cout_p * 2 + nm * 2 * cout_p * 4)),
    )(x_pad, w_p)

    # --- tiny per-channel finalize in the wrapper ---------------------------
    sums = jnp.sum(partial_stats, axis=0)                 # (2, Cout_pad) f32
    mean = sums[0] / m
    # TODO(synk): E[x^2]-E[x]^2 in f32 can cancel when |mean| >> std; switch to a
    # shifted-moments formulation if BN stats must match PyTorch very tightly.
    var = jnp.maximum(sums[1] / m - mean * mean, 0.0)     # biased var (BN train)
    inv_std = lax.rsqrt(var + _BN_EPS)
    gamma_p = jnp.pad(gamma.astype(jnp.float32), (0, cout_p - cout))
    beta_p = jnp.pad(beta.astype(jnp.float32), (0, cout_p - cout))
    scale = gamma_p * inv_std
    shift = beta_p - mean * scale
    params = jnp.stack([scale, shift], axis=0)            # (2, Cout_pad)

    # --- pass 2: normalize + affine + LeakyReLU (HBM-bound, bigger tiles) ----
    g = 1
    for cand in range(nm, 0, -1):
        if nm % cand == 0 and cand * tile_m1 <= 2048 and (nm // cand >= 2 or nm == 1):
            g = cand
            break
    tile_m2 = tile_m1 * g
    nm2 = m // tile_m2

    out = pl.pallas_call(
        _bn_leaky_kernel,
        grid=(nm2,),
        in_specs=[
            pl.BlockSpec((tile_m2, cout_p), lambda i: (i, 0)),
            pl.BlockSpec((2, cout_p), lambda i: (0, 0)),           # resident params
        ],
        out_specs=pl.BlockSpec((tile_m2, cout_p), lambda i: (i, 0)),
        out_shape=jax.ShapeDtypeStruct((m, cout_p), jnp.float32),
        compiler_params=pltpu.CompilerParams(
            dimension_semantics=("parallel",),
            vmem_limit_bytes=vmem_limit),
        cost_estimate=pl.CostEstimate(
            flops=4 * m * cout_p, transcendentals=0,
            bytes_accessed=m * cout_p * (2 + 4) + 2 * cout_p * 4),
    )(y, params)

    # (M, Cout_pad) -> slice real channels -> NHWC -> NCHW
    out = out[:, :cout].reshape(n, oh, ow, cout)
    return jnp.transpose(out, (0, 3, 1, 2))


def _reference(x_nchw, conv_w, gamma, beta, *, kernel_size, stride, padding):
    """Pure-JAX f32 reference (lax.conv + training-mode BN + LeakyReLU)."""
    y = lax.conv_general_dilated(
        x_nchw.astype(jnp.float32), conv_w.astype(jnp.float32),
        window_strides=(stride, stride),
        padding=[(padding, padding), (padding, padding)],
        dimension_numbers=("NCHW", "OIHW", "NCHW"))
    mean = jnp.mean(y, axis=(0, 2, 3), keepdims=True)
    var = jnp.mean((y - mean) ** 2, axis=(0, 2, 3), keepdims=True)
    yh = (y - mean) / jnp.sqrt(var + _BN_EPS)
    yh = yh * gamma.reshape(1, -1, 1, 1) + beta.reshape(1, -1, 1, 1)
    return jnp.where(yh >= 0.0, yh, _LEAKY_SLOPE * yh)


if __name__ == "__main__":
    # Small shapes consistent with the module: CNNBlock(in=4, out=8, k=3, s=1, p=1)
    N, CIN, H, W = 2, 4, 16, 16
    COUT, K, S, P = 8, 3, 1, 1

    key = jax.random.PRNGKey(0)
    kx, kw = jax.random.split(key)
    x = jax.random.normal(kx, (N, CIN, H, W), dtype=jnp.float32)
    conv_w = jax.random.normal(kw, (COUT, CIN, K, K), dtype=jnp.float32) * 0.1
    gamma = jnp.ones((COUT,), dtype=jnp.float32)   # BatchNorm2d default init
    beta = jnp.zeros((COUT,), dtype=jnp.float32)

    out = cnn_block_forward(x, conv_w, gamma, beta,
                            kernel_size=K, stride=S, padding=P)
    out = jax.block_until_ready(out)

    ref = _reference(x, conv_w, gamma, beta, kernel_size=K, stride=S, padding=P)
    assert out.shape == (N, COUT, H, W), out.shape
    # bf16 MXU operands + bf16 intermediate y -> loosened tolerance vs f32 ref.
    assert jnp.allclose(out, ref, atol=3e-2, rtol=3e-2), \
        float(jnp.max(jnp.abs(out - ref)))

    print("KERNEL_OK")
</pallas_src>

<mosaic_0001>
module attributes {stable_mosaic.version = 11 : i64} {
  func.func @_conv_stats_kernel(%arg0: i32, %arg1: i32, %arg2: memref<1x18x18x4xbf16, #tpu.memory_space<vmem>>, %arg3: memref<9x4x128xbf16, #tpu.memory_space<vmem>>, %arg4: memref<256x128xbf16, #tpu.memory_space<vmem>>, %arg5: memref<1x2x128xf32, #tpu.memory_space<vmem>>, %arg6: memref<256x128xf32, #tpu.memory_space<vmem>>) attributes {dimension_semantics = [#tpu.dimension_semantics<parallel>, #tpu.dimension_semantics<parallel>], iteration_bounds = array<i64: 2, 1>, scalar_prefetch = 0 : i64, scratch_operands = 1 : i64, tpu.core_type = #tpu.core_type<tc>, window_params = [{transform_indices = @transform_0, window_bounds = array<i64: 1, 18, 18, 4>}, {pipeline_mode = #tpu.pipeline_mode<synchronous>, transform_indices = @transform_1, window_bounds = array<i64: 9, 4, 128>}, {transform_indices = @transform_2, window_bounds = array<i64: 256, 128>}, {transform_indices = @transform_3, window_bounds = array<i64: 1, 2, 128>}]} {
    %c16_i32 = arith.constant 16 : i32
    %0 = arith.muli %arg1, %c16_i32 : i32
    %1 = tpu.assume_multiple %0, 16 : i32
    %cst = arith.constant 0.000000e+00 : f32
    %2 = vector.broadcast %cst : f32 to vector<256x128xf32>
    %c0 = arith.constant 0 : index
    %c0_0 = arith.constant 0 : index
    %3 = vector.load %arg6[%c0, %c0_0] : memref<256x128xf32, #tpu.memory_space<vmem>>, vector<256x128xf32>
    tpu.vector_store %arg6[%c0, %c0_0], %2 {strides = array<i32>} : memref<256x128xf32, #tpu.memory_space<vmem>>, vector<256x128xf32>,
    %c0_i32 = arith.constant 0 : i32
    %4 = arith.addi %1, %c0_i32 : i32
    %c0_1 = arith.constant 0 : index
    %5 = arith.index_cast %4 : i32 to index
    %c0_2 = arith.constant 0 : index
    %c0_3 = arith.constant 0 : index
    %6 = vector.load %arg2[%c0_1, %5, %c0_2, %c0_3] : memref<1x18x18x4xbf16, #tpu.memory_space<vmem>>, vector<1x16x16x4xbf16>
    %7 = vector.shape_cast %6 : vector<1x16x16x4xbf16> to vector<16x16x4xbf16>
    %8 = vector.shape_cast %7 : vector<16x16x4xbf16> to vector<256x4xbf16>
    %c0_4 = arith.constant 0 : index
    %c0_5 = arith.constant 0 : index
    %9 = vector.load %arg6[%c0_4, %c0_5] : memref<256x128xf32, #tpu.memory_space<vmem>>, vector<256x128xf32>
    %c0_6 = arith.constant 0 : index
    %c0_7 = arith.constant 0 : index
    %c0_8 = arith.constant 0 : index
    %10 = vector.load %arg3[%c0_6, %c0_7, %c0_8] : memref<9x4x128xbf16, #tpu.memory_space<vmem>>, vector<1x4x128xbf16>
    %11 = vector.shape_cast %10 : vector<1x4x128xbf16> to vector<4x128xbf16>
    %cst_9 = arith.constant dense<0.000000e+00> : vector<256x128xf32>
    %12 = tpu.matmul %8, %11, %cst_9 {dimension_numbers = #tpu.dot_dimension_numbers<[1], [0], [0], [1], [0, 0, 1, 1], [], []>} : vector<256x4xbf16>, vector<4x128xbf16>, vector<256x128xf32> -> vector<256x128xf32>
    %13 = arith.addf %9, %12 : vector<256x128xf32>
    %c0_10 = arith.constant 0 : index
    %c0_11 = arith.constant 0 : index
    %14 = vector.load %arg6[%c0_10, %c0_11] : memref<256x128xf32, #tpu.memory_space<vmem>>, vector<256x128xf32>
    tpu.vector_store %arg6[%c0_10, %c0_11], %13 {strides = array<i32>} : memref<256x128xf32, #tpu.memory_space<vmem>>, vector<256x128xf32>,
    %c0_i32_12 = arith.constant 0 : i32
    %15 = arith.addi %1, %c0_i32_12 : i32
    %c0_13 = arith.constant 0 : index
    %16 = arith.index_cast %15 : i32 to index
    %c1 = arith.constant 1 : index
    %c0_14 = arith.constant 0 : index
    %17 = vector.load %arg2[%c0_13, %16, %c1, %c0_14] : memref<1x18x18x4xbf16, #tpu.memory_space<vmem>>, vector<1x16x16x4xbf16>
    %18 = vector.shape_cast %17 : vector<1x16x16x4xbf16> to vector<16x16x4xbf16>
    %19 = vector.shape_cast %18 : vector<16x16x4xbf16> to vector<256x4xbf16>
    %c0_15 = arith.constant 0 : index
    %c0_16 = arith.constant 0 : index
    %20 = vector.load %arg6[%c0_15, %c0_16] : memref<256x128xf32, #tpu.memory_space<vmem>>, vector<256x128xf32>
    %c1_17 = arith.constant 1 : index
    %c0_18 = arith.constant 0 : index
    %c0_19 = arith.constant 0 : index
    %21 = vector.load %arg3[%c1_17, %c0_18, %c0_19] : memref<9x4x128xbf16, #tpu.memory_space<vmem>>, vector<1x4x128xbf16>
    %22 = vector.shape_cast %21 : vector<1x4x128xbf16> to vector<4x128xbf16>
    %cst_20 = arith.constant dense<0.000000e+00> : vector<256x128xf32>
    %23 = tpu.matmul %19, %22, %cst_20 {dimension_numbers = #tpu.dot_dimension_numbers<[1], [0], [0], [1], [0, 0, 1, 1], [], []>} : vector<256x4xbf16>, vector<4x128xbf16>, vector<256x128xf32> -> vector<256x128xf32>
    %24 = arith.addf %20, %23 : vector<256x128xf32>
    %c0_21 = arith.constant 0 : index
    %c0_22 = arith.constant 0 : index
    %25 = vector.load %arg6[%c0_21, %c0_22] : memref<256x128xf32, #tpu.memory_space<vmem>>, vector<256x128xf32>
    tpu.vector_store %arg6[%c0_21, %c0_22], %24 {strides = array<i32>} : memref<256x128xf32, #tpu.memory_space<vmem>>, vector<256x128xf32>,
    %c0_i32_23 = arith.constant 0 : i32
    %26 = arith.addi %1, %c0_i32_23 : i32
    %c0_24 = arith.constant 0 : index
    %27 = arith.index_cast %26 : i32 to index
    %c2 = arith.constant 2 : index
    %c0_25 = arith.constant 0 : index
    %28 = vector.load %arg2[%c0_24, %27, %c2, %c0_25] : memref<1x18x18x4xbf16, #tpu.memory_space<vmem>>, vector<1x16x16x4xbf16>
    %29 = vector.shape_cast %28 : vector<1x16x16x4xbf16> to vector<16x16x4xbf16>
    %30 = vector.shape_cast %29 : vector<16x16x4xbf16> to vector<256x4xbf16>
    %c0_26 = arith.constant 0 : index
    %c0_27 = arith.constant 0 : index
    %31 = vector.load %arg6[%c0_26, %c0_27] : memref<256x128xf32, #tpu.memory_space<vmem>>, vector<256x128xf32>
    %c2_28 = arith.constant 2 : index
    %c0_29 = arith.constant 0 : index
    %c0_30 = arith.constant 0 : index
    %32 = vector.load %arg3[%c2_28, %c0_29, %c0_30] : memref<9x4x128xbf16, #tpu.memory_space<vmem>>, vector<1x4x128xbf16>
    %33 = vector.shape_cast %32 : vector<1x4x128xbf16> to vector<4x128xbf16>
    %cst_31 = arith.constant dense<0.000000e+00> : vector<256x128xf32>
    %34 = tpu.matmul %30, %33, %cst_31 {dimension_numbers = #tpu.dot_dimension_numbers<[1], [0], [0], [1], [0, 0, 1, 1], [], []>} : vector<256x4xbf16>, vector<4x128xbf16>, vector<256x128xf32> -> vector<256x128xf32>
    %35 = arith.addf %31, %34 : vector<256x128xf32>
    %c0_32 = arith.constant 0 : index
    %c0_33 = arith.constant 0 : index
    %36 = vector.load %arg6[%c0_32, %c0_33] : memref<256x128xf32, #tpu.memory_space<vmem>>, vector<256x128xf32>
    tpu.vector_store %arg6[%c0_32, %c0_33], %35 {strides = array<i32>} : memref<256x128xf32, #tpu.memory_space<vmem>>, vector<256x128xf32>,
    %c1_i32 = arith.constant 1 : i32
    %37 = arith.addi %1, %c1_i32 : i32
    %c0_34 = arith.constant 0 : index
    %38 = arith.index_cast %37 : i32 to index
    %c0_35 = arith.constant 0 : index
    %c0_36 = arith.constant 0 : index
    %39 = vector.load %arg2[%c0_34, %38, %c0_35, %c0_36] : memref<1x18x18x4xbf16, #tpu.memory_space<vmem>>, vector<1x16x16x4xbf16>
    %40 = vector.shape_cast %39 : vector<1x16x16x4xbf16> to vector<16x16x4xbf16>
    %41 = vector.shape_cast %40 : vector<16x16x4xbf16> to vector<256x4xbf16>
    %c0_37 = arith.constant 0 : index
    %c0_38 = arith.constant 0 : index
    %42 = vector.load %arg6[%c0_37, %c0_38] : memref<256x128xf32, #tpu.memory_space<vmem>>, vector<256x128xf32>
    %c3 = arith.constant 3 : index
    %c0_39 = arith.constant 0 : index
    %c0_40 = arith.constant 0 : index
    %43 = vector.load %arg3[%c3, %c0_39, %c0_40] : memref<9x4x128xbf16, #tpu.memory_space<vmem>>, vector<1x4x128xbf16>
    %44 = vector.shape_cast %43 : vector<1x4x128xbf16> to vector<4x128xbf16>
    %cst_41 = arith.constant dense<0.000000e+00> : vector<256x128xf32>
    %45 = tpu.matmul %41, %44, %cst_41 {dimension_numbers = #tpu.dot_dimension_numbers<[1], [0], [0], [1], [0, 0, 1, 1], [], []>} : vector<256x4xbf16>, vector<4x128xbf16>, vector<256x128xf32> -> vector<256x128xf32>
    %46 = arith.addf %42, %45 : vector<256x128xf32>
    %c0_42 = arith.constant 0 : index
    %c0_43 = arith.constant 0 : index
    %47 = vector.load %arg6[%c0_42, %c0_43] : memref<256x128xf32, #tpu.memory_space<vmem>>, vector<256x128xf32>
    tpu.vector_store %arg6[%c0_42, %c0_43], %46 {strides = array<i32>} : memref<256x128xf32, #tpu.memory_space<vmem>>, vector<256x128xf32>,
    %c1_i32_44 = arith.constant 1 : i32
    %48 = arith.addi %1, %c1_i32_44 : i32
    %c0_45 = arith.constant 0 : index
    %49 = arith.index_cast %48 : i32 to index
    %c1_46 = arith.constant 1 : index
    %c0_47 = arith.constant 0 : index
    %50 = vector.load %arg2[%c0_45, %49, %c1_46, %c0_47] : memref<1x18x18x4xbf16, #tpu.memory_space<vmem>>, vector<1x16x16x4xbf16>
    %51 = vector.shape_cast %50 : vector<1x16x16x4xbf16> to vector<16x16x4xbf16>
    %52 = vector.shape_cast %51 : vector<16x16x4xbf16> to vector<256x4xbf16>
    %c0_48 = arith.constant 0 : index
    %c0_49 = arith.constant 0 : index
    %53 = vector.load %arg6[%c0_48, %c0_49] : memref<256x128xf32, #tpu.memory_space<vmem>>, vector<256x128xf32>
    %c4 = arith.constant 4 : index
    %c0_50 = arith.constant 0 : index
    %c0_51 = arith.constant 0 : index
    %54 = vector.load %arg3[%c4, %c0_50, %c0_51] : memref<9x4x128xbf16, #tpu.memory_space<vmem>>, vector<1x4x128xbf16>
    %55 = vector.shape_cast %54 : vector<1x4x128xbf16> to vector<4x128xbf16>
    %cst_52 = arith.constant dense<0.000000e+00> : vector<256x128xf32>
    %56 = tpu.matmul %52, %55, %cst_52 {dimension_numbers = #tpu.dot_dimension_numbers<[1], [0], [0], [1], [0, 0, 1, 1], [], []>} : vector<256x4xbf16>, vector<4x128xbf16>, vector<256x128xf32> -> vector<256x128xf32>
    %57 = arith.addf %53, %56 : vector<256x128xf32>
    %c0_53 = arith.constant 0 : index
    %c0_54 = arith.constant 0 : index
    %58 = vector.load %arg6[%c0_53, %c0_54] : memref<256x128xf32, #tpu.memory_space<vmem>>, vector<256x128xf32>
    tpu.vector_store %arg6[%c0_53, %c0_54], %57 {strides = array<i32>} : memref<256x128xf32, #tpu.memory_space<vmem>>, vector<256x128xf32>,
    %c1_i32_55 = arith.constant 1 : i32
    %59 = arith.addi %1, %c1_i32_55 : i32
    %c0_56 = arith.constant 0 : index
    %60 = arith.index_cast %59 : i32 to index
    %c2_57 = arith.constant 2 : index
    %c0_58 = arith.constant 0 : index
    %61 = vector.load %arg2[%c0_56, %60, %c2_57, %c0_58] : memref<1x18x18x4xbf16, #tpu.memory_space<vmem>>, vector<1x16x16x4xbf16>
    %62 = vector.shape_cast %61 : vector<1x16x16x4xbf16> to vector<16x16x4xbf16>
    %63 = vector.shape_cast %62 : vector<16x16x4xbf16> to vector<256x4xbf16>
    %c0_59 = arith.constant 0 : index
    %c0_60 = arith.constant 0 : index
    %64 = vector.load %arg6[%c0_59, %c0_60] : memref<256x128xf32, #tpu.memory_space<vmem>>, vector<256x128xf32>
    %c5 = arith.constant 5 : index
    %c0_61 = arith.constant 0 : index
    %c0_62 = arith.constant 0 : index
    %65 = vector.load %arg3[%c5, %c0_61, %c0_62] : memref<9x4x128xbf16, #tpu.memory_space<vmem>>, vector<1x4x128xbf16>
    %66 = vector.shape_cast %65 : vector<1x4x128xbf16> to vector<4x128xbf16>
    %cst_63 = arith.constant dense<0.000000e+00> : vector<256x128xf32>
    %67 = tpu.matmul %63, %66, %cst_63 {dimension_numbers = #tpu.dot_dimension_numbers<[1], [0], [0], [1], [0, 0, 1, 1], [], []>} : vector<256x4xbf16>, vector<4x128xbf16>, vector<256x128xf32> -> vector<256x128xf32>
    %68 = arith.addf %64, %67 : vector<256x128xf32>
    %c0_64 = arith.constant 0 : index
    %c0_65 = arith.constant 0 : index
    %69 = vector.load %arg6[%c0_64, %c0_65] : memref<256x128xf32, #tpu.memory_space<vmem>>, vector<256x128xf32>
    tpu.vector_store %arg6[%c0_64, %c0_65], %68 {strides = array<i32>} : memref<256x128xf32, #tpu.memory_space<vmem>>, vector<256x128xf32>,
    %c2_i32 = arith.constant 2 : i32
    %70 = arith.addi %1, %c2_i32 : i32
    %c0_66 = arith.constant 0 : index
    %71 = arith.index_cast %70 : i32 to index
    %c0_67 = arith.constant 0 : index
    %c0_68 = arith.constant 0 : index
    %72 = vector.load %arg2[%c0_66, %71, %c0_67, %c0_68] : memref<1x18x18x4xbf16, #tpu.memory_space<vmem>>, vector<1x16x16x4xbf16>
    %73 = vector.shape_cast %72 : vector<1x16x16x4xbf16> to vector<16x16x4xbf16>
    %74 = vector.shape_cast %73 : vector<16x16x4xbf16> to vector<256x4xbf16>
    %c0_69 = arith.constant 0 : index
    %c0_70 = arith.constant 0 : index
    %75 = vector.load %arg6[%c0_69, %c0_70] : memref<256x128xf32, #tpu.memory_space<vmem>>, vector<256x128xf32>
    %c6 = arith.constant 6 : index
    %c0_71 = arith.constant 0 : index
    %c0_72 = arith.constant 0 : index
    %76 = vector.load %arg3[%c6, %c0_71, %c0_72] : memref<9x4x128xbf16, #tpu.memory_space<vmem>>, vector<1x4x128xbf16>
    %77 = vector.shape_cast %76 : vector<1x4x128xbf16> to vector<4x128xbf16>
    %cst_73 = arith.constant dense<0.000000e+00> : vector<256x128xf32>
    %78 = tpu.matmul %74, %77, %cst_73 {dimension_numbers = #tpu.dot_dimension_numbers<[1], [0], [0], [1], [0, 0, 1, 1], [], []>} : vector<256x4xbf16>, vector<4x128xbf16>, vector<256x128xf32> -> vector<256x128xf32>
    %79 = arith.addf %75, %78 : vector<256x128xf32>
    %c0_74 = arith.constant 0 : index
    %c0_75 = arith.constant 0 : index
    %80 = vector.load %arg6[%c0_74, %c0_75] : memref<256x128xf32, #tpu.memory_space<vmem>>, vector<256x128xf32>
    tpu.vector_store %arg6[%c0_74, %c0_75], %79 {strides = array<i32>} : memref<256x128xf32, #tpu.memory_space<vmem>>, vector<256x128xf32>,
    %c2_i32_76 = arith.constant 2 : i32
    %81 = arith.addi %1, %c2_i32_76 : i32
    %c0_77 = arith.constant 0 : index
    %82 = arith.index_cast %81 : i32 to index
    %c1_78 = arith.constant 1 : index
    %c0_79 = arith.constant 0 : index
    %83 = vector.load %arg2[%c0_77, %82, %c1_78, %c0_79] : memref<1x18x18x4xbf16, #tpu.memory_space<vmem>>, vector<1x16x16x4xbf16>
    %84 = vector.shape_cast %83 : vector<1x16x16x4xbf16> to vector<16x16x4xbf16>
    %85 = vector.shape_cast %84 : vector<16x16x4xbf16> to vector<256x4xbf16>
    %c0_80 = arith.constant 0 : index
    %c0_81 = arith.constant 0 : index
    %86 = vector.load %arg6[%c0_80, %c0_81] : memref<256x128xf32, #tpu.memory_space<vmem>>, vector<256x128xf32>
    %c7 = arith.constant 7 : index
    %c0_82 = arith.constant 0 : index
    %c0_83 = arith.constant 0 : index
    %87 = vector.load %arg3[%c7, %c0_82, %c0_83] : memref<9x4x128xbf16, #tpu.memory_space<vmem>>, vector<1x4x128xbf16>
    %88 = vector.shape_cast %87 : vector<1x4x128xbf16> to vector<4x128xbf16>
    %cst_84 = arith.constant dense<0.000000e+00> : vector<256x128xf32>
    %89 = tpu.matmul %85, %88, %cst_84 {dimension_numbers = #tpu.dot_dimension_numbers<[1], [0], [0], [1], [0, 0, 1, 1], [], []>} : vector<256x4xbf16>, vector<4x128xbf16>, vector<256x128xf32> -> vector<256x128xf32>
    %90 = arith.addf %86, %89 : vector<256x128xf32>
    %c0_85 = arith.constant 0 : index
    %c0_86 = arith.constant 0 : index
    %91 = vector.load %arg6[%c0_85, %c0_86] : memref<256x128xf32, #tpu.memory_space<vmem>>, vector<256x128xf32>
    tpu.vector_store %arg6[%c0_85, %c0_86], %90 {strides = array<i32>} : memref<256x128xf32, #tpu.memory_space<vmem>>, vector<256x128xf32>,
    %c2_i32_87 = arith.constant 2 : i32
    %92 = arith.addi %1, %c2_i32_87 : i32
    %c0_88 = arith.constant 0 : index
    %93 = arith.index_cast %92 : i32 to index
    %c2_89 = arith.constant 2 : index
    %c0_90 = arith.constant 0 : index
    %94 = vector.load %arg2[%c0_88, %93, %c2_89, %c0_90] : memref<1x18x18x4xbf16, #tpu.memory_space<vmem>>, vector<1x16x16x4xbf16>
    %95 = vector.shape_cast %94 : vector<1x16x16x4xbf16> to vector<16x16x4xbf16>
    %96 = vector.shape_cast %95 : vector<16x16x4xbf16> to vector<256x4xbf16>
    %c0_91 = arith.constant 0 : index
    %c0_92 = arith.constant 0 : index
    %97 = vector.load %arg6[%c0_91, %c0_92] : memref<256x128xf32, #tpu.memory_space<vmem>>, vector<256x128xf32>
    %c8 = arith.constant 8 : index
    %c0_93 = arith.constant 0 : index
    %c0_94 = arith.constant 0 : index
    %98 = vector.load %arg3[%c8, %c0_93, %c0_94] : memref<9x4x128xbf16, #tpu.memory_space<vmem>>, vector<1x4x128xbf16>
    %99 = vector.shape_cast %98 : vector<1x4x128xbf16> to vector<4x128xbf16>
    %cst_95 = arith.constant dense<0.000000e+00> : vector<256x128xf32>
    %100 = tpu.matmul %96, %99, %cst_95 {dimension_numbers = #tpu.dot_dimension_numbers<[1], [0], [0], [1], [0, 0, 1, 1], [], []>} : vector<256x4xbf16>, vector<4x128xbf16>, vector<256x128xf32> -> vector<256x128xf32>
    %101 = arith.addf %97, %100 : vector<256x128xf32>
    %c0_96 = arith.constant 0 : index
    %c0_97 = arith.constant 0 : index
    %102 = vector.load %arg6[%c0_96, %c0_97] : memref<256x128xf32, #tpu.memory_space<vmem>>, vector<256x128xf32>
    tpu.vector_store %arg6[%c0_96, %c0_97], %101 {strides = array<i32>} : memref<256x128xf32, #tpu.memory_space<vmem>>, vector<256x128xf32>,
    %c0_98 = arith.constant 0 : index
    %c0_99 = arith.constant 0 : index
    %103 = vector.load %arg6[%c0_98, %c0_99] : memref<256x128xf32, #tpu.memory_space<vmem>>, vector<256x128xf32>
    %104 = arith.truncf %103 : vector<256x128xf32> to vector<256x128xbf16>
    %c0_100 = arith.constant 0 : index
    %c0_101 = arith.constant 0 : index
    %105 = vector.load %arg4[%c0_100, %c0_101] : memref<256x128xbf16, #tpu.memory_space<vmem>>, vector<256x128xbf16>
    tpu.vector_store %arg4[%c0_100, %c0_101], %104 {strides = array<i32>} : memref<256x128xbf16, #tpu.memory_space<vmem>>, vector<256x128xbf16>,
    %cst_102 = arith.constant dense<0.000000e+00> : vector<128xf32>
    %106 = vector.multi_reduction <add>, %103, %cst_102 [0] : vector<256x128xf32> to vector<128xf32>
    %107 = vector.shape_cast %106 : vector<128xf32> to vector<1x128xf32>
    %c0_103 = arith.constant 0 : index
    %c0_104 = arith.constant 0 : index
    %c0_105 = arith.constant 0 : index
    %108 = vector.load %arg5[%c0_103, %c0_104, %c0_105] : memref<1x2x128xf32, #tpu.memory_space<vmem>>, vector<1x1x128xf32>
    %109 = vector.shape_cast %108 : vector<1x1x128xf32> to vector<1x128xf32>
    %110 = vector.shape_cast %107 : vector<1x128xf32> to vector<1x1x128xf32>
    tpu.vector_store %arg5[%c0_103, %c0_104, %c0_105], %110 {strides = array<i32>} : memref<1x2x128xf32, #tpu.memory_space<vmem>>, vector<1x1x128xf32>,
    %111 = arith.mulf %103, %103 : vector<256x128xf32>
    %cst_106 = arith.constant dense<0.000000e+00> : vector<128xf32>
    %112 = vector.multi_reduction <add>, %111, %cst_106 [0] : vector<256x128xf32> to vector<128xf32>
    %113 = vector.shape_cast %112 : vector<128xf32> to vector<1x128xf32>
    %c0_107 = arith.constant 0 : index
    %c1_108 = arith.constant 1 : index
    %c0_109 = arith.constant 0 : index
    %114 = vector.load %arg5[%c0_107, %c1_108, %c0_109] : memref<1x2x128xf32, #tpu.memory_space<vmem>>, vector<1x1x128xf32>
    %115 = vector.shape_cast %114 : vector<1x1x128xf32> to vector<1x128xf32>
    %116 = vector.shape_cast %113 : vector<1x128xf32> to vector<1x1x128xf32>
    tpu.vector_store %arg5[%c0_107, %c1_108, %c0_109], %116 {strides = array<i32>} : memref<1x2x128xf32, #tpu.memory_space<vmem>>, vector<1x1x128xf32>,
    return
  }
  func.func @transform_0(%arg0: i32, %arg1: i32) -> (i32, i32, i32, i32) {
    %c0_i32 = arith.constant 0 : i32
    %c0_i32_0 = arith.constant 0 : i32
    %c0_i32_1 = arith.constant 0 : i32
    %c0_i32_2 = arith.constant 0 : i32
    return %arg0, %c0_i32, %c0_i32_0, %c0_i32_1 : i32, i32, i32, i32
  }
  func.func @transform_1(%arg0: i32, %arg1: i32) -> (i32, i32, i32) {
    %c0_i32 = arith.constant 0 : i32
    %c0_i32_0 = arith.constant 0 : i32
    %c0_i32_1 = arith.constant 0 : i32
    %c0_i32_2 = arith.constant 0 : i32
    return %c0_i32, %c0_i32_0, %c0_i32_1 : i32, i32, i32
  }
  func.func @transform_2(%arg0: i32, %arg1: i32) -> (i32, i32) {
    %c1_i32 = arith.constant 1 : i32
    %0 = arith.muli %arg0, %c1_i32 : i32
    %1 = arith.addi %0, %arg1 : i32
    %c0_i32 = arith.constant 0 : i32
    %c0_i32_0 = arith.constant 0 : i32
    return %1, %c0_i32 : i32, i32
  }
  func.func @transform_3(%arg0: i32, %arg1: i32) -> (i32, i32, i32) {
    %c1_i32 = arith.constant 1 : i32
    %0 = arith.muli %arg0, %c1_i32 : i32
    %1 = arith.addi %0, %arg1 : i32
    %c0_i32 = arith.constant 0 : i32
    %c0_i32_0 = arith.constant 0 : i32
    %c0_i32_1 = arith.constant 0 : i32
    return %1, %c0_i32, %c0_i32_0 : i32, i32, i32
  }
}

module attributes {stable_mosaic.version = 11 : i64} {
  func.func @_bn_leaky_kernel(%arg0: i32, %arg1: memref<256x128xbf16, #tpu.memory_space<vmem>>, %arg2: memref<2x128xf32, #tpu.memory_space<vmem>>, %arg3: memref<256x128xf32, #tpu.memory_space<vmem>>) attributes {dimension_semantics = [#tpu.dimension_semantics<parallel>], iteration_bounds = array<i64: 2>, scalar_prefetch = 0 : i64, scratch_operands = 0 : i64, tpu.core_type = #tpu.core_type<tc>, window_params = [{transform_indices = @transform_0, window_bounds = array<i64: 256, 128>}, {pipeline_mode = #tpu.pipeline_mode<synchronous>, transform_indices = @transform_1, window_bounds = array<i64: 2, 128>}, {transform_indices = @transform_2, window_bounds = array<i64: 256, 128>}]} {
    %c0 = arith.constant 0 : index
    %c0_0 = arith.constant 0 : index
    %0 = vector.load %arg2[%c0, %c0_0] : memref<2x128xf32, #tpu.memory_space<vmem>>, vector<1x128xf32>
    %c1 = arith.constant 1 : index
    %c0_1 = arith.constant 0 : index
    %1 = vector.load %arg2[%c1, %c0_1] : memref<2x128xf32, #tpu.memory_space<vmem>>, vector<1x128xf32>
    %c0_2 = arith.constant 0 : index
    %c0_3 = arith.constant 0 : index
    %2 = vector.load %arg1[%c0_2, %c0_3] : memref<256x128xbf16, #tpu.memory_space<vmem>>, vector<256x128xbf16>
    %3 = arith.extf %2 : vector<256x128xbf16> to vector<256x128xf32>
    %4 = vector.broadcast %0 : vector<1x128xf32> to vector<256x128xf32>
    %5 = arith.mulf %3, %4 : vector<256x128xf32>
    %6 = vector.broadcast %1 : vector<1x128xf32> to vector<256x128xf32>
    %7 = arith.addf %5, %6 : vector<256x128xf32>
    %cst = arith.constant 0.000000e+00 : f32
    %8 = vector.broadcast %cst : f32 to vector<256x128xf32>
    %9 = arith.cmpf oge, %7, %8 : vector<256x128xf32>
    %cst_4 = arith.constant 1.000000e-01 : f32
    %10 = vector.broadcast %cst_4 : f32 to vector<256x128xf32>
    %11 = arith.mulf %10, %7 : vector<256x128xf32>
    %12 = arith.select %9, %7, %11 : vector<256x128xi1>, vector<256x128xf32>
    %c0_5 = arith.constant 0 : index
    %c0_6 = arith.constant 0 : index
    %13 = vector.load %arg3[%c0_5, %c0_6] : memref<256x128xf32, #tpu.memory_space<vmem>>, vector<256x128xf32>
    tpu.vector_store %arg3[%c0_5, %c0_6], %12 {strides = array<i32>} : memref<256x128xf32, #tpu.memory_space<vmem>>, vector<256x128xf32>,
    return
  }
  func.func @transform_0(%arg0: i32) -> (i32, i32) {
    %c0_i32 = arith.constant 0 : i32
    %c0_i32_0 = arith.constant 0 : i32
    return %arg0, %c0_i32 : i32, i32
  }
  func.func @transform_1(%arg0: i32) -> (i32, i32) {
    %c0_i32 = arith.constant 0 : i32
    %c0_i32_0 = arith.constant 0 : i32
    %c0_i32_1 = arith.constant 0 : i32
    return %c0_i32, %c0_i32_0 : i32, i32
  }
  func.func @transform_2(%arg0: i32) -> (i32, i32) {
    %c0_i32 = arith.constant 0 : i32
    %c0_i32_0 = arith.constant 0 : i32
    return %arg0, %c0_i32 : i32, i32
  }
}

</mosaic_0001>

<bundles_post_ra>
// kernel: cnn_block_forward.3
= control target key start
LH: loop header
LB: loop body
LE: loop exit
PB: predicated region body
PF: predicated region fallthrough
CT: control target
= control target key end

     0   :  { %s586_s9 = smov 0   ;;  %s733_s0 = inlined_call_operand.vmem [shape: bf16[512,128], index: 0, kind: input, shape index: {}]   ;;  %s734_s1 = inlined_call_operand.vmem [shape: f32[2,128], index: 1, kind: input, shape index: {}]   ;;  %s735_s2 = inlined_call_operand.vmem [shape: f32[512,128], index: 2, kind: output, shape index: {}]  }
   0x1 LB: > { %s463_s10 = sadd.s32 4294967295, %s569_s9   ;;  %p467_p0 = scmp.ge.s32.totalorder %s569_s9, 1  ;;  %s569_s9 = sphi %s586_s9, %s12_s9  }
   0x2   : > { %p113_p1 = scmp.lt.s32.totalorder %s569_s9, 3 }
   0x4   : > { %p114_p2 = pnand %p467_p0, %p113_p1 }
   0x5   : > { %s468_s11 = sshll.u32 (!%p114_p2), %s463_s10, 5 }
   0x6   : > { %117 = sbr.rel (%p114_p2) target bundleno = 69 (0x45), region = 28  ;;  %p136_p3 = scmp.lt.s32.totalorder (!%p114_p2), %s468_s11, 63 }
   0xb   : > { %s737_s11 = smov (!%p136_p3, %s468_s11), 63  ;;  %v605_v0 = vld [vmem:[%s734_s1] ss:$0 sm:$0xff]  ;;  %v613_v5 = vld [vmem:[%s734_s1 + $0x1] ss:$0 sm:$0xff] }
   0xc   : > { %s469_s12 = sshll.u32 %s737_s11, 2  ;;  %s471_s20 = sshll.u32 %s737_s11, 3 }
   0xd   : > { %s600_s15 = scalar_lea.vmem %s733_s0, %s469_s12  ;;  %s636_s23 = scalar_lea.vmem %s735_s2, %s471_s20 }
   0xe   : > { %v475_v1 = vld [vmem:[%s600_s15] sm:$0xff]   ;;  %v538_v2 = vld [vmem:[%s600_s15 + $0x8] sm:$0xff]   ;;  %v539_v3 = vld [vmem:[%s600_s15 + $0x10] sm:$0xff]  }
   0xf   : > { %v476_v4 = vunpack.c.l.bf16 %v475_v1  ;;  %v477_v6 = vunpack.c.h.bf16 %v475_v1  ;;  %v480_v7 = vunpack.c.l.bf16 %v538_v2  ;;  %v481_v8 = vunpack.c.h.bf16 %v538_v2  ;;  %v540_v9 = vld [vmem:[%s600_s15 + $0x18] sm:$0xff]   ;;  %v541_v37 = vld [vmem:[%s600_s15 + $0x20] sm:$0xff]   ;;  %v542_v41 = vld [vmem:[%s600_s15 + $0x28] sm:$0xff]  }
  0x10   : > { %v484_v10 = vunpack.c.l.bf16 %v539_v3  ;;  %v485_v11 = vunpack.c.h.bf16 %v539_v3  ;;  %v488_v12 = vunpack.c.l.bf16 %v540_v9  ;;  %v489_v13 = vunpack.c.h.bf16 %v540_v9  ;;  %v543_v42 = vld [vmem:[%s600_s15 + $0x30] sm:$0xff]   ;;  %v544_v49 = vld [vmem:[%s600_s15 + $0x38] sm:$0xff]  }
  0x11   : > { %v214_v14 = vmul.f32 %v605_v0, %v476_v4  ;;  %v215_v15 = vmul.f32 %v605_v0, %v477_v6  ;;  %v216_v16 = vmul.f32 %v605_v0, %v480_v7  ;;  %v217_v17 = vmul.f32 %v605_v0, %v481_v8  ;;  %v545_v8 = vld [vmem:[%s600_s15 + $0x40] sm:$0xff]  }
  0x12   : > { %v218_v18 = vmul.f32 %v605_v0, %v484_v10  ;;  %v219_v19 = vmul.f32 %v605_v0, %v485_v11  ;;  %v220_v20 = vmul.f32 %v605_v0, %v488_v12  ;;  %v221_v21 = vmul.f32 %v605_v0, %v489_v13 }
  0x13   : > { %v247_v22 = vadd.f32 %v613_v5, %v214_v14  ;;  %v248_v23 = vadd.f32 %v613_v5, %v215_v15  ;;  %v249_v24 = vadd.f32 %v613_v5, %v216_v16  ;;  %v250_v25 = vadd.f32 %v613_v5, %v217_v17  ;;  %v546_v16 = vld [vmem:[%s600_s15 + $0x48] sm:$0xff]  }
  0x14   : > { %v251_v26 = vadd.f32 %v613_v5, %v218_v18  ;;  %v252_v27 = vadd.f32 %v613_v5, %v219_v19  ;;  %v253_v28 = vadd.f32 %v613_v5, %v220_v20  ;;  %v254_v29 = vadd.f32 %v613_v5, %v221_v21 }
  0x15   : > { %vm279_vm0 = vcmp.ge.f32.partialorder %v247_v22, 0.0  ;;  %v311_v30 = vmul.f32 0.1, %v247_v22  ;;  %vm280_vm1 = vcmp.ge.f32.partialorder %v248_v23, 0.0  ;;  %v312_v31 = vmul.f32 0.1, %v248_v23 }
  0x16   : > { %vm281_vm2 = vcmp.ge.f32.partialorder %v249_v24, 0.0  ;;  %v313_v32 = vmul.f32 0.1, %v249_v24  ;;  %vm282_vm3 = vcmp.ge.f32.partialorder %v250_v25, 0.0  ;;  %v314_v33 = vmul.f32 0.1, %v250_v25 }
  0x17   : > { %v343_v34 = vsel %vm279_vm0, %v247_v22, %v311_v30  ;;  %v344_v35 = vsel %vm280_vm1, %v248_v23, %v312_v31  ;;  %vm283_vm4 = vcmp.ge.f32.partialorder %v251_v26, 0.0  ;;  %v315_v36 = vmul.f32 0.1, %v251_v26 }
  0x18   : > { %375 = vst [vmem:[%s636_s23] sm:$0xff] %v343_v34  ;;  %v345_v38 = vsel %vm281_vm2, %v249_v24, %v313_v32  ;;  %v346_v39 = vsel %vm282_vm3, %v250_v25, %v314_v33  ;;  %vm284_vm5 = vcmp.ge.f32.partialorder %v252_v27, 0.0  ;;  %v316_v40 = vmul.f32 0.1, %v252_v27  ;;  %v547_v25 = vld [vmem:[%s600_s15 + $0x50] sm:$0xff]  }
  0x19   : > { %376 = vst [vmem:[%s636_s23 + $0x8] sm:$0xff] %v344_v35  ;;  %v347_v43 = vsel %vm283_vm4, %v251_v26, %v315_v36  ;;  %vm285_vm6 = vcmp.ge.f32.partialorder %v253_v28, 0.0  ;;  %v317_v44 = vmul.f32 0.1, %v253_v28  ;;  %vm286_vm7 = vcmp.ge.f32.partialorder %v254_v29, 0.0 }
  0x1a   : > { %377 = vst [vmem:[%s636_s23 + $0x10] sm:$0xff] %v345_v38  ;;  %v348_v45 = vsel %vm284_vm5, %v252_v27, %v316_v40  ;;  %v318_v46 = vmul.f32 0.1, %v254_v29  ;;  %v492_v47 = vunpack.c.l.bf16 %v541_v37  ;;  %v493_v48 = vunpack.c.h.bf16 %v541_v37 }
  0x1b   : > { %378 = vst [vmem:[%s636_s23 + $0x18] sm:$0xff] %v346_v39  ;;  %v349_v50 = vsel %vm285_vm6, %v253_v28, %v317_v44  ;;  %v496_v51 = vunpack.c.l.bf16 %v542_v41  ;;  %v497_v52 = vunpack.c.h.bf16 %v542_v41  ;;  %v500_v53 = vunpack.c.l.bf16 %v543_v42 }
  0x1c   : > { %379 = vst [vmem:[%s636_s23 + $0x20] sm:$0xff] %v347_v43  ;;  %v350_v54 = vsel %vm286_vm7, %v254_v29, %v318_v46  ;;  %v222_v55 = vmul.f32 %v605_v0, %v492_v47  ;;  %v223_v56 = vmul.f32 %v605_v0, %v493_v48  ;;  %v501_v57 = vunpack.c.h.bf16 %v543_v42  ;;  %v548_v46 = vld [vmem:[%s600_s15 + $0x58] sm:$0xff]  }
  0x1d   : > { %380 = vst [vmem:[%s636_s23 + $0x28] sm:$0xff] %v348_v45  ;;  %v224_v58 = vmul.f32 %v605_v0, %v496_v51  ;;  %v225_v59 = vmul.f32 %v605_v0, %v497_v52  ;;  %v226_v60 = vmul.f32 %v605_v0, %v500_v53  ;;  %v504_v61 = vunpack.c.l.bf16 %v544_v49  ;;  %v549_v53 = vld [vmem:[%s600_s15 + $0x60] sm:$0xff]  }
  0x1e   : > { %381 = vst [vmem:[%s636_s23 + $0x30] sm:$0xff] %v349_v50  ;;  %v255_v62 = vadd.f32 %v613_v5, %v222_v55  ;;  %v256_v63 = vadd.f32 %v613_v5, %v223_v56  ;;  %v227_v1 = vmul.f32 %v605_v0, %v501_v57  ;;  %v505_v2 = vunpack.c.h.bf16 %v544_v49 }
  0x1f   : > { %382 = vst [vmem:[%s636_s23 + $0x38] sm:$0xff] %v350_v54  ;;  %v257_v3 = vadd.f32 %v613_v5, %v224_v58  ;;  %v258_v4 = vadd.f32 %v613_v5, %v225_v59  ;;  %v259_v6 = vadd.f32 %v613_v5, %v226_v60  ;;  %v228_v7 = vmul.f32 %v605_v0, %v504_v61  ;;  %v550_v60 = vld [vmem:[%s600_s15 + $0x68] sm:$0xff]  }
  0x20   : > { %vm287_vm8 = vcmp.ge.f32.partialorder %v255_v62, 0.0  ;;  %v319_v9 = vmul.f32 0.1, %v255_v62  ;;  %vm288_vm9 = vcmp.ge.f32.partialorder %v256_v63, 0.0  ;;  %v320_v10 = vmul.f32 0.1, %v256_v63 }
  0x21   : > { %vm289_vm10 = vcmp.ge.f32.partialorder %v257_v3, 0.0  ;;  %v321_v11 = vmul.f32 0.1, %v257_v3  ;;  %vm290_vm11 = vcmp.ge.f32.partialorder %v258_v4, 0.0  ;;  %v322_v12 = vmul.f32 0.1, %v258_v4 }
  0x22   : > { %v351_v13 = vsel %vm287_vm8, %v255_v62, %v319_v9  ;;  %v352_v14 = vsel %vm288_vm9, %v256_v63, %v320_v10  ;;  %vm291_vm12 = vcmp.ge.f32.partialorder %v259_v6, 0.0  ;;  %v323_v15 = vmul.f32 0.1, %v259_v6 }
  0x23   : > { %383 = vst [vmem:[%s636_s23 + $0x40] sm:$0xff] %v351_v13  ;;  %v353_v17 = vsel %vm289_vm10, %v257_v3, %v321_v11  ;;  %v354_v18 = vsel %vm290_vm11, %v258_v4, %v322_v12  ;;  %v260_v19 = vadd.f32 %v613_v5, %v227_v1  ;;  %v261_v20 = vadd.f32 %v613_v5, %v228_v7 }
  0x24   : > { %384 = vst [vmem:[%s636_s23 + $0x48] sm:$0xff] %v352_v14  ;;  %v355_v21 = vsel %vm291_vm12, %v259_v6, %v323_v15  ;;  %v229_v22 = vmul.f32 %v605_v0, %v505_v2  ;;  %v508_v23 = vunpack.c.l.bf16 %v545_v8  ;;  %v509_v24 = vunpack.c.h.bf16 %v545_v8  ;;  %v551_v2 = vld [vmem:[%s600_s15 + $0x70] sm:$0xff]  }
  0x25   : > { %385 = vst [vmem:[%s636_s23 + $0x50] sm:$0xff] %v353_v17  ;;  %vm292_vm13 = vcmp.ge.f32.partialorder %v260_v19, 0.0  ;;  %v324_v26 = vmul.f32 0.1, %v260_v19  ;;  %vm293_vm14 = vcmp.ge.f32.partialorder %v261_v20, 0.0  ;;  %v512_v27 = vunpack.c.l.bf16 %v546_v16 }
  0x26   : > { %386 = vst [vmem:[%s636_s23 + $0x58] sm:$0xff] %v354_v18  ;;  %v325_v28 = vmul.f32 0.1, %v261_v20  ;;  %v262_v29 = vadd.f32 %v613_v5, %v229_v22  ;;  %v230_v30 = vmul.f32 %v605_v0, %v508_v23  ;;  %v231_v31 = vmul.f32 %v605_v0, %v509_v24 }
  0x27   : > { %387 = vst [vmem:[%s636_s23 + $0x60] sm:$0xff] %v355_v21  ;;  %v356_v32 = vsel %vm292_vm13, %v260_v19, %v324_v26  ;;  %v232_v33 = vmul.f32 %v605_v0, %v512_v27  ;;  %v513_v34 = vunpack.c.h.bf16 %v546_v16  ;;  %v516_v35 = vunpack.c.l.bf16 %v547_v25 }
  0x28   : > { %388 = vst [vmem:[%s636_s23 + $0x68] sm:$0xff] %v356_v32  ;;  %v357_v36 = vsel %vm293_vm14, %v261_v20, %v325_v28  ;;  %vm294_vm15 = vcmp.ge.f32.partialorder %v262_v29, 0.0  ;;  %v326_v37 = vmul.f32 0.1, %v262_v29  ;;  %v263_v38 = vadd.f32 %v613_v5, %v230_v30 }
  0x29   : > { %389 = vst [vmem:[%s636_s23 + $0x70] sm:$0xff] %v357_v36  ;;  %v264_v39 = vadd.f32 %v613_v5, %v231_v31  ;;  %v265_v40 = vadd.f32 %v613_v5, %v232_v33  ;;  %v233_v41 = vmul.f32 %v605_v0, %v513_v34  ;;  %v234_v42 = vmul.f32 %v605_v0, %v516_v35  ;;  %v552_v31 = vld [vmem:[%s600_s15 + $0x78] sm:$0xff]  }
  0x2a   : > { %v358_v43 = vsel %vm294_vm15, %v262_v29, %v326_v37  ;;  %vm295_vm0 = vcmp.ge.f32.partialorder %v263_v38, 0.0  ;;  %v327_v44 = vmul.f32 0.1, %v263_v38  ;;  %v517_v45 = vunpack.c.h.bf16 %v547_v25 }
  0x2b   : > { %390 = vst [vmem:[%s636_s23 + $0x78] sm:$0xff] %v358_v43  ;;  %vm296_vm1 = vcmp.ge.f32.partialorder %v264_v39, 0.0  ;;  %v328_v47 = vmul.f32 0.1, %v264_v39  ;;  %vm297_vm2 = vcmp.ge.f32.partialorder %v265_v40, 0.0  ;;  %v266_v48 = vadd.f32 %v613_v5, %v233_v41 }
  0x2c   : > { %v359_v49 = vsel %vm295_vm0, %v263_v38, %v327_v44  ;;  %v329_v50 = vmul.f32 0.1, %v265_v40  ;;  %v267_v51 = vadd.f32 %v613_v5, %v234_v42  ;;  %v235_v52 = vmul.f32 %v605_v0, %v517_v45 }
  0x2d   : > { %391 = vst [vmem:[%s636_s23 + $0x80] sm:$0xff] %v359_v49  ;;  %v360_v54 = vsel %vm296_vm1, %v264_v39, %v328_v47  ;;  %vm298_vm3 = vcmp.ge.f32.partialorder %v266_v48, 0.0  ;;  %v330_v55 = vmul.f32 0.1, %v266_v48  ;;  %v520_v56 = vunpack.c.l.bf16 %v548_v46 }
  0x2e   : > { %392 = vst [vmem:[%s636_s23 + $0x88] sm:$0xff] %v360_v54  ;;  %v361_v57 = vsel %vm297_vm2, %v265_v40, %v329_v50  ;;  %vm299_vm4 = vcmp.ge.f32.partialorder %v267_v51, 0.0  ;;  %v331_v58 = vmul.f32 0.1, %v267_v51  ;;  %v268_v59 = vadd.f32 %v613_v5, %v235_v52 }
  0x2f   : > { %393 = vst [vmem:[%s636_s23 + $0x90] sm:$0xff] %v361_v57  ;;  %v362_v61 = vsel %vm298_vm3, %v266_v48, %v330_v55  ;;  %v236_v62 = vmul.f32 %v605_v0, %v520_v56  ;;  %v521_v63 = vunpack.c.h.bf16 %v548_v46  ;;  %v524_v1 = vunpack.c.l.bf16 %v549_v53 }
  0x30   : > { %394 = vst [vmem:[%s636_s23 + $0x98] sm:$0xff] %v362_v61  ;;  %v363_v3 = vsel %vm299_vm4, %v267_v51, %v331_v58  ;;  %vm300_vm5 = vcmp.ge.f32.partialorder %v268_v59, 0.0  ;;  %v332_v4 = vmul.f32 0.1, %v268_v59  ;;  %v525_v6 = vunpack.c.h.bf16 %v549_v53 }
  0x31   : > { %395 = vst [vmem:[%s636_s23 + $0xa0] sm:$0xff] %v363_v3  ;;  %v269_v7 = vadd.f32 %v613_v5, %v236_v62  ;;  %v237_v8 = vmul.f32 %v605_v0, %v521_v63  ;;  %v238_v9 = vmul.f32 %v605_v0, %v524_v1  ;;  %v528_v10 = vunpack.c.l.bf16 %v550_v60 }
  0x32   : > { %v364_v11 = vsel %vm300_vm5, %v268_v59, %v332_v4  ;;  %v239_v12 = vmul.f32 %v605_v0, %v525_v6  ;;  %v529_v13 = vunpack.c.h.bf16 %v550_v60  ;;  %v532_v14 = vunpack.c.l.bf16 %v551_v2 }
  0x33   : > { %396 = vst [vmem:[%s636_s23 + $0xa8] sm:$0xff] %v364_v11  ;;  %vm301_vm6 = vcmp.ge.f32.partialorder %v269_v7, 0.0  ;;  %v333_v15 = vmul.f32 0.1, %v269_v7  ;;  %v270_v16 = vadd.f32 %v613_v5, %v237_v8  ;;  %v271_v17 = vadd.f32 %v613_v5, %v238_v9 }
  0x34   : > { %v272_v18 = vadd.f32 %v613_v5, %v239_v12  ;;  %v240_v19 = vmul.f32 %v605_v0, %v528_v10  ;;  %v241_v20 = vmul.f32 %v605_v0, %v529_v13  ;;  %v242_v21 = vmul.f32 %v605_v0, %v532_v14 }
  0x35   : > { %v365_v22 = vsel %vm301_vm6, %v269_v7, %v333_v15  ;;  %vm302_vm7 = vcmp.ge.f32.partialorder %v270_v16, 0.0  ;;  %v334_v23 = vmul.f32 0.1, %v270_v16  ;;  %vm303_vm8 = vcmp.ge.f32.partialorder %v271_v17, 0.0 }
  0x36   : > { %397 = vst [vmem:[%s636_s23 + $0xb0] sm:$0xff] %v365_v22  ;;  %v335_v24 = vmul.f32 0.1, %v271_v17  ;;  %vm304_vm9 = vcmp.ge.f32.partialorder %v272_v18, 0.0  ;;  %v336_v25 = vmul.f32 0.1, %v272_v18  ;;  %v273_v26 = vadd.f32 %v613_v5, %v240_v19 }
  0x37   : > { %v366_v27 = vsel %vm302_vm7, %v270_v16, %v334_v23  ;;  %v274_v28 = vadd.f32 %v613_v5, %v241_v20  ;;  %v275_v29 = vadd.f32 %v613_v5, %v242_v21  ;;  %v533_v30 = vunpack.c.h.bf16 %v551_v2 }
  0x38   : > { %398 = vst [vmem:[%s636_s23 + $0xb8] sm:$0xff] %v366_v27  ;;  %v367_v32 = vsel %vm303_vm8, %v271_v17, %v335_v24  ;;  %v368_v33 = vsel %vm304_vm9, %v272_v18, %v336_v25  ;;  %vm305_vm10 = vcmp.ge.f32.partialorder %v273_v26, 0.0  ;;  %v337_v34 = vmul.f32 0.1, %v273_v26 }
  0x39   : > { %399 = vst [vmem:[%s636_s23 + $0xc0] sm:$0xff] %v367_v32  ;;  %vm306_vm11 = vcmp.ge.f32.partialorder %v274_v28, 0.0  ;;  %v338_v35 = vmul.f32 0.1, %v274_v28  ;;  %vm307_vm12 = vcmp.ge.f32.partialorder %v275_v29, 0.0  ;;  %v243_v36 = vmul.f32 %v605_v0, %v533_v30 }
  0x3a   : > { %400 = vst [vmem:[%s636_s23 + $0xc8] sm:$0xff] %v368_v33  ;;  %v369_v37 = vsel %vm305_vm10, %v273_v26, %v337_v34  ;;  %v339_v38 = vmul.f32 0.1, %v275_v29  ;;  %v536_v39 = vunpack.c.l.bf16 %v552_v31  ;;  %v537_v40 = vunpack.c.h.bf16 %v552_v31 }
  0x3b   : > { %401 = vst [vmem:[%s636_s23 + $0xd0] sm:$0xff] %v369_v37  ;;  %v370_v41 = vsel %vm306_vm11, %v274_v28, %v338_v35  ;;  %v276_v42 = vadd.f32 %v613_v5, %v243_v36 }
  0x3c   : > { %402 = vst [vmem:[%s636_s23 + $0xd8] sm:$0xff] %v370_v41  ;;  %v371_v43 = vsel %vm307_vm12, %v275_v29, %v339_v38  ;;  %v244_v44 = vmul.f32 %v605_v0, %v536_v39  ;;  %v245_v45 = vmul.f32 %v605_v0, %v537_v40 }
  0x3d   : > { %403 = vst [vmem:[%s636_s23 + $0xe0] sm:$0xff] %v371_v43  ;;  %vm308_vm13 = vcmp.ge.f32.partialorder %v276_v42, 0.0  ;;  %v340_v46 = vmul.f32 0.1, %v276_v42 }
  0x3e   : > { %v277_v47 = vadd.f32 %v613_v5, %v244_v44  ;;  %v278_v48 = vadd.f32 %v613_v5, %v245_v45 }
  0x3f   : > { %v372_v49 = vsel %vm308_vm13, %v276_v42, %v340_v46 }
  0x40   : > { %404 = vst [vmem:[%s636_s23 + $0xe8] sm:$0xff] %v372_v49  ;;  %vm309_vm14 = vcmp.ge.f32.partialorder %v277_v47, 0.0  ;;  %v341_v50 = vmul.f32 0.1, %v277_v47  ;;  %vm310_vm15 = vcmp.ge.f32.partialorder %v278_v48, 0.0 }
  0x41   : > { %v342_v51 = vmul.f32 0.1, %v278_v48 }
  0x42   : > { %v373_v52 = vsel %vm309_vm14, %v277_v47, %v341_v50 }
  0x43   : > { %405 = vst [vmem:[%s636_s23 + $0xf0] sm:$0xff] %v373_v52  ;;  %v374_v53 = vsel %vm310_vm15, %v278_v48, %v342_v51 }
  0x44   : > { %406 = vst [vmem:[%s636_s23 + $0xf8] sm:$0xff] %v374_v53 }
  0x45 PF: > { %s12_s9 = sadd.s32 1, %s569_s9  }
  0x46   : > { %p9_p4 = scmp.ge.s32.totalorder %s12_s9, 4  }
  0x48   :  { %11 = sbr.rel (!%p9_p4) target bundleno = 1 (0x1), region = 58 }

// kernel: cnn_block_forward.2
= control target key start
LH: loop header
LB: loop body
LE: loop exit
PB: predicated region body
PF: predicated region fallthrough
CT: control target
= control target key end

     0   :  { %s6133_s12 = smov 0   ;;  %s6135_s13 = smov 0   ;;  %s7467_s0 = inlined_call_operand.vmem [shape: bf16[2,18,18,4], index: 0, kind: input, shape index: {}]   ;;  %s7468_s1 = inlined_call_operand.vmem [shape: bf16[9,4,128], index: 1, kind: input, shape index: {}]   ;;  %s7469_s2 = inlined_call_operand.vmem [shape: bf16[512,128], index: 2, kind: output, shape index: {0}]   ;;  %s7470_s3 = inlined_call_operand.vmem [shape: f32[2,2,128], index: 3, kind: output, shape index: {1}]  }
   0x1   :  { %s6137_s14 = smov 0  }
   0x2 LB: > { %s26_s15 = sadd.s32 1, %s6107_s13  ;;  %p5263_p0 = scmp.ge.s32.totalorder %s6111_s14, 1  ;;  %s6111_s14 = sphi %s6137_s14, %s14_s14   ;;  %s6107_s13 = sphi %s6135_s13, %s7499_s13   ;;  %s6103_s12 = sphi %s6133_s12, %s7498_s12  }
   0x3   : > { %p28_p1 = scmp.ge.s32.totalorder %s26_s15, 2  ;;  %p156_p2 = scmp.lt.s32.totalorder %s6111_s14, 3 }
   0x5   : > { %s7501_s15 = smov (%p28_p1, %s26_s15), 0  ;;  %p157_p3 = pnand %p5263_p0, %p156_p2 }
   0x7   : > { %160 = sbr.rel (%p157_p3) target bundleno = 743 (0x2e7), region = 28 }
   0xc   : > { %v306_v0 = vld [vmem:[%s7468_s1] sm:$0x3]  ;;  %vm436_vm0 = vcmask 1041408   ;;  %p186_p4 = scmp.lt.s32.totalorder %s6103_s12, 1  ;;  %v5381_v2 = vld [vmem:[%s7468_s1 + $0x4] sm:$0x3] }
   0xd   : > { %v438_v1 = vsel %vm436_vm0, %v306_v0, 0  ;;  %v5430_v3 = vld [vmem:[%s7468_s1 + $0x6] sm:$0x3]  ;;  %v1656_v4 = vsel %vm436_vm0, %v5381_v2, 0  ;;  %v5348_v6 = vld [vmem:[%s7468_s1 + $0x2] sm:$0x3] }
   0xe   : > { %6061 = vmatpush.bf16.msra.mxu1 %v438_v1  ;;  %6062 = vmatpush.bf16.msra.mxu2 %v438_v1  ;;  %s6165_s22 = scalar_select %p186_p4, %s6103_s12, 1  ;;  %v2010_v5 = vsel %vm436_vm0, %v5430_v3, 0  ;;  %v1159_v7 = vsel %vm436_vm0, %v5348_v6, 0  ;;  %v5559_v8 = vld [vmem:[%s7468_s1 + $0x8] sm:$0x3]  ;;  %vm387_vm1 = vcmask 31744  }
   0xf   : > { %6063 = vmatpush.bf16.msra.mxu3 %v438_v1  ;;  %447 = vmatpush.bf16.msra.mxu0 %v438_v1  ;;  %v2728_v9 = vsel %vm436_vm0, %v5559_v8, 0  ;;  %v5689_v29 = vld [vmem:[%s7468_s1 + $0xc] sm:$0x3]  ;;  %v5818_v31 = vld [vmem:[%s7468_s1 + $0xe] sm:$0x3]  ;;  %vm1410_vm4 = vcmask 1042432  }
  0x10   : > { %s6064_s27 = smul.u32 216, %s6165_s22  ;;  %v3576_v32 = vsel %vm436_vm0, %v5689_v29, 0  ;;  %v4294_v33 = vsel %vm436_vm0, %v5818_v31, 0  ;;  %v5640_v34 = vld [vmem:[%s7468_s1 + $0xa] sm:$0x3]  ;;  %vm1411_vm5 = vcmask 1046532  }
  0x11   : > { %v5899_v35 = vld [vmem:[%s7468_s1 + $0x10] sm:$0x3]  ;;  %v3222_v36 = vsel %vm436_vm0, %v5640_v34, 0  ;;  %vm641_vm2 = vsmask.f32 3328  ;;  %vm6244_vm7 = vmor %vm1410_vm4, %vm1411_vm5  ;;  %s5265_s16 = sshll.u32 %s6103_s12, 5 }
  0x12   : > { %1665 = vmatpush.bf16.msrb.mxu2 %v1656_v4  ;;  %1168 = vmatpush.bf16.msrb.mxu1 %v1159_v7  ;;  %s6181_s30 = scalar_lea.vmem %s7467_s0, %s6064_s27  ;;  %v4788_v37 = vsel %vm436_vm0, %v5899_v35, 0  ;;  %vm642_vm3 = vsmask.f32 7440  ;;  %p7201_p5 = scmp.lt.s32.totalorder %s5265_s16, 63 }
  0x13   : > { %2019 = vmatpush.bf16.msrb.mxu3 %v2010_v5  ;;  %2737 = vmatpush.bf16.msrb.mxu0 %v2728_v9  ;;  %v5922_v10 = vld [vmem:[%s6181_s30 + $0x30] sm:$0xff]  ;;  %v5926_v11 = vld [vmem:[%s6181_s30 + $0x60] sm:$0xff]  ;;  %v5924_v18 = vld [vmem:[%s6181_s30 + $0x48] sm:$0xff]  ;;  %s5267_s21 = sshll.u32 %s6165_s22, 1 }
  0x14   : > { %v5930_v12 = vld [vmem:[%s6181_s30 + $0x90] sm:$0xff]  ;;  %v5918_v13 = vld [vmem:[%s6181_s30] sm:$0xff]  ;;  %5336 = vmatmul.msk.bf16.vlgmr.msra.gmra.mxu1 %vm387_vm1, %v5922_v10  ;;  %5340 = vmatmul.msk.bf16.vlgmr.msra.gmra.mxu2 %vm387_vm1, %v5926_v11  ;;  %v5928_v19 = vld [vmem:[%s6181_s30 + $0x78] sm:$0xff]  ;;  %s7503_s16 = smov (!%p7201_p5, %s5265_s16), 63  ;;  %s203_s25 = scalar_lea.vmem %s7470_s3, %s5267_s21 }
  0x15   : > { %5344 = vmatmul.msk.bf16.vlgmr.msra.gmra.mxu3 %vm387_vm1, %v5930_v12  ;;  %5332 = vmatmul.msk.bf16.vlgmr.msra.gmra.mxu0 %vm387_vm1, %v5918_v13  ;;  %v5923_v14 = vld [vmem:[%s6181_s30 + $0x3c] sm:$0xff]  ;;  %v5927_v15 = vld [vmem:[%s6181_s30 + $0x6c] sm:$0xff]  ;;  %v594_v23 = vld [vmem:[%s6181_s30 + $0x4] sm:$0xf]  ;;  %s5266_s12 = sshll.u32 %s7503_s16, 2 }
  0x16   : > { %v5931_v16 = vld [vmem:[%s6181_s30 + $0x9c] sm:$0xff]  ;;  %v5919_v17 = vld [vmem:[%s6181_s30 + $0xc] sm:$0xff]  ;;  %v654_v26 = vshll.u32 %v594_v23, 16  ;;  %v658_v27 = vshrl.u32 %v594_v23, 16  ;;  %3585 = vmatpush.bf16.msra.mxu2 %v3576_v32  ;;  %3231 = vmatpush.bf16.msra.mxu1 %v3222_v36  ;;  %v595_v46 = vld [vmem:[%s6181_s30 + $0x8] sm:$0x1]  ;;  %s7237_s20 = scalar_lea.vmem %s7469_s2, %s5266_s12 }
  0x17   : > { %v5932_v20 = vld [vmem:[%s6181_s30 + $0xa8] sm:$0xff]  ;;  %v5920_v21 = vld [vmem:[%s6181_s30 + $0x18] sm:$0xff]  ;;  %v593_v22 = vld [vmem:[%s6181_s30] sm:$0xf]  ;;  %4303 = vmatpush.bf16.msra.mxu3 %v4294_v33  ;;  %4797 = vmatpush.bf16.msra.mxu0 %v4788_v37  ;;  %v664_v55 = vshll.u32 %v595_v46, 16 }
  0x18   : > { %v645_v24 = vshrl.u32 %v593_v22, 16  ;;  %v648_v25 = vshll.u32 %v593_v22, 16  ;;  %v5511_v28 = vld [vmem:[%s6181_s30 + $0xc] sm:$0xf]  ;;  %v5512_v30 = vld [vmem:[%s6181_s30 + $0x10] sm:$0xf]  ;;  %vm6238_vm6 = vmor %vm641_vm2, %vm642_vm3 }
  0x19   : > { %v2214_v38 = vshrl.u32 %v5511_v28, 16  ;;  %v2217_v39 = vshll.u32 %v5511_v28, 16  ;;  %v2223_v40 = vshll.u32 %v5512_v30, 16  ;;  %v2227_v41 = vshrl.u32 %v5512_v30, 16  ;;  %v1315_v47 = vld [vmem:[%s6181_s30 + $0x4] sm:$0xf] }
  0x1a   : > { %v647_v42 = vrot.slane %v645_v24, 4  ;;  %v650_v43 = vrot.slane %v648_v25, 5  ;;  %v656_v44 = vrot.slane %v654_v26, 5  ;;  %v660_v45 = vrot.slane %v658_v27, 4  ;;  %v5513_v52 = vld [vmem:[%s6181_s30 + $0x14] sm:$0x1] }
  0x1b   : > { %v2216_v48 = vrot.slane %v2214_v38, 4  ;;  %v2219_v49 = vrot.slane %v2217_v39, 5  ;;  %v2225_v50 = vrot.slane %v2223_v40, 5  ;;  %v2229_v51 = vrot.slane %v2227_v41, 4  ;;  %v5925_v56 = vld [vmem:[%s6181_s30 + $0x54] sm:$0xff]  ;;  %v5929_v58 = vld [vmem:[%s6181_s30 + $0x84] sm:$0xff] }
  0x1c   : > { %v651_v53 = vor.u32 %v650_v43, %v647_v42  ;;  %v661_v54 = vor.u32 %v660_v45, %v656_v44  ;;  %v1415_v57 = vrot.slane %v1315_v47, 5  ;;  %v1314_v59 = vld [vmem:[%s6181_s30] sm:$0xe]  ;;  %v1316_v60 = vld [vmem:[%s6181_s30 + $0x8] sm:$0x1]  ;;  %v2233_v63 = vshll.u32 %v5513_v52, 16 }
  0x1d   : > { %v2220_v61 = vor.u32 %v2219_v49, %v2216_v48  ;;  %v2230_v62 = vor.u32 %v2229_v51, %v2225_v50  ;;  %v5933_v0 = vld [vmem:[%s6181_s30 + $0xb4] sm:$0xff]  ;;  %v5921_v1 = vld [vmem:[%s6181_s30 + $0x24] sm:$0xff]  ;;  %v666_v4 = vrot.slane %v664_v55, 5  ;;  %v5365_v6 = vrot.slane %v1314_v59, 9  ;;  %v596_v13 = vld [vmem:[%s6181_s30 + $0xc] sm:$0xf] }
  0x1e   : > { %v652_v2 = vrot.slane %v651_v53, 4  ;;  %v662_v3 = vrot.slane %v661_v54, 4  ;;  %v1417_v7 = vrot.slane %v1415_v57, 4  ;;  %v1418_v8 = vrot.slane %v1316_v60, 5  ;;  %v598_v39 = vld [vmem:[%s6181_s30 + $0x14] sm:$0x1] }
  0x1f   : > { %v2221_v10 = vrot.slane %v2220_v61, 4  ;;  %v2231_v11 = vrot.slane %v2230_v62, 4  ;;  %v2235_v12 = vrot.slane %v2233_v63, 5  ;;  %v672_v22 = vshll.u32 %v596_v13, 16  ;;  %v1318_v42 = vld [vmem:[%s6181_s30 + $0x10] sm:$0xf] }
  0x20   : > { %v5516_v47 = vld [vmem:[%s6181_s30 + $0x20] sm:$0x1]  ;;  %v688_v52 = vshll.u32 %v598_v39, 16  ;;  %v1317_v53 = vld [vmem:[%s6181_s30 + $0xc] sm:$0xe]  ;;  %v1422_v54 = vrot.slane %v1318_v42, 5 }
  0x21   : > { %v2226_v23 = vsel %vm6238_vm6, %v2221_v10, %v2225_v50  ;;  %v2236_v24 = vsel %vm6238_vm6, %v2231_v11, %v2235_v12  ;;  %v674_v36 = vrot.slane %v672_v22, 5  ;;  %v5934_v55 = vld [vmem:[%s6181_s30 + $0xc] sm:$0xff]  ;;  %v2257_v60 = vshll.u32 %v5516_v47, 16  ;;  %v599_v63 = vld [vmem:[%s6181_s30 + $0x18] sm:$0xf] }
  0x22   : > { %v2631_v37 = vunpack.c.l.b16 %v2226_v23  ;;  %v2632_v38 = vunpack.c.l.b16 %v2236_v24  ;;  %v5366_v62 = vrot.slane %v1317_v53, 9  ;;  %v5517_v10 = vld [vmem:[%s6181_s30 + $0x24] sm:$0xf]  ;;  %v693_v11 = vshrl.u32 %v599_v63, 16 }
  0x23   : > { %v696_v12 = vshll.u32 %v599_v63, 16  ;;  %v603_v63 = vld [vmem:[%s6181_s30 + $0x28] sm:$0xf] }
  0x24   : > { %5337 = vmatmul.msk.bf16.gmra.mxu1 %vm387_vm1, %v5923_v14  ;;  %5341 = vmatmul.msk.bf16.gmra.mxu2 %vm387_vm1, %v5927_v15  ;;  %v597_v14 = vld [vmem:[%s6181_s30 + $0x10] sm:$0xf]  ;;  %v657_v15 = vsel %vm6238_vm6, %v652_v2, %v656_v44  ;;  %v690_v2 = vrot.slane %v688_v52, 5  ;;  %v5935_v52 = vld [vmem:[%s6181_s30 + $0x18] sm:$0xff] }
  0x25   : > { %5345 = vmatmul.msk.bf16.gmra.mxu3 %vm387_vm1, %v5931_v16  ;;  %5333 = vmatmul.msk.bf16.gmra.mxu0 %vm387_vm1, %v5919_v17  ;;  %v667_v16 = vsel %vm6238_vm6, %v662_v3, %v666_v4  ;;  %v5514_v17 = vld [vmem:[%s6181_s30 + $0x18] sm:$0xf]  ;;  %v678_v25 = vshll.u32 %v597_v14, 16  ;;  %v682_v26 = vshrl.u32 %v597_v14, 16  ;;  %v1062_v31 = vunpack.c.l.b16 %v657_v15  ;;  %v5518_v15 = vld [vmem:[%s6181_s30 + $0x28] sm:$0xf] }
  0x26   : > { %v2238_v27 = vshrl.u32 %v5514_v17, 16  ;;  %v2241_v28 = vshll.u32 %v5514_v17, 16  ;;  %v1063_v32 = vunpack.c.l.b16 %v667_v16  ;;  %v1424_v3 = vrot.slane %v1422_v54, 4 }
  0x27   : > { %v680_v40 = vrot.slane %v678_v25, 5  ;;  %v684_v41 = vrot.slane %v682_v26, 4  ;;  %v1423_v17 = vsel %vm6244_vm7, %v5366_v62, %v1422_v54  ;;  %v2271_v24 = vshll.u32 %v5518_v15, 16  ;;  %v602_v62 = vld [vmem:[%s6181_s30 + $0x24] sm:$0xf] }
  0x28   : > { %v2240_v43 = vrot.slane %v2238_v27, 4  ;;  %v2243_v44 = vrot.slane %v2241_v28, 5  ;;  %v1094_v48 = vpack.c.b16 %v1063_v32, %v1062_v31  ;;  %v2275_v25 = vshrl.u32 %v5518_v15, 16  ;;  %v601_v32 = vld [vmem:[%s6181_s30 + $0x20] sm:$0x1] }
  0x29   : > { %v685_v51 = vor.u32 %v684_v41, %v680_v40  ;;  %v695_v26 = vrot.slane %v693_v11, 4  ;;  %v698_v27 = vrot.slane %v696_v12, 5  ;;  %v1561_v31 = vunpack.c.l.b16 %v1423_v17 }
  0x2a   : > { %v2277_v41 = vrot.slane %v2275_v25, 4 }
  0x2b   : > { %v699_v42 = vor.u32 %v698_v27, %v695_v26 }
  0x34   : > { %5338 = vmatmul.msk.bf16.gmra.mxu1 %vm387_vm1, %v5924_v18  ;;  %5342 = vmatmul.msk.bf16.gmra.mxu2 %vm387_vm1, %v5928_v19  ;;  %v5515_v18 = vld [vmem:[%s6181_s30 + $0x1c] sm:$0xf]  ;;  %v1416_v19 = vsel %vm6244_vm7, %v5365_v6, %v1415_v57  ;;  %v1319_v57 = vld [vmem:[%s6181_s30 + $0x14] sm:$0x1] }
  0x35   : > { %5346 = vmatmul.msk.bf16.gmra.mxu3 %vm387_vm1, %v5932_v20  ;;  %5334 = vmatmul.msk.bf16.gmra.mxu0 %vm387_vm1, %v5920_v21  ;;  %v1419_v20 = vsel %vm6244_vm7, %v1417_v7, %v1418_v8  ;;  %v669_v21 = vshrl.u32 %v596_v13, 16  ;;  %v2247_v29 = vshll.u32 %v5515_v18, 16  ;;  %v2251_v30 = vshrl.u32 %v5515_v18, 16 }
  0x36   : > { %v1559_v33 = vunpack.c.l.b16 %v1416_v19  ;;  %v1560_v34 = vunpack.c.l.b16 %v1419_v20  ;;  %v1425_v4 = vrot.slane %v1319_v57, 5  ;;  %v2259_v8 = vrot.slane %v2257_v60, 5 }
  0x37   : > { %v671_v35 = vrot.slane %v669_v21, 4  ;;  %v2249_v45 = vrot.slane %v2247_v29, 5  ;;  %v2253_v46 = vrot.slane %v2251_v30, 4  ;;  %v2262_v20 = vshrl.u32 %v5517_v10, 16 }
  0x38   : > { %v1591_v50 = vpack.c.b16 %v1560_v34, %v1559_v33  ;;  %v1426_v19 = vsel %vm6244_vm7, %v1424_v3, %v1425_v4  ;;  %v2265_v21 = vshll.u32 %v5517_v10, 16  ;;  %v5520_v3 = vld [vmem:[%s6181_s30 + $0x30] sm:$0xf]  ;;  %v5521_v4 = vld [vmem:[%s6181_s30 + $0x34] sm:$0xf]  ;;  %v730_v10 = vshrl.u32 %v603_v63, 16 }
  0x39   : > { %v675_v49 = vor.u32 %v674_v36, %v671_v35  ;;  %v2254_v59 = vor.u32 %v2253_v46, %v2249_v45  ;;  %v1562_v34 = vunpack.c.l.b16 %v1426_v19  ;;  %v1321_v35 = vld [vmem:[%s6181_s30 + $0x1c] sm:$0xf]  ;;  %v2264_v36 = vrot.slane %v2262_v20, 4  ;;  %v1320_v46 = vld [vmem:[%s6181_s30 + $0x18] sm:$0xe] }
  0x3a   : > { %v1429_v47 = vrot.slane %v1321_v35, 5  ;;  %v2286_v15 = vshrl.u32 %v5520_v3, 16  ;;  %v2295_v17 = vshll.u32 %v5521_v4, 16 }
  0x3b   : > { %v676_v61 = vrot.slane %v675_v49, 4  ;;  %v2255_v7 = vrot.slane %v2254_v59, 4  ;;  %v1592_v49 = vpack.c.b16 %v1562_v34, %v1561_v31  ;;  %v5367_v59 = vrot.slane %v1320_v46, 9 }
  0x3c   : > { %v1431_v60 = vrot.slane %v1429_v47, 4  ;;  %v2288_v31 = vrot.slane %v2286_v15, 4 }
  0x3d   : > { %v681_v16 = vsel %vm6238_vm6, %v676_v61, %v680_v40  ;;  %v2260_v23 = vsel %vm6238_vm6, %v2255_v7, %v2259_v8  ;;  %v2273_v40 = vrot.slane %v2271_v24, 5  ;;  %v720_v7 = vshll.u32 %v602_v62, 16 }
  0x3e   : > { %v1064_v30 = vunpack.c.l.b16 %v681_v16  ;;  %v2634_v39 = vunpack.c.l.b16 %v2260_v23  ;;  %v726_v8 = vshll.u32 %v603_v63, 16  ;;  %v2289_v16 = vshll.u32 %v5520_v3, 16 }
  0x3f   : > { %v2278_v54 = vor.u32 %v2277_v41, %v2273_v40  ;;  %v732_v24 = vrot.slane %v730_v10, 4 }
  0x40   : > { %v728_v23 = vrot.slane %v726_v8, 5 }
  0x44   : > { %5339 = vmatmul.msk.bf16.gmra.mxu1 %vm387_vm1, %v5925_v56  ;;  %5343 = vmatmul.msk.bf16.gmra.mxu2 %vm387_vm1, %v5929_v58  ;;  %v2663_v56 = vpack.c.b16 %v2632_v38, %v2631_v37  ;;  %v2244_v58 = vor.u32 %v2243_v44, %v2240_v43  ;;  %v2267_v37 = vrot.slane %v2265_v21, 5  ;;  %v712_v44 = vshll.u32 %v601_v32, 16 }
  0x45   : > { %5347 = vmatmul.msk.bf16.gmra.mxu3 %vm387_vm1, %v5933_v0  ;;  %5335 = vmatmul.msk.bf16.gmra.mxu0 %vm387_vm1, %v5921_v1  ;;  %v600_v0 = vld [vmem:[%s6181_s30 + $0x1c] sm:$0xf]  ;;  %v686_v1 = vrot.slane %v685_v51, 4  ;;  %v2291_v32 = vrot.slane %v2289_v16, 5 }
  0x46   : > { %v2245_v6 = vrot.slane %v2244_v58, 4  ;;  %v702_v13 = vshll.u32 %v600_v0, 16  ;;  %v706_v14 = vshrl.u32 %v600_v0, 16  ;;  %v2268_v51 = vor.u32 %v2267_v37, %v2264_v36  ;;  %v5522_v37 = vld [vmem:[%s6181_s30 + $0x38] sm:$0x1] }
  0x47   : > { %v691_v18 = vsel %vm6238_vm6, %v686_v1, %v690_v2  ;;  %v714_v58 = vrot.slane %v712_v44, 5  ;;  %v2279_v1 = vrot.slane %v2278_v54, 4  ;;  %v1323_v44 = vld [vmem:[%s6181_s30 + $0x24] sm:$0xe]  ;;  %v2292_v46 = vor.u32 %v2291_v32, %v2288_v31 }
  0x48   : > { %v2250_v22 = vsel %vm6238_vm6, %v2245_v6, %v2249_v45  ;;  %v6292_v28 = vrot.slane %v702_v13, 5  ;;  %v708_v29 = vrot.slane %v706_v14, 4  ;;  %v1065_v33 = vunpack.c.l.b16 %v691_v18  ;;  %v5519_v45 = vld [vmem:[%s6181_s30 + $0x2c] sm:$0x1] }
  0x49   : > { %v2633_v38 = vunpack.c.l.b16 %v2250_v22  ;;  %v2269_v0 = vrot.slane %v2268_v51, 4  ;;  %v717_v6 = vshrl.u32 %v602_v62, 16  ;;  %v1430_v13 = vsel %vm6244_vm7, %v5367_v59, %v1429_v47 }
  0x4a   : > { %v709_v43 = vor.u32 %v708_v29, %v6292_v28  ;;  %v2299_v18 = vshrl.u32 %v5521_v4, 16  ;;  %v722_v22 = vrot.slane %v720_v7, 5  ;;  %v1563_v27 = vunpack.c.l.b16 %v1430_v13  ;;  %v604_v29 = vld [vmem:[%s6181_s30 + $0x2c] sm:$0x1] }
  0x4b   : > { %v2664_v53 = vpack.c.b16 %v2634_v39, %v2633_v38  ;;  %v2274_v19 = vsel %vm6238_vm6, %v2269_v0, %v2273_v40  ;;  %v719_v21 = vrot.slane %v717_v6, 4  ;;  %v733_v39 = vor.u32 %v732_v24, %v728_v23  ;;  %v5523_v0 = vld [vmem:[%s6181_s30 + $0x3c] sm:$0xf]  ;;  %v607_v24 = vld [vmem:[%s6181_s30 + $0x38] sm:$0x1] }
  0x4c   : > { %v710_v57 = vrot.slane %v709_v43, 4  ;;  %v2301_v34 = vrot.slane %v2299_v18, 4  ;;  %v2635_v35 = vunpack.c.l.b16 %v2274_v19  ;;  %v736_v40 = vshll.u32 %v604_v29, 16 }
  0x4d   : > { %v723_v38 = vor.u32 %v722_v22, %v719_v21  ;;  %v5368_v54 = vrot.slane %v1323_v44, 9  ;;  %v2313_v13 = vshll.u32 %v5523_v0, 16 }
  0x4e   : > { %v715_v12 = vsel %vm6238_vm6, %v710_v57, %v714_v58  ;;  %v2293_v57 = vrot.slane %v2292_v46, 4  ;;  %v608_v46 = vld [vmem:[%s6181_s30 + $0x3c] sm:$0xf] }
  0x4f   : > { %v1067_v26 = vunpack.c.l.b16 %v715_v12  ;;  %v724_v51 = vrot.slane %v723_v38, 4  ;;  %v2310_v12 = vshrl.u32 %v5523_v0, 16  ;;  %v1326_v38 = vld [vmem:[%s6181_s30 + $0x30] sm:$0xe] }
  0x51   : > { %v729_v62 = vsel %vm6238_vm6, %v724_v51, %v728_v23  ;;  %v2312_v29 = vrot.slane %v2310_v12, 4 }
  0x52   : > { %v1068_v16 = vunpack.c.l.b16 %v729_v62  ;;  %v5527_v62 = vld [vmem:[%s6181_s30 + $0x4c] sm:$0xf] }
  0x53   : > { %v2347_v12 = vshrl.u32 %v5527_v62, 16 }
  0x54   : > { %5349 = vmatmul.msk.bf16.vlgmr.msrb.gmra.mxu1 %vm387_vm1, %v1094_v48  ;;  %5382 = vmatmul.msk.bf16.vlgmr.msrb.gmra.mxu2 %vm387_vm1, %v1591_v50  ;;  %v1095_v48 = vpack.c.b16 %v1065_v33, %v1064_v30  ;;  %v1322_v50 = vld [vmem:[%s6181_s30 + $0x20] sm:$0x1]  ;;  %v1324_v30 = vld [vmem:[%s6181_s30 + $0x28] sm:$0xf]  ;;  %v2297_v33 = vrot.slane %v2295_v17, 5 }
  0x55   : > { %5495 = vmatmul.msk.bf16.vlgmr.msrb.gmra.mxu3 %vm387_vm1, %v5934_v55  ;;  %5560 = vmatmul.msk.bf16.vlgmr.msrb.gmra.mxu0 %vm387_vm1, %v2663_v56  ;;  %v2281_v55 = vshll.u32 %v5519_v45, 16  ;;  %v700_v56 = vrot.slane %v699_v42, 4  ;;  %v1432_v61 = vrot.slane %v1322_v50, 5  ;;  %v1436_v42 = vrot.slane %v1324_v30, 5  ;;  %v1325_v45 = vld [vmem:[%s6181_s30 + $0x2c] sm:$0x1] }
  0x56   : > { %v2302_v47 = vor.u32 %v2301_v34, %v2297_v33  ;;  %v2298_v7 = vsel %vm6238_vm6, %v2293_v57, %v2297_v33  ;;  %v2315_v30 = vrot.slane %v2313_v13, 5  ;;  %v765_v57 = vshrl.u32 %v608_v46, 16 }
  0x57   : > { %v2283_v2 = vrot.slane %v2281_v55, 5  ;;  %v705_v11 = vsel %vm6238_vm6, %v700_v56, %v6292_v28  ;;  %v1433_v14 = vsel %vm6244_vm7, %v1431_v60, %v1432_v61  ;;  %v1438_v55 = vrot.slane %v1436_v42, 4  ;;  %v605_v60 = vld [vmem:[%s6181_s30 + $0x30] sm:$0xf]  ;;  %v606_v61 = vld [vmem:[%s6181_s30 + $0x34] sm:$0xf] }
  0x58   : > { %v1066_v25 = vunpack.c.l.b16 %v705_v11  ;;  %v1564_v28 = vunpack.c.l.b16 %v1433_v14  ;;  %v1439_v56 = vrot.slane %v1325_v45, 5  ;;  %v2303_v58 = vrot.slane %v2302_v47, 4 }
  0x59   : > { %v2284_v20 = vsel %vm6238_vm6, %v2279_v1, %v2283_v2  ;;  %v5524_v1 = vld [vmem:[%s6181_s30 + $0x40] sm:$0xf]  ;;  %v1437_v2 = vsel %vm6244_vm7, %v5368_v54, %v1436_v42  ;;  %v741_v4 = vshrl.u32 %v605_v60, 16  ;;  %v744_v6 = vshll.u32 %v605_v60, 16 }
  0x5a   : > { %v2636_v36 = vunpack.c.l.b16 %v2284_v20  ;;  %v1096_v41 = vpack.c.b16 %v1067_v26, %v1066_v25  ;;  %v1593_v43 = vpack.c.b16 %v1564_v28, %v1563_v27  ;;  %v1440_v3 = vsel %vm6244_vm7, %v1438_v55, %v1439_v56  ;;  %v1327_v27 = vld [vmem:[%s6181_s30 + $0x34] sm:$0xf]  ;;  %v5525_v28 = vld [vmem:[%s6181_s30 + $0x44] sm:$0x1]  ;;  %v609_v54 = vld [vmem:[%s6181_s30 + $0x40] sm:$0xf] }
  0x5b   : > { %v750_v10 = vshll.u32 %v606_v61, 16  ;;  %v754_v11 = vshrl.u32 %v606_v61, 16  ;;  %v2319_v14 = vshll.u32 %v5524_v1, 16  ;;  %v2323_v15 = vshrl.u32 %v5524_v1, 16  ;;  %v5526_v61 = vld [vmem:[%s6181_s30 + $0x48] sm:$0xf] }
  0x5c   : > { %v2665_v50 = vpack.c.b16 %v2636_v36, %v2635_v35  ;;  %v1565_v18 = vunpack.c.l.b16 %v1437_v2  ;;  %v1566_v19 = vunpack.c.l.b16 %v1440_v3  ;;  %v743_v20 = vrot.slane %v741_v4, 4 }
  0x5d   : > { %v746_v21 = vrot.slane %v744_v6, 5  ;;  %v2637_v22 = vunpack.c.l.b16 %v2298_v7  ;;  %v752_v25 = vrot.slane %v750_v10, 5  ;;  %v756_v26 = vrot.slane %v754_v11, 4 }
  0x5e   : > { %v2321_v31 = vrot.slane %v2319_v14, 5  ;;  %v2325_v32 = vrot.slane %v2323_v15, 4  ;;  %v760_v35 = vshll.u32 %v607_v24, 16  ;;  %v1594_v36 = vpack.c.b16 %v1566_v19, %v1565_v18  ;;  %v610_v19 = vld [vmem:[%s6181_s30 + $0x44] sm:$0x1] }
  0x5f   : > { %v747_v34 = vor.u32 %v746_v21, %v743_v20  ;;  %v2316_v44 = vor.u32 %v2315_v30, %v2312_v29  ;;  %v778_v60 = vshrl.u32 %v609_v54, 16  ;;  %v767_v6 = vrot.slane %v765_v57, 4  ;;  %v1330_v20 = vld [vmem:[%s6181_s30 + $0x40] sm:$0xf]  ;;  %v1329_v24 = vld [vmem:[%s6181_s30 + $0x3c] sm:$0xe] }
  0x60   : > { %v2326_v45 = vor.u32 %v2325_v32, %v2321_v31  ;;  %v2337_v10 = vshll.u32 %v5526_v61, 16  ;;  %v2343_v11 = vshll.u32 %v5527_v62, 16  ;;  %v2349_v29 = vrot.slane %v2347_v12, 4 }
  0x61   : > { %v748_v47 = vrot.slane %v747_v34, 4  ;;  %v2317_v55 = vrot.slane %v2316_v44, 4  ;;  %v780_v14 = vrot.slane %v778_v60, 4  ;;  %v1450_v32 = vrot.slane %v1330_v20, 5 }
  0x62   : > { %v2327_v56 = vrot.slane %v2326_v45, 4 }
  0x63   : > { %v2322_v3 = vsel %vm6238_vm6, %v2317_v55, %v2321_v31  ;;  %v784_v31 = vshll.u32 %v610_v19, 16  ;;  %v5530_v55 = vld [vmem:[%s6181_s30 + $0x58] sm:$0xf] }
  0x64   : > { %5350 = vmatmul.msk.bf16.gmra.mxu1 %vm387_vm1, %v1095_v48  ;;  %5383 = vmatmul.msk.bf16.gmra.mxu2 %vm387_vm1, %v1592_v49  ;;  %v2305_v48 = vshll.u32 %v5522_v37, 16  ;;  %v5936_v49 = vld [vmem:[%s6181_s30 + $0x24] sm:$0xff]  ;;  %v757_v37 = vor.u32 %v756_v26, %v752_v25  ;;  %v2639_v21 = vunpack.c.l.b16 %v2322_v3 }
  0x65   : > { %5496 = vmatmul.msk.bf16.gmra.mxu3 %vm387_vm1, %v5935_v52  ;;  %5561 = vmatmul.msk.bf16.gmra.mxu0 %vm387_vm1, %v2664_v53  ;;  %v734_v52 = vrot.slane %v733_v39, 4  ;;  %v738_v53 = vrot.slane %v736_v40, 5  ;;  %v1443_v39 = vrot.slane %v1327_v27, 5  ;;  %v2329_v40 = vshll.u32 %v5525_v28, 16 }
  0x66   : > { %v2307_v59 = vrot.slane %v2305_v48, 5  ;;  %v762_v48 = vrot.slane %v760_v35, 5  ;;  %v2339_v27 = vrot.slane %v2337_v10, 5  ;;  %v6378_v28 = vrot.slane %v2343_v11, 5  ;;  %v1331_v35 = vld [vmem:[%s6181_s30 + $0x44] sm:$0x1] }
  0x67   : > { %v739_v63 = vsel %vm6238_vm6, %v734_v52, %v738_v53  ;;  %v1445_v51 = vrot.slane %v1443_v39, 4  ;;  %v2331_v53 = vrot.slane %v2329_v40, 5  ;;  %v5370_v40 = vrot.slane %v1329_v24, 9 }
  0x68   : > { %v2308_v8 = vsel %vm6238_vm6, %v2303_v58, %v2307_v59  ;;  %v1069_v17 = vunpack.c.l.b16 %v739_v63  ;;  %v768_v58 = vshll.u32 %v608_v46, 16  ;;  %v774_v59 = vshll.u32 %v609_v54, 16  ;;  %v5529_v54 = vld [vmem:[%s6181_s30 + $0x54] sm:$0xf] }
  0x69   : > { %v2638_v23 = vunpack.c.l.b16 %v2308_v8  ;;  %v753_v63 = vsel %vm6238_vm6, %v748_v47, %v752_v25  ;;  %v2332_v4 = vsel %vm6238_vm6, %v2327_v56, %v2331_v53  ;;  %v2334_v8 = vshrl.u32 %v5526_v61, 16  ;;  %v5528_v25 = vld [vmem:[%s6181_s30 + $0x50] sm:$0x1] }
  0x6a   : > { %v1097_v33 = vpack.c.b16 %v1069_v17, %v1068_v16  ;;  %v770_v7 = vrot.slane %v768_v58, 5  ;;  %v776_v13 = vrot.slane %v774_v59, 5  ;;  %v1070_v15 = vunpack.c.l.b16 %v753_v63 }
  0x6b   : > { %v2666_v42 = vpack.c.b16 %v2638_v23, %v2637_v22  ;;  %v2640_v22 = vunpack.c.l.b16 %v2332_v4  ;;  %v2336_v26 = vrot.slane %v2334_v8, 4  ;;  %v2350_v44 = vor.u32 %v2349_v29, %v6378_v28 }
  0x6c   : > { %v771_v23 = vor.u32 %v770_v7, %v767_v6  ;;  %v781_v30 = vor.u32 %v780_v14, %v776_v13  ;;  %v786_v46 = vrot.slane %v784_v31, 5  ;;  %v1452_v47 = vrot.slane %v1450_v32, 4 }
  0x6d   : > { %v2351_v57 = vrot.slane %v2350_v44, 4  ;;  %v2361_v3 = vshll.u32 %v5529_v54, 16  ;;  %v2367_v4 = vshll.u32 %v5530_v55, 16  ;;  %v2371_v6 = vshrl.u32 %v5530_v55, 16 }
  0x6e   : > { %v782_v45 = vrot.slane %v781_v30, 4 }
  0x6f   : > { %v6418_v24 = vrot.slane %v2367_v4, 5 }
  0x70   : > { %v787_v61 = vsel %vm6238_vm6, %v782_v45, %v786_v46  ;;  %v5939_v45 = vld [vmem:[%s6181_s30 + $0x48] sm:$0xff] }
  0x74   : > { %5351 = vmatmul.msk.bf16.gmra.mxu1 %vm387_vm1, %v1096_v41  ;;  %5384 = vmatmul.msk.bf16.gmra.mxu2 %vm387_vm1, %v1593_v43  ;;  %v5937_v41 = vld [vmem:[%s6181_s30 + $0x30] sm:$0xff]  ;;  %v1328_v43 = vld [vmem:[%s6181_s30 + $0x38] sm:$0x1] }
  0x75   : > { %5497 = vmatmul.msk.bf16.gmra.mxu3 %vm387_vm1, %v5936_v49  ;;  %5562 = vmatmul.msk.bf16.gmra.mxu0 %vm387_vm1, %v2665_v50  ;;  %v5369_v49 = vrot.slane %v1326_v38, 9  ;;  %v758_v50 = vrot.slane %v757_v37, 4  ;;  %v1446_v52 = vrot.slane %v1328_v43, 5  ;;  %v5938_v37 = vld [vmem:[%s6181_s30 + $0x3c] sm:$0xff]  ;;  %v2667_v38 = vpack.c.b16 %v2640_v22, %v2639_v21  ;;  %v1333_v21 = vld [vmem:[%s6181_s30 + $0x4c] sm:$0xf] }
  0x76   : > { %v2340_v43 = vor.u32 %v2339_v27, %v2336_v26 }
  0x77   : > { %v763_v0 = vsel %vm6238_vm6, %v758_v50, %v762_v48  ;;  %v1444_v1 = vsel %vm6244_vm7, %v5369_v49, %v1443_v39  ;;  %v1447_v2 = vsel %vm6244_vm7, %v1445_v51, %v1446_v52  ;;  %v772_v39 = vrot.slane %v771_v23, 4  ;;  %v611_v49 = vld [vmem:[%s6181_s30 + $0x48] sm:$0xf]  ;;  %v612_v50 = vld [vmem:[%s6181_s30 + $0x4c] sm:$0xf] }
  0x78   : > { %v1071_v16 = vunpack.c.l.b16 %v763_v0  ;;  %v1567_v17 = vunpack.c.l.b16 %v1444_v1  ;;  %v1568_v18 = vunpack.c.l.b16 %v1447_v2  ;;  %v1453_v48 = vrot.slane %v1331_v35, 5 }
  0x79   : > { %v777_v51 = vsel %vm6238_vm6, %v772_v39, %v776_v13  ;;  %v1451_v52 = vsel %vm6244_vm7, %v5370_v40, %v1450_v32  ;;  %v2341_v56 = vrot.slane %v2340_v43, 4  ;;  %v789_v58 = vshrl.u32 %v611_v49, 16  ;;  %v1334_v39 = vld [vmem:[%s6181_s30 + $0x50] sm:$0x1] }
  0x7a   : > { %v1595_v34 = vpack.c.b16 %v1568_v18, %v1567_v17  ;;  %v792_v59 = vshll.u32 %v611_v49, 16  ;;  %v1454_v62 = vsel %vm6244_vm7, %v1452_v47, %v1453_v48  ;;  %v798_v63 = vshll.u32 %v612_v50, 16  ;;  %v613_v18 = vld [vmem:[%s6181_s30 + $0x50] sm:$0x1] }
  0x7b   : > { %v802_v0 = vshrl.u32 %v612_v50, 16  ;;  %v2358_v2 = vshrl.u32 %v5529_v54, 16  ;;  %v1072_v8 = vunpack.c.l.b16 %v777_v51  ;;  %v1569_v10 = vunpack.c.l.b16 %v1451_v52 }
  0x7c   : > { %v2346_v12 = vsel %vm6238_vm6, %v2341_v56, %v6378_v28  ;;  %v791_v14 = vrot.slane %v789_v58, 4  ;;  %v1570_v17 = vunpack.c.l.b16 %v1454_v62  ;;  %v800_v19 = vrot.slane %v798_v63, 5  ;;  %v5531_v28 = vld [vmem:[%s6181_s30 + $0x5c] sm:$0x1]  ;;  %v615_v58 = vld [vmem:[%s6181_s30 + $0x58] sm:$0xf] }
  0x7d   : > { %v804_v20 = vrot.slane %v802_v0, 4  ;;  %v2360_v22 = vrot.slane %v2358_v2, 4  ;;  %v2363_v23 = vrot.slane %v2361_v3, 5  ;;  %v2641_v26 = vunpack.c.l.b16 %v2346_v12  ;;  %v5532_v62 = vld [vmem:[%s6181_s30 + $0x60] sm:$0xf] }
  0x7e   : > { %v1457_v35 = vrot.slane %v1333_v21, 5  ;;  %v2377_v43 = vshll.u32 %v5531_v28, 16  ;;  %v5533_v63 = vld [vmem:[%s6181_s30 + $0x64] sm:$0xf] }
  0x7f   : > { %v805_v32 = vor.u32 %v804_v20, %v800_v19  ;;  %v2364_v40 = vor.u32 %v2363_v23, %v2360_v22 }
  0x80   : > { %v1459_v52 = vrot.slane %v1457_v35, 4  ;;  %v2379_v56 = vrot.slane %v2377_v43, 5 }
  0x81   : > { %v806_v50 = vrot.slane %v805_v32, 4  ;;  %v2365_v54 = vrot.slane %v2364_v40, 4 }
  0x84   : > { %5352 = vmatmul.msk.bf16.gmra.mxu1 %vm387_vm1, %v1097_v33  ;;  %5385 = vmatmul.msk.bf16.gmra.mxu2 %vm387_vm1, %v1594_v36  ;;  %v1098_v33 = vpack.c.b16 %v1071_v16, %v1070_v15  ;;  %v794_v15 = vrot.slane %v792_v59, 5  ;;  %v1073_v16 = vunpack.c.l.b16 %v787_v61 }
  0x85   : > { %5498 = vmatmul.msk.bf16.gmra.mxu3 %vm387_vm1, %v5937_v41  ;;  %5563 = vmatmul.msk.bf16.gmra.mxu0 %vm387_vm1, %v2666_v42  ;;  %v2353_v41 = vshll.u32 %v5528_v25, 16  ;;  %v2373_v25 = vrot.slane %v2371_v6, 4 }
  0x86   : > { %v795_v29 = vor.u32 %v794_v15, %v791_v14  ;;  %v1099_v31 = vpack.c.b16 %v1073_v16, %v1072_v8  ;;  %v826_v14 = vshrl.u32 %v615_v58, 16  ;;  %v2382_v16 = vshrl.u32 %v5532_v62, 16 }
  0x87   : > { %v2355_v53 = vrot.slane %v2353_v41, 5  ;;  %v2374_v41 = vor.u32 %v2373_v25, %v6418_v24 }
  0x88   : > { %v796_v48 = vrot.slane %v795_v29, 4  ;;  %v616_v29 = vld [vmem:[%s6181_s30 + $0x5c] sm:$0x1]  ;;  %v828_v32 = vrot.slane %v826_v14, 4 }
  0x89   : > { %v2356_v13 = vsel %vm6238_vm6, %v2351_v57, %v2355_v53  ;;  %v1460_v53 = vrot.slane %v1334_v39, 5  ;;  %v2375_v55 = vrot.slane %v2374_v41, 4  ;;  %v614_v57 = vld [vmem:[%s6181_s30 + $0x54] sm:$0xf] }
  0x8a   : > { %v2642_v27 = vunpack.c.l.b16 %v2356_v13  ;;  %v801_v59 = vsel %vm6238_vm6, %v796_v48, %v800_v19  ;;  %v813_v4 = vshrl.u32 %v614_v57, 16  ;;  %v816_v6 = vshll.u32 %v614_v57, 16  ;;  %v1337_v57 = vld [vmem:[%s6181_s30 + $0x5c] sm:$0x1] }
  0x8b   : > { %v1461_v3 = vsel %vm6244_vm7, %v1459_v52, %v1460_v53  ;;  %v2380_v12 = vsel %vm6238_vm6, %v2375_v55, %v2379_v56  ;;  %v822_v13 = vshll.u32 %v615_v58, 16  ;;  %v2395_v19 = vshrl.u32 %v5533_v63, 16  ;;  %v5940_v55 = vld [vmem:[%s6181_s30 + $0x54] sm:$0xff] }
  0x8c   : > { %v2668_v46 = vpack.c.b16 %v2642_v27, %v2641_v26  ;;  %v1074_v21 = vunpack.c.l.b16 %v801_v59  ;;  %v815_v25 = vrot.slane %v813_v4, 4  ;;  %v818_v26 = vrot.slane %v816_v6, 5 }
  0x8d   : > { %v2644_v28 = vunpack.c.l.b16 %v2380_v12  ;;  %v2397_v40 = vrot.slane %v2395_v19, 4 }
  0x91   : > { %v6381_v36 = vpop.f32.mrf.mxu1 }
  0x92   : > { %v6384_v42 = vpop.f32.mrf.mxu0 }
  0x94   : > { %5353 = vmatmul.msk.bf16.gmra.mxu1 %vm387_vm1, %v1098_v33  ;;  %5386 = vmatmul.msk.bf16.gmra.mxu2 %vm387_vm1, %v1595_v34  ;;  %v808_v33 = vshll.u32 %v613_v18, 16  ;;  %v1332_v34 = vld [vmem:[%s6181_s30 + $0x48] sm:$0xe]  ;;  %v2391_v18 = vshll.u32 %v5533_v63, 16 }
  0x95   : > { %5499 = vmatmul.msk.bf16.gmra.mxu3 %vm387_vm1, %v5938_v37  ;;  %5564 = vmatmul.msk.bf16.gmra.mxu0 %vm387_vm1, %v2667_v38  ;;  %v1596_v38 = vpack.c.b16 %v1570_v17, %v1569_v10  ;;  %v5371_v49 = vrot.slane %v1332_v34, 9  ;;  %v2370_v10 = vsel %vm6238_vm6, %v2365_v54, %v6418_v24  ;;  %v2385_v17 = vshll.u32 %v5532_v62, 16  ;;  %v5534_v34 = vld [vmem:[%s6181_s30 + $0x68] sm:$0x1]  ;;  %v617_v62 = vld [vmem:[%s6181_s30 + $0x60] sm:$0xf] }
  0x96   : > { %v810_v51 = vrot.slane %v808_v33, 5  ;;  %v1572_v24 = vunpack.c.l.b16 %v1461_v3  ;;  %v2643_v27 = vunpack.c.l.b16 %v2370_v10  ;;  %v1336_v33 = vld [vmem:[%s6181_s30 + $0x58] sm:$0xf]  ;;  %v6467_v39 = vrot.slane %v2391_v18, 5 }
  0x97   : > { %v6399_v60 = vpop.f32.mrf.mxu2  ;;  %v1458_v61 = vsel %vm6244_vm7, %v5371_v49, %v1457_v35  ;;  %v2384_v35 = vrot.slane %v2382_v16, 4  ;;  %v1464_v52 = vrot.slane %v1336_v33, 5  ;;  %v2401_v53 = vshll.u32 %v5534_v34, 16 }
  0x98   : > { %v6405_v1 = vpop.f32.mrf.mxu3  ;;  %v811_v2 = vsel %vm6238_vm6, %v806_v50, %v810_v51  ;;  %v1571_v22 = vunpack.c.l.b16 %v1458_v61  ;;  %v1335_v51 = vld [vmem:[%s6181_s30 + $0x54] sm:$0xe]  ;;  %v2669_v56 = vpack.c.b16 %v2644_v28, %v2643_v27  ;;  %v2398_v59 = vor.u32 %v2397_v40, %v6467_v39 }
  0x99   : > { %v6407_v7 = vpop.f32.mrf.mxu1  ;;  %v1075_v23 = vunpack.c.l.b16 %v811_v2  ;;  %v5372_v3 = vrot.slane %v1335_v51, 9  ;;  %v1466_v6 = vrot.slane %v1464_v52, 4  ;;  %v1467_v10 = vrot.slane %v1337_v57, 5 }
  0x9a   : > { %v6409_v11 = vpop.f32.mrf.mxu0  ;;  %v1597_v49 = vpack.c.b16 %v1572_v24, %v1571_v22  ;;  %v2403_v12 = vrot.slane %v2401_v53, 5  ;;  %v2399_v16 = vrot.slane %v2398_v59, 4  ;;  %v840_v18 = vshll.u32 %v617_v62, 16  ;;  %v5536_v24 = vld [vmem:[%s6181_s30 + $0x70] sm:$0xf] }
  0x9b   : > { %v1100_v43 = vpack.c.b16 %v1075_v23, %v1074_v21  ;;  %v5535_v23 = vld [vmem:[%s6181_s30 + $0x6c] sm:$0xf]  ;;  %v1465_v28 = vsel %vm6244_vm7, %v5372_v3, %v1464_v52 }
  0x9c   : > { %v2406_v40 = vshrl.u32 %v5535_v23, 16 }
  0x9f   : > { %v6421_v30 = vpop.f32.mrf.mxu2 }
  0xa0   : > { %v6424_v37 = vpop.f32.mrf.mxu3 }
  0xa1   : > { %v6428_v44 = vpop.f32.mrf.mxu1 }
  0xa2   : > { %v6431_v47 = vpop.f32.mrf.mxu0 }
  0xa4   : > { %5354 = vmatmul.msk.bf16.gmra.mxu1 %vm387_vm1, %v1099_v31  ;;  %5387 = vmatmul.msk.bf16.gmra.mxu2 %vm387_vm1, %v1596_v38  ;;  %v6463_v31 = vrot.slane %v822_v13, 5  ;;  %v2387_v38 = vrot.slane %v2385_v17, 5  ;;  %v618_v13 = vld [vmem:[%s6181_s30 + $0x64] sm:$0xf]  ;;  %v837_v17 = vshrl.u32 %v617_v62, 16 }
  0xa5   : > { %5500 = vmatmul.msk.bf16.gmra.mxu3 %vm387_vm1, %v5939_v45  ;;  %5565 = vmatmul.msk.bf16.gmra.mxu0 %vm387_vm1, %v2668_v46  ;;  %v819_v45 = vor.u32 %v818_v26, %v815_v25  ;;  %v832_v46 = vshll.u32 %v616_v29, 16  ;;  %v846_v21 = vshll.u32 %v618_v13, 16  ;;  %v850_v22 = vshrl.u32 %v618_v13, 16  ;;  %v1338_v62 = vld [vmem:[%s6181_s30 + $0x60] sm:$0xe] }
  0xa6   : > { %v829_v50 = vor.u32 %v828_v32, %v6463_v31  ;;  %v2388_v58 = vor.u32 %v2387_v38, %v2384_v35  ;;  %v1468_v29 = vsel %vm6244_vm7, %v1466_v6, %v1467_v10  ;;  %v839_v34 = vrot.slane %v837_v17, 4 }
  0xa7   : > { %v6445_v0 = vpop.f32.mrf.mxu2  ;;  %v820_v63 = vrot.slane %v819_v45, 4  ;;  %v834_v2 = vrot.slane %v832_v46, 5  ;;  %v842_v35 = vrot.slane %v840_v18, 5  ;;  %v2415_v45 = vshll.u32 %v5536_v24, 16 }
  0xa8   : > { %v6451_v8 = vpop.f32.mrf.mxu3  ;;  %v830_v4 = vrot.slane %v829_v50, 4  ;;  %v2389_v14 = vrot.slane %v2388_v58, 4  ;;  %v2419_v46 = vshrl.u32 %v5536_v24, 16  ;;  %v852_v50 = vrot.slane %v850_v22, 4 }
  0xa9   : > { %7475 = vst [vmem:[#allocation3_spill] sm:$0xff] %v6451_v8  ;;  %v6458_v15 = vpop.f32.mrf.mxu1  ;;  %v825_v26 = vsel %vm6238_vm6, %v820_v63, %v6463_v31  ;;  %v2404_v31 = vsel %vm6238_vm6, %v2399_v16, %v2403_v12  ;;  %v1574_v53 = vunpack.c.l.b16 %v1468_v29  ;;  %v843_v59 = vor.u32 %v842_v35, %v839_v34  ;;  %v5537_v63 = vld [vmem:[%s6181_s30 + $0x74] sm:$0x1] }
  0xaa   : > { %v6460_v20 = vpop.f32.mrf.mxu0  ;;  %v835_v27 = vsel %vm6238_vm6, %v830_v4, %v834_v2  ;;  %v2394_v33 = vsel %vm6238_vm6, %v2389_v14, %v6467_v39  ;;  %v1076_v51 = vunpack.c.l.b16 %v825_v26  ;;  %v1573_v39 = vunpack.c.l.b16 %v1465_v28 }
  0xab   : > { %v1077_v52 = vunpack.c.l.b16 %v835_v27  ;;  %v2645_v57 = vunpack.c.l.b16 %v2394_v33  ;;  %v2646_v58 = vunpack.c.l.b16 %v2404_v31  ;;  %v2408_v2 = vrot.slane %v2406_v40, 4 }
  0xac   : > { %v6518_v4 = vrot.slane %v2415_v45, 5  ;;  %v2421_v6 = vrot.slane %v2419_v46, 4  ;;  %v1598_v18 = vpack.c.b16 %v1574_v53, %v1573_v39  ;;  %v844_v26 = vrot.slane %v843_v59, 4  ;;  %v620_v45 = vld [vmem:[%s6181_s30 + $0x6c] sm:$0xf] }
  0xad   : > { %v1101_v17 = vpack.c.b16 %v1077_v52, %v1076_v51  ;;  %v2670_v24 = vpack.c.b16 %v2646_v58, %v2645_v57  ;;  %v5373_v27 = vrot.slane %v1338_v62, 9  ;;  %v2425_v28 = vshll.u32 %v5537_v63, 16  ;;  %v621_v46 = vld [vmem:[%s6181_s30 + $0x70] sm:$0xf]  ;;  %v5538_v39 = vld [vmem:[%s6181_s30 + $0x78] sm:$0xf] }
  0xae   : > { %v2422_v31 = vor.u32 %v2421_v6, %v6518_v4  ;;  %v5539_v53 = vld [vmem:[%s6181_s30 + $0x7c] sm:$0xf]  ;;  %v861_v57 = vshrl.u32 %v620_v45, 16  ;;  %v864_v58 = vshll.u32 %v620_v45, 16  ;;  %v2430_v6 = vshrl.u32 %v5538_v39, 16 }
  0xaf   : > { %v6469_v41 = vpop.f32.mrf.mxu2  ;;  %v2427_v52 = vrot.slane %v2425_v28, 5 }
  0xb0   : > { %v6471_v48 = vpop.f32.mrf.mxu3  ;;  %v866_v28 = vrot.slane %v864_v58, 5  ;;  %v2432_v45 = vrot.slane %v2430_v6, 4 }
  0xb1   : > { %7476 = vst [vmem:[#allocation4_spill] sm:$0xff] %v6471_v48  ;;  %v6475_v54 = vpop.f32.mrf.mxu1  ;;  %v1346_v48 = vld [vmem:[%s6181_s30 + $0x80] sm:$0x1] }
  0xb2   : > { %v6480_v61 = vpop.f32.mrf.mxu0 }
  0xb4   : > { %5355 = vmatmul.msk.bf16.gmra.mxu1 %vm387_vm1, %v1100_v43  ;;  %5388 = vmatmul.msk.bf16.gmra.mxu2 %vm387_vm1, %v1597_v49  ;;  %v2409_v43 = vshll.u32 %v5535_v23, 16  ;;  %v6512_v49 = vrot.slane %v846_v21, 5  ;;  %v1340_v21 = vld [vmem:[%s6181_s30 + $0x68] sm:$0x1]  ;;  %v5941_v23 = vld [vmem:[%s6181_s30 + $0x60] sm:$0xff] }
  0xb5   : > { %5501 = vmatmul.msk.bf16.gmra.mxu3 %vm387_vm1, %v5940_v55  ;;  %5566 = vmatmul.msk.bf16.gmra.mxu0 %vm387_vm1, %v2669_v56  ;;  %v619_v55 = vld [vmem:[%s6181_s30 + $0x68] sm:$0x1]  ;;  %v1339_v56 = vld [vmem:[%s6181_s30 + $0x64] sm:$0xf] }
  0xb6   : > { %v2411_v3 = vrot.slane %v2409_v43, 5  ;;  %v853_v12 = vor.u32 %v852_v50, %v6512_v49  ;;  %v856_v13 = vshll.u32 %v619_v55, 16  ;;  %v1471_v14 = vrot.slane %v1339_v56, 5 }
  0xb7   : > { %v6488_v19 = vpop.f32.mrf.mxu2  ;;  %v1474_v43 = vrot.slane %v1340_v21, 5  ;;  %v849_v50 = vsel %vm6238_vm6, %v844_v26, %v6512_v49  ;;  %v2423_v56 = vrot.slane %v2422_v31, 4  ;;  %v874_v49 = vshrl.u32 %v621_v46, 16 }
  0xb8   : > { %v6492_v25 = vpop.f32.mrf.mxu3  ;;  %v2412_v33 = vor.u32 %v2411_v3, %v2408_v2  ;;  %v854_v34 = vrot.slane %v853_v12, 4  ;;  %v858_v35 = vrot.slane %v856_v13, 5  ;;  %v1473_v40 = vrot.slane %v1471_v14, 4 }
  0xb9   : > { %7477 = vst [vmem:[#allocation5_spill] sm:$0xff] %v6492_v25  ;;  %v6503_v32 = vpop.f32.mrf.mxu1  ;;  %v1472_v51 = vsel %vm6244_vm7, %v5373_v27, %v1471_v14  ;;  %v870_v2 = vshll.u32 %v621_v46, 16  ;;  %v2433_v12 = vshll.u32 %v5538_v39, 16  ;;  %v2439_v13 = vshll.u32 %v5539_v53, 16 }
  0xba   : > { %v6510_v38 = vpop.f32.mrf.mxu0  ;;  %v2413_v55 = vrot.slane %v2412_v33, 4  ;;  %v859_v62 = vsel %vm6238_vm6, %v854_v34, %v858_v35  ;;  %v1475_v63 = vsel %vm6244_vm7, %v1473_v40, %v1474_v43  ;;  %v2443_v14 = vshrl.u32 %v5539_v53, 16  ;;  %v622_v34 = vld [vmem:[%s6181_s30 + $0x74] sm:$0x1]  ;;  %v1342_v43 = vld [vmem:[%s6181_s30 + $0x70] sm:$0xf] }
  0xbb   : > { %v1575_v21 = vunpack.c.l.b16 %v1472_v51  ;;  %v2428_v26 = vsel %vm6238_vm6, %v2423_v56, %v2427_v52  ;;  %v863_v27 = vrot.slane %v861_v57, 4  ;;  %v1079_v33 = vunpack.c.l.b16 %v859_v62  ;;  %v5540_v53 = vld [vmem:[%s6181_s30 + $0x80] sm:$0x1] }
  0xbc   : > { %v1576_v31 = vunpack.c.l.b16 %v1475_v63  ;;  %v6563_v35 = vrot.slane %v870_v2, 5  ;;  %v876_v40 = vrot.slane %v874_v49, 4  ;;  %v2435_v46 = vrot.slane %v2433_v12, 5  ;;  %v1341_v49 = vld [vmem:[%s6181_s30 + $0x6c] sm:$0xe] }
  0xbd   : > { %v2445_v51 = vrot.slane %v2443_v14, 4  ;;  %v2648_v39 = vunpack.c.l.b16 %v2428_v26  ;;  %v867_v52 = vor.u32 %v866_v28, %v863_v27  ;;  %v880_v58 = vshll.u32 %v622_v34, 16  ;;  %v1343_v27 = vld [vmem:[%s6181_s30 + $0x74] sm:$0x1] }
  0xbe   : > { %v877_v57 = vor.u32 %v876_v40, %v6563_v35  ;;  %v1478_v62 = vrot.slane %v1342_v43, 5  ;;  %v1599_v2 = vpack.c.b16 %v1576_v31, %v1575_v21  ;;  %v2436_v6 = vor.u32 %v2435_v46, %v2432_v45  ;;  %v623_v43 = vld [vmem:[%s6181_s30 + $0x78] sm:$0xf] }
  0xbf   : > { %v6520_v10 = vpop.f32.mrf.mxu2  ;;  %v882_v40 = vrot.slane %v880_v58, 5  ;;  %v5374_v21 = vrot.slane %v1341_v49, 9  ;;  %v1481_v45 = vrot.slane %v1343_v27, 5  ;;  %v5542_v58 = vld [vmem:[%s6181_s30 + $0x88] sm:$0xf] }
  0xc0   : > { %v6523_v16 = vpop.f32.mrf.mxu3  ;;  %v878_v34 = vrot.slane %v877_v57, 4  ;;  %v1480_v31 = vrot.slane %v1478_v62, 4  ;;  %v2437_v46 = vrot.slane %v2436_v6, 4  ;;  %v5541_v57 = vld [vmem:[%s6181_s30 + $0x84] sm:$0xf] }
  0xc1   : > { %7478 = vst [vmem:[#allocation6_spill] sm:$0xff] %v6523_v16  ;;  %v6526_v22 = vpop.f32.mrf.mxu1  ;;  %v1479_v49 = vsel %vm6244_vm7, %v5374_v21, %v1478_v62  ;;  %v2467_v62 = vshrl.u32 %v5542_v58, 16  ;;  %v1345_v16 = vld [vmem:[%s6181_s30 + $0x7c] sm:$0xf] }
  0xc2   : > { %v6529_v29 = vpop.f32.mrf.mxu0 }
  0xc4   : > { %5356 = vmatmul.msk.bf16.gmra.mxu1 %vm387_vm1, %v1101_v17  ;;  %5389 = vmatmul.msk.bf16.gmra.mxu2 %vm387_vm1, %v1598_v18  ;;  %v1078_v18 = vunpack.c.l.b16 %v849_v50  ;;  %v6566_v50 = vrot.slane %v2439_v13, 5  ;;  %v2449_v13 = vshll.u32 %v5540_v53, 16  ;;  %v885_v53 = vshrl.u32 %v623_v43, 16 }
  0xc5   : > { %5502 = vmatmul.msk.bf16.gmra.mxu3 %vm387_vm1, %v5941_v23  ;;  %5567 = vmatmul.msk.bf16.gmra.mxu0 %vm387_vm1, %v2670_v24  ;;  %v2418_v24 = vsel %vm6238_vm6, %v2413_v55, %v6518_v4 }
  0xc6   : > { %v2647_v4 = vunpack.c.l.b16 %v2418_v24  ;;  %v1102_v56 = vpack.c.b16 %v1079_v33, %v1078_v18  ;;  %v2446_v12 = vor.u32 %v2445_v51, %v6566_v50  ;;  %v5942_v24 = vld [vmem:[%s6181_s30 + $0x6c] sm:$0xff]  ;;  %v868_v33 = vrot.slane %v867_v52, 4 }
  0xc7   : > { %v6545_v59 = vpop.f32.mrf.mxu2  ;;  %v888_v52 = vshll.u32 %v623_v43, 16 }
  0xc8   : > { %v6551_v3 = vpop.f32.mrf.mxu3  ;;  %v2671_v26 = vpack.c.b16 %v2648_v39, %v2647_v4  ;;  %v2447_v51 = vrot.slane %v2446_v12, 4  ;;  %v2451_v4 = vrot.slane %v2449_v13, 5  ;;  %v624_v39 = vld [vmem:[%s6181_s30 + $0x7c] sm:$0xf] }
  0xc9   : > { %7479 = vst [vmem:[#allocation7_spill] sm:$0xff] %v6551_v3  ;;  %v6553_v17 = vpop.f32.mrf.mxu1  ;;  %v894_v6 = vshll.u32 %v624_v39, 16  ;;  %v898_v12 = vshrl.u32 %v624_v39, 16  ;;  %v625_v3 = vld [vmem:[%s6181_s30 + $0x80] sm:$0x1] }
  0xca   : > { %v6555_v23 = vpop.f32.mrf.mxu0 }
  0xcf   : > { %v6569_v55 = vpop.f32.mrf.mxu2 }
  0xd0   : > { %v6572_v63 = vpop.f32.mrf.mxu3 }
  0xd1   : > { %7480 = vst [vmem:[#allocation8_spill] sm:$0xff] %v6572_v63  ;;  %v1170_v14 = vpop.f32.mrf.mxu1 }
  0xd2   : > { %v1250_v18 = vadd.f32 %v1170_v14, %v6384_v42  ;;  %v6579_v28 = vpop.f32.mrf.mxu0  ;;  %v873_v42 = vsel %vm6238_vm6, %v868_v33, %v6563_v35  ;;  %v2442_v35 = vsel %vm6238_vm6, %v2437_v46, %v6566_v50  ;;  %v2454_v33 = vshrl.u32 %v5541_v57, 16 }
  0xd3   : > { %v1080_v39 = vunpack.c.l.b16 %v873_v42  ;;  %v6604_v50 = vrot.slane %v894_v6, 5  ;;  %v900_v46 = vrot.slane %v898_v12, 4  ;;  %v2649_v63 = vunpack.c.l.b16 %v2442_v35 }
  0xd4   : > { %5357 = vmatmul.msk.bf16.gmra.mxu1 %vm387_vm1, %v1102_v56  ;;  %5390 = vmatmul.msk.bf16.gmra.mxu2 %vm387_vm1, %v1599_v2  ;;  %v883_v2 = vsel %vm6238_vm6, %v878_v34, %v882_v40  ;;  %v2457_v34 = vshll.u32 %v5541_v57, 16  ;;  %v2463_v40 = vshll.u32 %v5542_v58, 16  ;;  %v5543_v58 = vld [vmem:[%s6181_s30 + $0x8c] sm:$0x1]  ;;  %v2456_v25 = vrot.slane %v2454_v33, 4 }
  0xd5   : > { %5503 = vmatmul.msk.bf16.gmra.mxu3 %vm387_vm1, %v5942_v24  ;;  %5568 = vmatmul.msk.bf16.gmra.mxu0 %vm387_vm1, %v2671_v26  ;;  %v1482_v24 = vsel %vm6244_vm7, %v1480_v31, %v1481_v45  ;;  %v2452_v26 = vsel %vm6238_vm6, %v2447_v51, %v2451_v4  ;;  %v887_v31 = vrot.slane %v885_v53, 4  ;;  %v890_v45 = vrot.slane %v888_v52, 5 }
  0xd6   : > { %v1081_v51 = vunpack.c.l.b16 %v883_v2  ;;  %v1578_v4 = vunpack.c.l.b16 %v1482_v24  ;;  %v2650_v57 = vunpack.c.l.b16 %v2452_v26  ;;  %v2469_v53 = vrot.slane %v2467_v62, 4  ;;  %v1344_v26 = vld [vmem:[%s6181_s30 + $0x78] sm:$0xe] }
  0xd7   : > { %v1667_v56 = vpop.f32.mrf.mxu2  ;;  %v891_v42 = vor.u32 %v890_v45, %v887_v31  ;;  %v904_v6 = vshll.u32 %v625_v3, 16  ;;  %v1485_v2 = vrot.slane %v1345_v16, 5  ;;  %v626_v45 = vld [vmem:[%s6181_s30 + $0x84] sm:$0xf] }
  0xd8   : > { %v1747_v13 = vadd.f32 %v1667_v56, %v1250_v18  ;;  %v2021_v14 = vpop.f32.mrf.mxu3  ;;  %v1577_v56 = vunpack.c.l.b16 %v1479_v49  ;;  %v901_v49 = vor.u32 %v900_v46, %v6604_v50  ;;  %v1103_v24 = vpack.c.b16 %v1081_v51, %v1080_v39 }
  0xd9   : > { %v1172_v27 = vpop.f32.mrf.mxu1  ;;  %v5375_v46 = vrot.slane %v1344_v26, 9  ;;  %v1487_v51 = vrot.slane %v1485_v2, 4 }
  0xda   : > { %v2101_v18 = vadd.f32 %v2021_v14, %v1747_v13  ;;  %v1251_v21 = vadd.f32 %v1172_v27, %v6409_v11  ;;  %v2741_v43 = vpop.f32.mrf.mxu0  ;;  %v2459_v13 = vrot.slane %v2457_v34, 5  ;;  %v6609_v11 = vrot.slane %v2463_v40, 5  ;;  %v5943_v34 = vld [vmem:[%s6181_s30 + $0x78] sm:$0xff] }
  0xdb   : > { %v1600_v35 = vpack.c.b16 %v1578_v4, %v1577_v56  ;;  %v2473_v27 = vshll.u32 %v5543_v58, 16  ;;  %v2672_v40 = vpack.c.b16 %v2650_v57, %v2649_v63  ;;  %v902_v39 = vrot.slane %v901_v49, 4  ;;  %v627_v4 = vld [vmem:[%s6181_s30 + $0x88] sm:$0xf]  ;;  %v5544_v57 = vld [vmem:[%s6181_s30 + $0x90] sm:$0xf] }
  0xdc   : > { %v2460_v8 = vor.u32 %v2459_v13, %v2456_v25  ;;  %v2470_v62 = vor.u32 %v2469_v53, %v6609_v11  ;;  %v906_v56 = vrot.slane %v904_v6, 5  ;;  %v1488_v25 = vrot.slane %v1346_v48, 5  ;;  %v5545_v58 = vld [vmem:[%s6181_s30 + $0x94] sm:$0xf] }
  0xdd   : > { %v2475_v63 = vrot.slane %v2473_v27, 5  ;;  %v6626_v13 = vadd.f32 %v6579_v28, %v2101_v18  ;;  %v912_v49 = vshll.u32 %v626_v45, 16  ;;  %v918_v6 = vshll.u32 %v627_v4, 16 }
  0xde   : > { %v2461_v53 = vrot.slane %v2460_v8, 4  ;;  %v2481_v28 = vshll.u32 %v5544_v57, 16  ;;  %v2487_v18 = vshll.u32 %v5545_v58, 16  ;;  %v907_v8 = vsel %vm6238_vm6, %v902_v39, %v906_v56 }
  0xdf   : > { %v1669_v52 = vpop.f32.mrf.mxu2  ;;  %7481 = vst [vmem:[#allocation9_spill] sm:$0xff] %v6626_v13  ;;  %v1486_v27 = vsel %vm6244_vm7, %v5375_v46, %v1485_v2  ;;  %v628_v2 = vld [vmem:[%s6181_s30 + $0x8c] sm:$0x1]  ;;  %v6648_v39 = vrot.slane %v918_v6, 5 }
  0xe0   : > { %v1748_v12 = vadd.f32 %v1669_v52, %v1251_v21  ;;  %v2023_v14 = vpop.f32.mrf.mxu3  ;;  %v892_v21 = vrot.slane %v891_v42, 4  ;;  %v2471_v42 = vrot.slane %v2470_v62, 4  ;;  %v909_v52 = vshrl.u32 %v626_v45, 16 }
  0xe1   : > { %v1175_v33 = vpop.f32.mrf.mxu1 }
  0xe2   : > { %v2102_v31 = vadd.f32 %v2023_v14, %v1748_v12  ;;  %v1252_v16 = vadd.f32 %v1175_v33, %v6431_v47  ;;  %v6617_v3 = vpop.f32.mrf.mxu0  ;;  %v897_v48 = vsel %vm6238_vm6, %v892_v21, %v6604_v50  ;;  %v922_v12 = vshrl.u32 %v627_v4, 16 }
  0xe3   : > { %v1489_v33 = vsel %vm6244_vm7, %v1487_v51, %v1488_v25  ;;  %v911_v62 = vrot.slane %v909_v52, 4  ;;  %v2483_v51 = vrot.slane %v2481_v28, 5  ;;  %v1082_v25 = vunpack.c.l.b16 %v897_v48 }
  0xe4   : > { %5358 = vmatmul.msk.bf16.gmra.mxu1 %vm387_vm1, %v1103_v24  ;;  %5391 = vmatmul.msk.bf16.gmra.mxu2 %vm387_vm1, %v1600_v35  ;;  %v6628_v47 = vadd.f32 %v2741_v43, %v2102_v31  ;;  %v2478_v24 = vshrl.u32 %v5544_v57, 16  ;;  %v2491_v43 = vshrl.u32 %v5545_v58, 16  ;;  %v914_v31 = vrot.slane %v912_v49, 5 }
  0xe5   : > { %5504 = vmatmul.msk.bf16.gmra.mxu3 %vm387_vm1, %v5943_v34  ;;  %5569 = vmatmul.msk.bf16.gmra.mxu0 %vm387_vm1, %v2672_v40  ;;  %v2466_v34 = vsel %vm6238_vm6, %v2461_v53, %v6609_v11  ;;  %v2476_v40 = vsel %vm6238_vm6, %v2471_v42, %v2475_v63  ;;  %v924_v56 = vrot.slane %v922_v12, 4  ;;  %v6650_v11 = vrot.slane %v2487_v18, 5  ;;  %v1348_v53 = vld [vmem:[%s6181_s30 + $0x88] sm:$0xf]  ;;  %v5546_v42 = vld [vmem:[%s6181_s30 + $0x98] sm:$0x1] }
  0xe6   : > { %7482 = vst [vmem:[#allocation10_spill] sm:$0xff] %v6628_v47  ;;  %v2480_v46 = vrot.slane %v2478_v24, 4  ;;  %v2493_v4 = vrot.slane %v2491_v43, 4  ;;  %v1083_v63 = vunpack.c.l.b16 %v907_v8  ;;  %v1579_v57 = vunpack.c.l.b16 %v1486_v27  ;;  %v1349_v24 = vld [vmem:[%s6181_s30 + $0x8c] sm:$0x1] }
  0xe7   : > { %v1672_v14 = vpop.f32.mrf.mxu2  ;;  %v1580_v58 = vunpack.c.l.b16 %v1489_v33  ;;  %v2651_v52 = vunpack.c.l.b16 %v2466_v34  ;;  %v928_v49 = vshll.u32 %v628_v2, 16  ;;  %v915_v6 = vor.u32 %v914_v31, %v911_v62  ;;  %v5944_v34 = vld [vmem:[%s6181_s30 + $0x84] sm:$0xff] }
  0xe8   : > { %v1749_v35 = vadd.f32 %v1672_v14, %v1252_v16  ;;  %v2026_v26 = vpop.f32.mrf.mxu3  ;;  %v925_v12 = vor.u32 %v924_v56, %v6648_v39  ;;  %v1347_v14 = vld [vmem:[%s6181_s30 + $0x84] sm:$0xe]  ;;  %v1492_v18 = vrot.slane %v1348_v53, 5  ;;  %v2494_v48 = vor.u32 %v2493_v4, %v6650_v11  ;;  %v629_v56 = vld [vmem:[%s6181_s30 + $0x90] sm:$0xf] }
  0xe9   : > { %v1177_v50 = vpop.f32.mrf.mxu1  ;;  %v2497_v43 = vshll.u32 %v5546_v42, 16  ;;  %v1104_v27 = vpack.c.b16 %v1083_v63, %v1082_v25  ;;  %v1601_v33 = vpack.c.b16 %v1580_v58, %v1579_v57  ;;  %v930_v62 = vrot.slane %v928_v49, 5  ;;  %v630_v57 = vld [vmem:[%s6181_s30 + $0x94] sm:$0xf] }
  0xea   : > { %v2103_v16 = vadd.f32 %v2026_v26, %v1749_v35  ;;  %v1253_v21 = vadd.f32 %v1177_v50, %v6460_v20  ;;  %v2746_v45 = vpop.f32.mrf.mxu0  ;;  %v2652_v20 = vunpack.c.l.b16 %v2476_v40  ;;  %v2484_v35 = vor.u32 %v2483_v51, %v2480_v46 }
  0xeb   : > { %v5376_v31 = vrot.slane %v1347_v14, 9  ;;  %v1495_v2 = vrot.slane %v1349_v24, 5  ;;  %v916_v46 = vrot.slane %v915_v6, 4  ;;  %v926_v51 = vrot.slane %v925_v12, 4  ;;  %v5547_v12 = vld [vmem:[%s6181_s30 + $0x9c] sm:$0xf] }
  0xec   : > { %v2673_v40 = vpack.c.b16 %v2652_v20, %v2651_v52  ;;  %v1494_v4 = vrot.slane %v1492_v18, 4  ;;  %v2495_v25 = vrot.slane %v2494_v48, 4  ;;  %v2499_v63 = vrot.slane %v2497_v43, 5  ;;  %v5548_v14 = vld [vmem:[%s6181_s30 + $0xa0] sm:$0xf] }
  0xed   : > { %v933_v58 = vshrl.u32 %v629_v56, 16  ;;  %v936_v42 = vshll.u32 %v629_v56, 16  ;;  %v6667_v52 = vadd.f32 %v6617_v3, %v2103_v16  ;;  %v1493_v20 = vsel %vm6244_vm7, %v5376_v31, %v1492_v18 }
  0xee   : > { %v942_v49 = vshll.u32 %v630_v57, 16  ;;  %v946_v6 = vshrl.u32 %v630_v57, 16  ;;  %v921_v3 = vsel %vm6238_vm6, %v916_v46, %v6648_v39  ;;  %v1496_v16 = vsel %vm6244_vm7, %v1494_v4, %v1495_v2 }
  0xef   : > { %v1674_v28 = vpop.f32.mrf.mxu2  ;;  %v935_v48 = vrot.slane %v933_v58, 4  ;;  %v938_v43 = vrot.slane %v936_v42, 5  ;;  %v2502_v39 = vshrl.u32 %v5547_v12, 16  ;;  %v1581_v56 = vunpack.c.l.b16 %v1493_v20 }
  0xf0   : > { %v1750_v26 = vadd.f32 %v1674_v28, %v1253_v21  ;;  %v2028_v8 = vpop.f32.mrf.mxu3  ;;  %v2485_v21 = vrot.slane %v2484_v35, 4  ;;  %v2500_v35 = vsel %vm6238_vm6, %v2495_v25, %v2499_v63  ;;  %v6691_v31 = vrot.slane %v942_v49, 5  ;;  %v1351_v25 = vld [vmem:[%s6181_s30 + $0x94] sm:$0xf] }
  0xf1   : > { %v1180_v50 = vpop.f32.mrf.mxu1  ;;  %v1582_v46 = vunpack.c.l.b16 %v1496_v16  ;;  %v2654_v4 = vunpack.c.l.b16 %v2500_v35  ;;  %v2504_v63 = vrot.slane %v2502_v39, 4  ;;  %v939_v42 = vor.u32 %v938_v43, %v935_v48  ;;  %v5945_v35 = vld [vmem:[%s6181_s30 + $0x90] sm:$0xff] }
  0xf2   : > { %v2104_v47 = vadd.f32 %v2028_v8, %v1750_v26  ;;  %v1254_v13 = vadd.f32 %v1180_v50, %v6480_v61  ;;  %v6661_v53 = vpop.f32.mrf.mxu0  ;;  %v631_v8 = vld [vmem:[%s6181_s30 + $0x98] sm:$0x1]  ;;  %v2515_v50 = vshrl.u32 %v5548_v14, 16 }
  0xf3   : > { %v1602_v20 = vpack.c.b16 %v1582_v46, %v1581_v56  ;;  %v633_v46 = vld [vmem:[%s6181_s30 + $0xa0] sm:$0xf] }
  0xf4   : > { %5359 = vmatmul.msk.bf16.gmra.mxu1 %vm387_vm1, %v1104_v27  ;;  %5392 = vmatmul.msk.bf16.gmra.mxu2 %vm387_vm1, %v1601_v33  ;;  %v6669_v61 = vadd.f32 %v2746_v45, %v2104_v47  ;;  %v931_v47 = vsel %vm6238_vm6, %v926_v51, %v930_v62  ;;  %v2490_v45 = vsel %vm6238_vm6, %v2485_v21, %v6650_v11  ;;  %v2505_v27 = vshll.u32 %v5547_v12, 16  ;;  %v5549_v12 = vld [vmem:[%s6181_s30 + $0xa4] sm:$0x1] }
  0xf5   : > { %5505 = vmatmul.msk.bf16.gmra.mxu3 %vm387_vm1, %v5944_v34  ;;  %5570 = vmatmul.msk.bf16.gmra.mxu0 %vm387_vm1, %v2673_v40  ;;  %v2511_v33 = vshll.u32 %v5548_v14, 16  ;;  %v1084_v11 = vunpack.c.l.b16 %v921_v3  ;;  %v1085_v2 = vunpack.c.l.b16 %v931_v47  ;;  %v2653_v51 = vunpack.c.l.b16 %v2490_v45 }
  0xf6   : > { %v952_v21 = vshll.u32 %v631_v8, 16  ;;  %v2507_v57 = vrot.slane %v2505_v27, 5  ;;  %v2521_v39 = vshll.u32 %v5549_v12, 16  ;;  %v970_v12 = vshrl.u32 %v633_v46, 16 }
  0xf7   : > { %v1677_v24 = vpop.f32.mrf.mxu2  ;;  %v6694_v58 = vrot.slane %v2511_v33, 5  ;;  %v2674_v16 = vpack.c.b16 %v2654_v4, %v2653_v51  ;;  %v5550_v51 = vld [vmem:[%s6181_s30 + $0xa8] sm:$0xf] }
  0xf8   : > { %v1751_v28 = vadd.f32 %v1677_v24, %v1254_v13  ;;  %v2031_v18 = vpop.f32.mrf.mxu3  ;;  %v948_v13 = vrot.slane %v946_v6, 4  ;;  %v1350_v6 = vld [vmem:[%s6181_s30 + $0x90] sm:$0xe]  ;;  %v1105_v24 = vpack.c.b16 %v1085_v2, %v1084_v11  ;;  %v954_v45 = vrot.slane %v952_v21, 5  ;;  %v632_v11 = vld [vmem:[%s6181_s30 + $0x9c] sm:$0xf] }
  0xf9   : > { %v1182_v26 = vpop.f32.mrf.mxu1  ;;  %v5377_v8 = vrot.slane %v1350_v6, 9  ;;  %v2508_v48 = vor.u32 %v2507_v57, %v2504_v63  ;;  %v2523_v57 = vrot.slane %v2521_v39, 5  ;;  %v966_v6 = vshll.u32 %v633_v46, 16  ;;  %v634_v39 = vld [vmem:[%s6181_s30 + $0xa4] sm:$0x1] }
  0xfa   : > { %v2105_v34 = vadd.f32 %v2031_v18, %v1751_v28  ;;  %v1255_v40 = vadd.f32 %v1182_v26, %v6510_v38  ;;  %v2751_v62 = vpop.f32.mrf.mxu0  ;;  %v2517_v38 = vrot.slane %v2515_v50, 4  ;;  %v949_v49 = vor.u32 %v948_v13, %v6691_v31  ;;  %v1352_v26 = vld [vmem:[%s6181_s30 + $0x98] sm:$0x1] }
  0xfb   : > { %v1499_v28 = vrot.slane %v1351_v25, 5  ;;  %v1502_v56 = vrot.slane %v1352_v26, 5  ;;  %v2509_v25 = vrot.slane %v2508_v48, 4 }
  0xfc   : > { %v2518_v43 = vor.u32 %v2517_v38, %v6694_v58  ;;  %v950_v13 = vrot.slane %v949_v49, 4  ;;  %v6711_v4 = vadd.f32 %v6661_v53, %v2105_v34  ;;  %v5551_v38 = vld [vmem:[%s6181_s30 + $0xac] sm:$0xf]  ;;  %v957_v34 = vshrl.u32 %v632_v11, 16 }
  0xfd   : > { %v1501_v2 = vrot.slane %v1499_v28, 4 }
  0xfe   : > { %v2519_v63 = vrot.slane %v2518_v43, 4  ;;  %v955_v53 = vsel %vm6238_vm6, %v950_v13, %v954_v45  ;;  %v2514_v45 = vsel %vm6238_vm6, %v2509_v25, %v6694_v58  ;;  %v972_v13 = vrot.slane %v970_v12, 4  ;;  %v1354_v58 = vld [vmem:[%s6181_s30 + $0xa0] sm:$0xf] }
  0xff   : > { %v1679_v14 = vpop.f32.mrf.mxu2 }
 0x100   : > { %v1752_v3 = vadd.f32 %v1679_v14, %v1255_v40  ;;  %v2033_v47 = vpop.f32.mrf.mxu3  ;;  %v940_v40 = vrot.slane %v939_v42, 4  ;;  %v2526_v14 = vshrl.u32 %v5550_v51, 16  ;;  %v2524_v26 = vsel %vm6238_vm6, %v2519_v63, %v2523_v57 }
 0x101   : > { %v1185_v18 = vpop.f32.mrf.mxu1  ;;  %v2655_v63 = vunpack.c.l.b16 %v2514_v45  ;;  %v976_v57 = vshll.u32 %v634_v39, 16 }
 0x102   : > { %v2106_v27 = vadd.f32 %v2033_v47, %v1752_v3  ;;  %v1256_v33 = vadd.f32 %v1185_v18, %v6529_v29  ;;  %v6703_v50 = vpop.f32.mrf.mxu0  ;;  %v1500_v29 = vsel %vm6244_vm7, %v5377_v8, %v1499_v28  ;;  %v945_v42 = vsel %vm6238_vm6, %v940_v40, %v6691_v31 }
 0x103   : > { %v1503_v47 = vsel %vm6244_vm7, %v1501_v2, %v1502_v56  ;;  %v2539_v28 = vshrl.u32 %v5551_v38, 16  ;;  %v1086_v31 = vunpack.c.l.b16 %v945_v42  ;;  %v6734_v40 = vrot.slane %v966_v6, 5 }
 0x104   : > { %5360 = vmatmul.msk.bf16.gmra.mxu1 %vm387_vm1, %v1105_v24  ;;  %5393 = vmatmul.msk.bf16.gmra.mxu2 %vm387_vm1, %v1602_v20  ;;  %v6713_v21 = vadd.f32 %v2751_v62, %v2106_v27  ;;  %v960_v62 = vshll.u32 %v632_v11, 16  ;;  %v2529_v24 = vshll.u32 %v5550_v51, 16  ;;  %v959_v27 = vrot.slane %v957_v34, 4  ;;  %v5552_v51 = vld [vmem:[%s6181_s30 + $0xb0] sm:$0x1] }
 0x105   : > { %5506 = vmatmul.msk.bf16.gmra.mxu3 %vm387_vm1, %v5945_v35  ;;  %5571 = vmatmul.msk.bf16.gmra.mxu0 %vm387_vm1, %v2674_v16  ;;  %v2535_v16 = vshll.u32 %v5551_v38, 16  ;;  %v1583_v35 = vunpack.c.l.b16 %v1500_v29  ;;  %v2528_v11 = vrot.slane %v2526_v14, 4  ;;  %v1087_v56 = vunpack.c.l.b16 %v955_v53 }
 0x106   : > { %v2531_v2 = vrot.slane %v2529_v24, 5  ;;  %v1584_v46 = vunpack.c.l.b16 %v1503_v47  ;;  %v2541_v25 = vrot.slane %v2539_v28, 4  ;;  %v973_v34 = vor.u32 %v972_v13, %v6734_v40  ;;  %v5946_v28 = vld [vmem:[%s6181_s30 + $0x9c] sm:$0xff] }
 0x107   : > { %v1682_v49 = vpop.f32.mrf.mxu2  ;;  %v6738_v29 = vrot.slane %v2535_v16, 5  ;;  %v1506_v6 = vrot.slane %v1354_v58, 5  ;;  %v2545_v53 = vshll.u32 %v5552_v51, 16  ;;  %v978_v45 = vrot.slane %v976_v57, 5 }
 0x108   : > { %v1753_v20 = vadd.f32 %v1682_v49, %v1256_v33  ;;  %v2036_v3 = vpop.f32.mrf.mxu3  ;;  %v962_v33 = vrot.slane %v960_v62, 5  ;;  %v1353_v62 = vld [vmem:[%s6181_s30 + $0x9c] sm:$0xe]  ;;  %v1355_v49 = vld [vmem:[%s6181_s30 + $0xa4] sm:$0x1]  ;;  %v2532_v12 = vor.u32 %v2531_v2, %v2528_v11  ;;  %v974_v2 = vrot.slane %v973_v34, 4 }
 0x109   : > { %v1187_v18 = vpop.f32.mrf.mxu1  ;;  %v2542_v47 = vor.u32 %v2541_v25, %v6738_v29  ;;  %v5378_v13 = vrot.slane %v1353_v62, 9  ;;  %v1509_v58 = vrot.slane %v1355_v49, 5  ;;  %v636_v11 = vld [vmem:[%s6181_s30 + $0xac] sm:$0xf]  ;;  %v5554_v49 = vld [vmem:[%s6181_s30 + $0xb8] sm:$0xf] }
 0x10a   : > { %v2107_v8 = vadd.f32 %v2036_v3, %v1753_v20  ;;  %v1257_v48 = vadd.f32 %v1187_v18, %v6555_v23  ;;  %v2756_v43 = vpop.f32.mrf.mxu0  ;;  %v2656_v23 = vunpack.c.l.b16 %v2524_v26  ;;  %v963_v38 = vor.u32 %v962_v33, %v959_v27  ;;  %v635_v26 = vld [vmem:[%s6181_s30 + $0xa8] sm:$0xf] }
 0x10b   : > { %v1106_v20 = vpack.c.b16 %v1087_v56, %v1086_v31  ;;  %v1603_v3 = vpack.c.b16 %v1584_v46, %v1583_v35  ;;  %v2533_v51 = vrot.slane %v2532_v12, 4  ;;  %v2547_v31 = vrot.slane %v2545_v53, 5 }
 0x10c   : > { %v2675_v18 = vpack.c.b16 %v2656_v23, %v2655_v63  ;;  %v964_v33 = vrot.slane %v963_v38, 4  ;;  %v2543_v35 = vrot.slane %v2542_v47, 4  ;;  %v981_v56 = vshrl.u32 %v635_v26, 16 }
 0x10d   : > { %v6752_v46 = vadd.f32 %v6703_v50, %v2107_v8  ;;  %v984_v63 = vshll.u32 %v635_v26, 16  ;;  %v990_v23 = vshll.u32 %v636_v11, 16  ;;  %v994_v38 = vshrl.u32 %v636_v11, 16 }
 0x10e   : > { %v969_v62 = vsel %vm6238_vm6, %v964_v33, %v6734_v40  ;;  %v979_v50 = vsel %vm6238_vm6, %v974_v2, %v978_v45  ;;  %v1507_v8 = vsel %vm6244_vm7, %v5378_v13, %v1506_v6  ;;  %v2538_v53 = vsel %vm6238_vm6, %v2533_v51, %v6738_v29 }
 0x10f   : > { %v1684_v42 = vpop.f32.mrf.mxu2  ;;  %v2548_v40 = vsel %vm6238_vm6, %v2543_v35, %v2547_v31  ;;  %v996_v45 = vrot.slane %v994_v38, 4  ;;  %v2559_v26 = vshll.u32 %v5554_v49, 16  ;;  %v1088_v33 = vunpack.c.l.b16 %v969_v62  ;;  %v1357_v31 = vld [vmem:[%s6181_s30 + $0xac] sm:$0xf] }
 0x110   : > { %v1754_v14 = vadd.f32 %v1684_v42, %v1257_v48  ;;  %v2038_v24 = vpop.f32.mrf.mxu3  ;;  %v1508_v48 = vrot.slane %v1506_v6, 4  ;;  %v5553_v42 = vld [vmem:[%s6181_s30 + $0xb4] sm:$0xf]  ;;  %v1089_v29 = vunpack.c.l.b16 %v979_v50  ;;  %v1585_v13 = vunpack.c.l.b16 %v1507_v8  ;;  %v5555_v50 = vld [vmem:[%s6181_s30 + $0xbc] sm:$0x1] }
 0x111   : > { %v1190_v16 = vpop.f32.mrf.mxu1  ;;  %v2550_v47 = vshrl.u32 %v5553_v42, 16  ;;  %v2553_v6 = vshll.u32 %v5553_v42, 16  ;;  %v2657_v11 = vunpack.c.l.b16 %v2538_v53  ;;  %v2658_v2 = vunpack.c.l.b16 %v2548_v40  ;;  %v5947_v40 = vld [vmem:[%s6181_s30 + $0xa8] sm:$0xff] }
 0x112   : > { %v2108_v39 = vadd.f32 %v2038_v24, %v1754_v14  ;;  %v6746_v27 = vpop.f32.mrf.mxu0  ;;  %v1258_v57 = vadd.f32 %v1190_v16, %v6381_v36  ;;  %v983_v14 = vrot.slane %v981_v56, 4  ;;  %v6782_v38 = vrot.slane %v2559_v26, 5 }
 0x113   : > { %v2552_v35 = vrot.slane %v2550_v47, 4  ;;  %v2555_v56 = vrot.slane %v2553_v6, 5  ;;  %v1107_v62 = vpack.c.b16 %v1089_v29, %v1088_v33 }
 0x114   : > { %5361 = vmatmul.msk.bf16.gmra.mxu1 %vm387_vm1, %v1106_v20  ;;  %5394 = vmatmul.msk.bf16.gmra.mxu2 %vm387_vm1, %v1603_v3  ;;  %v6754_v25 = vadd.f32 %v2756_v43, %v2108_v39  ;;  %v1510_v43 = vsel %vm6244_vm7, %v1508_v48, %v1509_v58  ;;  %v986_v20 = vrot.slane %v984_v63, 5  ;;  %v6775_v3 = vrot.slane %v990_v23, 5 }
 0x115   : > { %5507 = vmatmul.msk.bf16.gmra.mxu3 %vm387_vm1, %v5946_v28  ;;  %5572 = vmatmul.msk.bf16.gmra.mxu0 %vm387_vm1, %v2675_v18  ;;  %v637_v18 = vld [vmem:[%s6181_s30 + $0xb0] sm:$0x1]  ;;  %v2563_v39 = vshrl.u32 %v5554_v49, 16  ;;  %v1586_v58 = vunpack.c.l.b16 %v1510_v43  ;;  %v2556_v47 = vor.u32 %v2555_v56, %v2552_v35  ;;  %v5556_v35 = vld [vmem:[%s6181_s30 + $0xc0] sm:$0xf] }
 0x116   : > { %v987_v48 = vor.u32 %v986_v20, %v983_v14  ;;  %v1000_v51 = vshll.u32 %v637_v18, 16  ;;  %v997_v23 = vor.u32 %v996_v45, %v6775_v3 }
 0x117   : > { %v1687_v34 = vpop.f32.mrf.mxu2  ;;  %v2565_v42 = vrot.slane %v2563_v39, 4  ;;  %v1604_v49 = vpack.c.b16 %v1586_v58, %v1585_v13  ;;  %v2569_v39 = vshll.u32 %v5555_v50, 16  ;;  %v638_v13 = vld [vmem:[%s6181_s30 + $0xb4] sm:$0xf]  ;;  %v639_v58 = vld [vmem:[%s6181_s30 + $0xb8] sm:$0xf] }
 0x118   : > { %v1755_v12 = vadd.f32 %v1687_v34, %v1258_v57  ;;  %v2041_v36 = vpop.f32.mrf.mxu3  ;;  %v1356_v57 = vld [vmem:[%s6181_s30 + $0xa8] sm:$0xe]  ;;  %v1002_v14 = vrot.slane %v1000_v51, 5  ;;  %v998_v45 = vrot.slane %v997_v23, 4 }
 0x119   : > { %v1192_v24 = vpop.f32.mrf.mxu1  ;;  %v5379_v20 = vrot.slane %v1356_v57, 9  ;;  %v2566_v26 = vor.u32 %v2565_v42, %v6782_v38  ;;  %v1005_v57 = vshrl.u32 %v638_v13, 16  ;;  %v1008_v42 = vshll.u32 %v638_v13, 16  ;;  %v640_v13 = vld [vmem:[%s6181_s30 + $0xbc] sm:$0x1] }
 0x11a   : > { %v2109_v16 = vadd.f32 %v2041_v36, %v1755_v12  ;;  %v2761_v28 = vpop.f32.mrf.mxu0  ;;  %v1259_v63 = vadd.f32 %v1192_v24, %v6407_v7  ;;  %v2676_v12 = vpack.c.b16 %v2658_v2, %v2657_v11  ;;  %v1513_v36 = vrot.slane %v1357_v31, 5  ;;  %v1358_v24 = vld [vmem:[%s6181_s30 + $0xb0] sm:$0x1] }
 0x11b   : > { %v988_v7 = vrot.slane %v987_v48, 4  ;;  %v1516_v29 = vrot.slane %v1358_v24, 5  ;;  %v2557_v31 = vrot.slane %v2556_v47, 4 }
 0x11c   : > { %v1515_v33 = vrot.slane %v1513_v36, 4  ;;  %v6793_v11 = vadd.f32 %v6746_v27, %v2109_v16  ;;  %v1514_v51 = vsel %vm6244_vm7, %v5379_v20, %v1513_v36  ;;  %v1003_v27 = vsel %vm6238_vm6, %v998_v45, %v1002_v14 }
 0x11d   : > { %v993_v48 = vsel %vm6238_vm6, %v988_v7, %v6775_v3  ;;  %v2567_v16 = vrot.slane %v2566_v26, 4  ;;  %v2562_v36 = vsel %vm6238_vm6, %v2557_v31, %v6782_v38  ;;  %v1091_v20 = vunpack.c.l.b16 %v1003_v27  ;;  %v1360_v31 = vld [vmem:[%s6181_s30 + $0xb8] sm:$0xf] }
 0x11e   : > { %v1090_v24 = vunpack.c.l.b16 %v993_v48  ;;  %v1010_v45 = vrot.slane %v1008_v42, 5  ;;  %v1024_v42 = vshll.u32 %v640_v13, 16 }
 0x11f   : > { %v1689_v34 = vpop.f32.mrf.mxu2 }
 0x120   : > { %v1756_v8 = vadd.f32 %v1689_v34, %v1259_v63  ;;  %v2043_v43 = vpop.f32.mrf.mxu3  ;;  %v5557_v63 = vld [vmem:[%s6181_s30 + $0xc4] sm:$0xf]  ;;  %v1014_v34 = vshll.u32 %v639_v58, 16 }
 0x121   : > { %v1195_v53 = vpop.f32.mrf.mxu1 }
 0x122   : > { %v2110_v6 = vadd.f32 %v2043_v43, %v1756_v8  ;;  %v2764_v18 = vpop.f32.mrf.mxu0  ;;  %v1260_v56 = vadd.f32 %v1195_v53, %v6428_v44  ;;  %v1517_v8 = vsel %vm6244_vm7, %v1515_v33, %v1516_v29  ;;  %v2574_v43 = vshrl.u32 %v5556_v35, 16 }
 0x123   : > { %v1587_v44 = vunpack.c.l.b16 %v1514_v51  ;;  %v2583_v53 = vshll.u32 %v5557_v63, 16  ;;  %v6816_v26 = vrot.slane %v1014_v34, 5  ;;  %v1588_v33 = vunpack.c.l.b16 %v1517_v8 }
 0x124   : > { %5362 = vmatmul.msk.bf16.gmra.mxu1 %vm387_vm1, %v1107_v62  ;;  %5395 = vmatmul.msk.bf16.gmra.mxu2 %vm387_vm1, %v1604_v49  ;;  %v6795_v2 = vadd.f32 %v2761_v28, %v2110_v6  ;;  %v2571_v28 = vrot.slane %v2569_v39, 5  ;;  %v1018_v62 = vshrl.u32 %v639_v58, 16  ;;  %v2577_v49 = vshll.u32 %v5556_v35, 16 }
 0x125   : > { %5508 = vmatmul.msk.bf16.gmra.mxu3 %vm387_vm1, %v5947_v40  ;;  %5573 = vmatmul.msk.bf16.gmra.mxu0 %vm387_vm1, %v2676_v12  ;;  %v2587_v40 = vshrl.u32 %v5557_v63, 16  ;;  %v1007_v6 = vrot.slane %v1005_v57, 4  ;;  %v2659_v29 = vunpack.c.l.b16 %v2562_v36  ;;  %v2576_v38 = vrot.slane %v2574_v43, 4  ;;  %v5948_v36 = vld [vmem:[%s6181_s30 + $0xb4] sm:$0xff] }
 0x126   : > { %v2572_v47 = vsel %vm6238_vm6, %v2567_v16, %v2571_v28  ;;  %v1020_v39 = vrot.slane %v1018_v62, 4  ;;  %v2579_v58 = vrot.slane %v2577_v49, 5  ;;  %v2585_v35 = vrot.slane %v2583_v53, 5  ;;  %v5558_v16 = vld [vmem:[%s6181_s30 + $0xc8] sm:$0x1] }
 0x127   : > { %v1692_v23 = vpop.f32.mrf.mxu2  ;;  %v2660_v51 = vunpack.c.l.b16 %v2572_v47  ;;  %v2589_v48 = vrot.slane %v2587_v40, 4  ;;  %v1108_v63 = vpack.c.b16 %v1091_v20, %v1090_v24  ;;  %v1520_v8 = vrot.slane %v1360_v31, 5  ;;  %v1361_v53 = vld [vmem:[%s6181_s30 + $0xbc] sm:$0x1] }
 0x128   : > { %v1757_v50 = vadd.f32 %v1692_v23, %v1260_v56  ;;  %v2046_v3 = vpop.f32.mrf.mxu3  ;;  %v1011_v23 = vor.u32 %v1010_v45, %v1007_v6  ;;  %v1021_v57 = vor.u32 %v1020_v39, %v6816_v26  ;;  %v2580_v43 = vor.u32 %v2579_v58, %v2576_v38  ;;  %v5770_v38 = vld [vmem:[%s6181_s30 + $0x18] sm:$0xf] }
 0x129   : > { %v1197_v12 = vpop.f32.mrf.mxu1  ;;  %v2590_v40 = vor.u32 %v2589_v48, %v2585_v35  ;;  %v1026_v47 = vrot.slane %v1024_v42, 5  ;;  %v1523_v45 = vrot.slane %v1361_v53, 5  ;;  %v3783_v42 = vshll.u32 %v5770_v38, 16 }
 0x12a   : > { %v2111_v7 = vadd.f32 %v2046_v3, %v1757_v50  ;;  %v2766_v14 = vpop.f32.mrf.mxu0  ;;  %v1261_v27 = vadd.f32 %v1197_v12, %v6458_v15  ;;  %v1605_v50 = vpack.c.b16 %v1588_v33, %v1587_v44  ;;  %v1359_v3 = vld [vmem:[%s6181_s30 + $0xb4] sm:$0xe]  ;;  %v2593_v15 = vshll.u32 %v5558_v16, 16 }
 0x12b   : > { %v1012_v24 = vrot.slane %v1011_v23, 4  ;;  %v1022_v20 = vrot.slane %v1021_v57, 4  ;;  %v5380_v6 = vrot.slane %v1359_v3, 9  ;;  %v1522_v44 = vrot.slane %v1520_v8, 4 }
 0x12c   : > { %v6820_v56 = vadd.f32 %v2764_v18, %v2111_v7  ;;  %v2677_v18 = vpack.c.b16 %v2660_v51, %v2659_v29  ;;  %v2581_v39 = vrot.slane %v2580_v43, 4  ;;  %v2591_v29 = vrot.slane %v2590_v40, 4  ;;  %v5771_v51 = vld [vmem:[%s6181_s30 + $0x1c] sm:$0xf]  ;;  %v5577_v40 = vld [vmem:[%s6181_s30 + $0x10] sm:$0xf] }
 0x12d   : > { %v2595_v13 = vrot.slane %v2593_v15, 5  ;;  %v1017_v48 = vsel %vm6238_vm6, %v1012_v24, %v6816_v26  ;;  %v3780_v23 = vshrl.u32 %v5770_v38, 16  ;;  %v2981_v38 = vrot.slane %v5577_v40, 5 }
 0x12f   : > { %v1694_v28 = vpop.f32.mrf.mxu2  ;;  %v2596_v26 = vsel %vm6238_vm6, %v2591_v29, %v2595_v13  ;;  %v3782_v15 = vrot.slane %v3780_v23, 4  ;;  %v5835_v23 = vld [vmem:[%s6181_s30 + $0x18] sm:$0xe] }
 0x130   : > { %v1758_v34 = vadd.f32 %v1694_v28, %v1261_v27  ;;  %v2048_v62 = vpop.f32.mrf.mxu3  ;;  %v1027_v27 = vsel %vm6238_vm6, %v1022_v20, %v1026_v47  ;;  %v2662_v53 = vunpack.c.l.b16 %v2596_v26 }
 0x131   : > { %v1200_v49 = vpop.f32.mrf.mxu1  ;;  %v1093_v43 = vunpack.c.l.b16 %v1027_v27 }
 0x132   : > { %v2112_v12 = vadd.f32 %v2048_v62, %v1758_v34  ;;  %v2769_v7 = vpop.f32.mrf.mxu0  ;;  %v1262_v58 = vadd.f32 %v1200_v49, %v6475_v54  ;;  %v2586_v54 = vsel %vm6238_vm6, %v2581_v39, %v2585_v35  ;;  %v3789_v34 = vshll.u32 %v5771_v51, 16 }
 0x133   : > { %v3793_v62 = vshrl.u32 %v5771_v51, 16  ;;  %v5949_v51 = vld [vmem:[%s6181_s30 + $0xc0] sm:$0xff] }
 0x134   : > { %5363 = vmatmul.msk.bf16.gmra.mxu1 %vm387_vm1, %v1108_v63  ;;  %5396 = vmatmul.msk.bf16.gmra.mxu2 %vm387_vm1, %v1605_v50  ;;  %v6830_v33 = vadd.f32 %v2766_v14, %v2112_v12  ;;  %v1521_v14 = vsel %vm6244_vm7, %v5380_v6, %v1520_v8  ;;  %v1524_v63 = vsel %vm6244_vm7, %v1522_v44, %v1523_v45  ;;  %v1092_v8 = vunpack.c.l.b16 %v1017_v48  ;;  %v5772_v6 = vld [vmem:[%s6181_s30 + $0x20] sm:$0x1]  ;;  %v5836_v45 = vld [vmem:[%s6181_s30 + $0x1c] sm:$0xf]  ;;  %v5576_v48 = vld [vmem:[%s6181_s30 + $0xc] sm:$0xe] }
 0x135   : > { %5509 = vmatmul.msk.bf16.gmra.mxu3 %vm387_vm1, %v5948_v36  ;;  %5574 = vmatmul.msk.bf16.gmra.mxu0 %vm387_vm1, %v2677_v18  ;;  %v1589_v49 = vunpack.c.l.b16 %v1521_v14  ;;  %v1590_v36 = vunpack.c.l.b16 %v1524_v63  ;;  %v2661_v18 = vunpack.c.l.b16 %v2586_v54  ;;  %v3785_v12 = vrot.slane %v3783_v42, 5  ;;  %v5578_v63 = vld [vmem:[%s6181_s30 + $0x14] sm:$0x1] }
 0x136   : > { %v6853_v24 = vrot.slane %v3789_v34, 5  ;;  %v3795_v20 = vrot.slane %v3793_v62, 4  ;;  %v3799_v14 = vshll.u32 %v5772_v6, 16  ;;  %v4547_v54 = vrot.slane %v5836_v45, 5  ;;  %v5773_v34 = vld [vmem:[%s6181_s30 + $0x24] sm:$0xf] }
 0x137   : > { %v1697_v31 = vpop.f32.mrf.mxu2  ;;  %v1606_v13 = vpack.c.b16 %v1590_v36, %v1589_v49  ;;  %v3786_v27 = vor.u32 %v3785_v12, %v3782_v15  ;;  %v5624_v26 = vrot.slane %v5576_v48, 9  ;;  %v2983_v42 = vrot.slane %v2981_v38, 4  ;;  %v5774_v62 = vld [vmem:[%s6181_s30 + $0x28] sm:$0xf] }
 0x138   : > { %v1759_v16 = vadd.f32 %v1697_v31, %v1262_v58  ;;  %v2051_v28 = vpop.f32.mrf.mxu3  ;;  %v2678_v31 = vpack.c.b16 %v2662_v53, %v2661_v18  ;;  %v3801_v36 = vrot.slane %v3799_v14, 5  ;;  %v5883_v53 = vrot.slane %v5835_v23, 9  ;;  %v5775_v23 = vld [vmem:[%s6181_s30 + $0x2c] sm:$0x1] }
 0x139   : > { %v1202_v57 = vpop.f32.mrf.mxu1  ;;  %v4549_v40 = vrot.slane %v4547_v54, 4  ;;  %v3813_v6 = vshll.u32 %v5774_v62, 16 }
 0x13a   : > { %v2113_v50 = vadd.f32 %v2051_v28, %v1759_v16  ;;  %v2771_v3 = vpop.f32.mrf.mxu0  ;;  %v1263_v47 = vadd.f32 %v1202_v57, %v6503_v32  ;;  %v3796_v32 = vor.u32 %v3795_v20, %v6853_v24  ;;  %v5837_v57 = vld [vmem:[%s6181_s30 + $0x20] sm:$0x1]  ;;  %v3804_v20 = vshrl.u32 %v5773_v34, 16 }
 0x13b   : > { %v4550_v15 = vrot.slane %v5837_v57, 5  ;;  %v6887_v14 = vrot.slane %v3813_v6, 5 }
 0x13c   : > { %v6850_v35 = vadd.f32 %v2769_v7, %v2113_v50  ;;  %v1109_v7 = vpack.c.b16 %v1093_v43, %v1092_v8  ;;  %v2984_v8 = vrot.slane %v5578_v63, 5  ;;  %v3787_v43 = vrot.slane %v3786_v27, 4 }
 0x13d   : > { %v3797_v49 = vrot.slane %v3796_v32, 4  ;;  %v4551_v48 = vsel %vm6244_vm7, %v4549_v40, %v4550_v15  ;;  %v3806_v27 = vrot.slane %v3804_v20, 4  ;;  %v3823_v40 = vshll.u32 %v5775_v23, 16  ;;  %v5950_v20 = vld [vmem:[%s6181_s30 + $0x18] sm:$0xff]  ;;  %v5776_v23 = vld [vmem:[%s6181_s30 + $0x30] sm:$0xf] }
 0x13f   : > { %v1699_v44 = vpop.f32.mrf.mxu2 }
 0x140   : > { %v1760_v39 = vadd.f32 %v1699_v44, %v1263_v47  ;;  %v2053_v29 = vpop.f32.mrf.mxu3  ;;  %v3807_v47 = vshll.u32 %v5773_v34, 16  ;;  %v4692_v34 = vunpack.c.l.b16 %v4551_v48 }
 0x141   : > { %v1205_v58 = vpop.f32.mrf.mxu1 }
 0x142   : > { %v2114_v16 = vadd.f32 %v2053_v29, %v1760_v39  ;;  %v2774_v28 = vpop.f32.mrf.mxu0  ;;  %v1264_v18 = vadd.f32 %v1205_v58, %v6526_v22  ;;  %v2982_v29 = vsel %vm6244_vm7, %v5624_v26, %v2981_v38  ;;  %v3792_v22 = vsel %vm6238_vm6, %v3787_v43, %v6853_v24  ;;  %v5580_v38 = vld [vmem:[%s6181_s30 + $0x1c] sm:$0xf] }
 0x143   : > { %v3809_v32 = vrot.slane %v3807_v47, 5  ;;  %v3125_v24 = vunpack.c.l.b16 %v2982_v29  ;;  %v4197_v26 = vunpack.c.l.b16 %v3792_v22  ;;  %v2988_v43 = vrot.slane %v5580_v38, 5  ;;  %v5581_v47 = vld [vmem:[%s6181_s30 + $0x20] sm:$0x1]  ;;  %v5838_v29 = vld [vmem:[%s6181_s30 + $0x24] sm:$0xe] }
 0x144   : > { %5364 = vmatmul.msk.bf16.gmra.mxu1 %vm387_vm1, %v1109_v7  ;;  %5397 = vmatmul.msk.bf16.gmra.mxu2 %vm387_vm1, %v1606_v13  ;;  %v6868_v50 = vadd.f32 %v2771_v3, %v2114_v16  ;;  %v3817_v3 = vshrl.u32 %v5774_v62, 16  ;;  %v2985_v7 = vsel %vm6244_vm7, %v2983_v42, %v2984_v8  ;;  %v5839_v62 = vld [vmem:[%s6181_s30 + $0x28] sm:$0xf]  ;;  %v3825_v38 = vrot.slane %v3823_v40, 5 }
 0x145   : > { %5510 = vmatmul.msk.bf16.gmra.mxu3 %vm387_vm1, %v5949_v51  ;;  %5575 = vmatmul.msk.bf16.gmra.mxu0 %vm387_vm1, %v2678_v31  ;;  %v3802_v51 = vsel %vm6238_vm6, %v3797_v49, %v3801_v36  ;;  %v4548_v31 = vsel %vm6244_vm7, %v5883_v53, %v4547_v54  ;;  %v3126_v63 = vunpack.c.l.b16 %v2985_v7  ;;  %v5579_v36 = vld [vmem:[%s6181_s30 + $0x18] sm:$0xe]  ;;  %v4554_v6 = vrot.slane %v5839_v62, 5 }
 0x146   : > { %v3819_v16 = vrot.slane %v3817_v3, 4  ;;  %v4198_v42 = vunpack.c.l.b16 %v3802_v51  ;;  %v4691_v54 = vunpack.c.l.b16 %v4548_v31  ;;  %v5625_v22 = vrot.slane %v5579_v36, 9 }
 0x147   : > { %v1702_v12 = vpop.f32.mrf.mxu2  ;;  %v2991_v51 = vrot.slane %v5581_v47, 5 }
 0x148   : > { %v1761_v44 = vadd.f32 %v1702_v12, %v1264_v18  ;;  %v2056_v45 = vpop.f32.mrf.mxu3  ;;  %v3810_v18 = vor.u32 %v3809_v32, %v3806_v27  ;;  %v3820_v53 = vor.u32 %v3819_v16, %v6887_v14  ;;  %v3157_v12 = vpack.c.b16 %v3126_v63, %v3125_v24 }
 0x149   : > { %v1207_v39 = vpop.f32.mrf.mxu1  ;;  %v5884_v27 = vrot.slane %v5838_v29, 9  ;;  %v4556_v32 = vrot.slane %v4554_v6, 4  ;;  %v5583_v29 = vld [vmem:[%s6181_s30 + $0x28] sm:$0xf] }
 0x14a   : > { %v2115_v13 = vadd.f32 %v2056_v45, %v1761_v44  ;;  %v2776_v58 = vpop.f32.mrf.mxu0  ;;  %v1265_v8 = vadd.f32 %v1207_v39, %v6553_v17  ;;  %v4229_v44 = vpack.c.b16 %v4198_v42, %v4197_v26  ;;  %v4723_v45 = vpack.c.b16 %v4692_v34, %v4691_v54  ;;  %v5840_v17 = vld [vmem:[%s6181_s30 + $0x2c] sm:$0x1]  ;;  %v5777_v26 = vld [vmem:[%s6181_s30 + $0x34] sm:$0xf] }
 0x14b   : > { %v3811_v31 = vrot.slane %v3810_v18, 4  ;;  %v3821_v48 = vrot.slane %v3820_v53, 4  ;;  %v4557_v16 = vrot.slane %v5840_v17, 5  ;;  %v2989_v54 = vsel %vm6244_vm7, %v5625_v22, %v2988_v43 }
 0x14c   : > { %v6890_v57 = vadd.f32 %v2774_v28, %v2115_v13  ;;  %v2990_v13 = vrot.slane %v2988_v43, 4  ;;  %v3828_v18 = vshrl.u32 %v5776_v23, 16  ;;  %v3831_v53 = vshll.u32 %v5776_v23, 16 }
 0x14d   : > { %v4558_v36 = vsel %vm6244_vm7, %v4556_v32, %v4557_v16  ;;  %v3837_v40 = vshll.u32 %v5777_v26, 16  ;;  %v2995_v23 = vrot.slane %v5583_v29, 5 }
 0x14e   : > { %v2992_v34 = vsel %vm6244_vm7, %v2990_v13, %v2991_v51  ;;  %v3830_v17 = vrot.slane %v3828_v18, 4 }
 0x14f   : > { %v1704_v49 = vpop.f32.mrf.mxu2  ;;  %v6925_v22 = vrot.slane %v3837_v40, 5  ;;  %v5779_v40 = vld [vmem:[%s6181_s30 + $0x3c] sm:$0xf] }
 0x150   : > { %v1762_v28 = vadd.f32 %v1704_v49, %v1265_v8  ;;  %v2058_v15 = vpop.f32.mrf.mxu3  ;;  %v3826_v49 = vsel %vm6238_vm6, %v3821_v48, %v3825_v38  ;;  %v5842_v38 = vld [vmem:[%s6181_s30 + $0x34] sm:$0xf] }
 0x151   : > { %v1210_v3 = vpop.f32.mrf.mxu1 }
 0x152   : > { %v2116_v39 = vadd.f32 %v2058_v15, %v1762_v28  ;;  %v2779_v7 = vpop.f32.mrf.mxu0  ;;  %v1266_v63 = vadd.f32 %v1210_v3, %v6399_v60  ;;  %v4555_v60 = vsel %vm6244_vm7, %v5884_v27, %v4554_v6  ;;  %v3841_v28 = vshrl.u32 %v5777_v26, 16 }
 0x153   : > { %v4200_v3 = vunpack.c.l.b16 %v3826_v49  ;;  %v4694_v6 = vunpack.c.l.b16 %v4558_v36  ;;  %v5584_v49 = vld [vmem:[%s6181_s30 + $0x2c] sm:$0x1]  ;;  %v5841_v36 = vld [vmem:[%s6181_s30 + $0x30] sm:$0xe] }
 0x154   : > { %5641 = vmatmul.msk.bf16.vlgmr.msra.gmra.mxu1 %vm387_vm1, %v3157_v12  ;;  %5754 = vmatmul.msk.bf16.vlgmr.msra.gmra.mxu2 %vm387_vm1, %v5950_v20  ;;  %v6902_v24 = vadd.f32 %v2776_v58, %v2116_v39  ;;  %v3816_v58 = vsel %vm6238_vm6, %v3811_v31, %v6887_v14  ;;  %v3127_v12 = vunpack.c.l.b16 %v2989_v54  ;;  %v3128_v20 = vunpack.c.l.b16 %v2992_v34  ;;  %v5778_v31 = vld [vmem:[%s6181_s30 + $0x38] sm:$0x1]  ;;  %v5582_v54 = vld [vmem:[%s6181_s30 + $0x24] sm:$0xe] }
 0x155   : > { %5819 = vmatmul.msk.bf16.vlgmr.msra.gmra.mxu3 %vm387_vm1, %v4229_v44  ;;  %5900 = vmatmul.msk.bf16.vlgmr.msra.gmra.mxu0 %vm387_vm1, %v4723_v45  ;;  %v4199_v47 = vunpack.c.l.b16 %v3816_v58  ;;  %v4693_v44 = vunpack.c.l.b16 %v4555_v60  ;;  %v3833_v39 = vrot.slane %v3831_v53, 5  ;;  %v3843_v13 = vrot.slane %v3841_v28, 4  ;;  %v5780_v28 = vld [vmem:[%s6181_s30 + $0x40] sm:$0xf] }
 0x156   : > { %v3158_v16 = vpack.c.b16 %v3128_v20, %v3127_v12  ;;  %v3847_v58 = vshll.u32 %v5778_v31, 16  ;;  %v4561_v60 = vrot.slane %v5842_v38, 5  ;;  %v5626_v18 = vrot.slane %v5582_v54, 9 }
 0x157   : > { %v1707_v42 = vpop.f32.mrf.mxu2  ;;  %v3834_v34 = vor.u32 %v3833_v39, %v3830_v17  ;;  %v2997_v53 = vrot.slane %v2995_v23, 4  ;;  %v2998_v12 = vrot.slane %v5584_v49, 5  ;;  %v3861_v31 = vshll.u32 %v5780_v28, 16 }
 0x158   : > { %v1763_v62 = vadd.f32 %v1707_v42, %v1266_v63  ;;  %v2061_v8 = vpop.f32.mrf.mxu3  ;;  %v4230_v63 = vpack.c.b16 %v4200_v3, %v4199_v47  ;;  %v4724_v42 = vpack.c.b16 %v4694_v6, %v4693_v44  ;;  %v3849_v3 = vrot.slane %v3847_v58, 5 }
 0x159   : > { %v1212_v43 = vpop.f32.mrf.mxu1  ;;  %v3835_v20 = vrot.slane %v3834_v34, 4  ;;  %v5885_v6 = vrot.slane %v5841_v36, 9  ;;  %v4563_v29 = vrot.slane %v4561_v60, 4  ;;  %v6959_v58 = vrot.slane %v3861_v31, 5  ;;  %v5781_v36 = vld [vmem:[%s6181_s30 + $0x44] sm:$0x1] }
 0x15a   : > { %v2117_v15 = vadd.f32 %v2061_v8, %v1763_v62  ;;  %v2781_v14 = vpop.f32.mrf.mxu0  ;;  %v1267_v51 = vadd.f32 %v1212_v43, %v6421_v30  ;;  %v3844_v30 = vor.u32 %v3843_v13, %v6925_v22  ;;  %v5843_v43 = vld [vmem:[%s6181_s30 + $0x38] sm:$0x1]  ;;  %v3852_v13 = vshrl.u32 %v5779_v40, 16 }
 0x15b   : > { %v4564_v17 = vrot.slane %v5843_v43, 5 }
 0x15c   : > { %v6922_v45 = vadd.f32 %v2779_v7, %v2117_v15  ;;  %v5951_v7 = vld [vmem:[%s6181_s30 + $0x24] sm:$0xff]  ;;  %v3845_v47 = vrot.slane %v3844_v30, 4  ;;  %v3854_v34 = vrot.slane %v3852_v13, 4  ;;  %v5952_v13 = vld [vmem:[%s6181_s30 + $0x30] sm:$0xff] }
 0x15d   : > { %v4565_v54 = vsel %vm6244_vm7, %v4563_v29, %v4564_v17  ;;  %v3871_v29 = vshll.u32 %v5781_v36, 16  ;;  %v5782_v36 = vld [vmem:[%s6181_s30 + $0x48] sm:$0xf] }
 0x15f   : > { %v1709_v48 = vpop.f32.mrf.mxu2 }
 0x160   : > { %v1764_v27 = vadd.f32 %v1709_v48, %v1267_v51  ;;  %v2063_v32 = vpop.f32.mrf.mxu3  ;;  %v3855_v51 = vshll.u32 %v5779_v40, 16  ;;  %v4696_v40 = vunpack.c.l.b16 %v4565_v54 }
 0x161   : > { %v1215_v26 = vpop.f32.mrf.mxu1 }
 0x162   : > { %v2118_v62 = vadd.f32 %v2063_v32, %v1764_v27  ;;  %v2784_v8 = vpop.f32.mrf.mxu0  ;;  %v1268_v44 = vadd.f32 %v1215_v26, %v6445_v0  ;;  %v2996_v32 = vsel %vm6244_vm7, %v5626_v18, %v2995_v23  ;;  %v3840_v0 = vsel %vm6238_vm6, %v3835_v20, %v6925_v22  ;;  %v5586_v23 = vld [vmem:[%s6181_s30 + $0x34] sm:$0xf] }
 0x163   : > { %v3850_v26 = vsel %vm6238_vm6, %v3845_v47, %v3849_v3  ;;  %v3857_v30 = vrot.slane %v3855_v51, 5  ;;  %v3129_v22 = vunpack.c.l.b16 %v2996_v32  ;;  %v4201_v18 = vunpack.c.l.b16 %v3840_v0  ;;  %v5585_v3 = vld [vmem:[%s6181_s30 + $0x30] sm:$0xe]  ;;  %v5587_v51 = vld [vmem:[%s6181_s30 + $0x38] sm:$0x1] }
 0x164   : > { %5642 = vmatmul.msk.bf16.gmra.mxu1 %vm387_vm1, %v3158_v16  ;;  %5755 = vmatmul.msk.bf16.gmra.mxu2 %vm387_vm1, %v5951_v7  ;;  %v6940_v15 = vadd.f32 %v2781_v14, %v2118_v62  ;;  %v3865_v14 = vshrl.u32 %v5780_v28, 16  ;;  %v2999_v16 = vsel %vm6244_vm7, %v2997_v53, %v2998_v12  ;;  %v4202_v53 = vunpack.c.l.b16 %v3850_v26  ;;  %v5845_v28 = vld [vmem:[%s6181_s30 + $0x40] sm:$0xf]  ;;  %v5844_v32 = vld [vmem:[%s6181_s30 + $0x3c] sm:$0xe] }
 0x165   : > { %5820 = vmatmul.msk.bf16.gmra.mxu3 %vm387_vm1, %v4230_v63  ;;  %5901 = vmatmul.msk.bf16.gmra.mxu0 %vm387_vm1, %v4724_v42  ;;  %v4562_v42 = vsel %vm6244_vm7, %v5885_v6, %v4561_v60  ;;  %v3130_v49 = vunpack.c.l.b16 %v2999_v16  ;;  %v3002_v20 = vrot.slane %v5586_v23, 5  ;;  %v4568_v31 = vrot.slane %v5845_v28, 5 }
 0x166   : > { %v3867_v62 = vrot.slane %v3865_v14, 4  ;;  %v4695_v60 = vunpack.c.l.b16 %v4562_v42  ;;  %v5627_v0 = vrot.slane %v5585_v3, 9  ;;  %v3005_v26 = vrot.slane %v5587_v51, 5 }
 0x167   : > { %v1712_v39 = vpop.f32.mrf.mxu2  ;;  %v3873_v23 = vrot.slane %v3871_v29, 5 }
 0x168   : > { %v1765_v48 = vadd.f32 %v1712_v39, %v1268_v44  ;;  %v2066_v38 = vpop.f32.mrf.mxu3  ;;  %v3858_v44 = vor.u32 %v3857_v30, %v3854_v34  ;;  %v3868_v6 = vor.u32 %v3867_v62, %v6959_v58  ;;  %v3159_v39 = vpack.c.b16 %v3130_v49, %v3129_v22 }
 0x169   : > { %v1217_v27 = vpop.f32.mrf.mxu1  ;;  %v5886_v34 = vrot.slane %v5844_v32, 9  ;;  %v4570_v30 = vrot.slane %v4568_v31, 4  ;;  %v5589_v32 = vld [vmem:[%s6181_s30 + $0x40] sm:$0xf] }
 0x16a   : > { %v2119_v7 = vadd.f32 %v2066_v38, %v1765_v48  ;;  %v2786_v63 = vpop.f32.mrf.mxu0  ;;  %v1269_v12 = vadd.f32 %v1217_v27, %v6469_v41  ;;  %v4231_v48 = vpack.c.b16 %v4202_v53, %v4201_v18  ;;  %v4725_v38 = vpack.c.b16 %v4696_v40, %v4695_v60  ;;  %v5846_v41 = vld [vmem:[%s6181_s30 + $0x44] sm:$0x1]  ;;  %v5783_v18 = vld [vmem:[%s6181_s30 + $0x4c] sm:$0xf] }
 0x16b   : > { %v3859_v42 = vrot.slane %v3858_v44, 4  ;;  %v3869_v54 = vrot.slane %v3868_v6, 4  ;;  %v4571_v62 = vrot.slane %v5846_v41, 5  ;;  %v3003_v60 = vsel %vm6244_vm7, %v5627_v0, %v3002_v20 }
 0x16c   : > { %v6962_v43 = vadd.f32 %v2784_v8, %v2119_v7  ;;  %v3004_v7 = vrot.slane %v3002_v20, 4  ;;  %v3876_v44 = vshrl.u32 %v5782_v36, 16  ;;  %v3879_v6 = vshll.u32 %v5782_v36, 16 }
 0x16d   : > { %v4572_v3 = vsel %vm6244_vm7, %v4570_v30, %v4571_v62  ;;  %v3885_v29 = vshll.u32 %v5783_v18, 16  ;;  %v3009_v36 = vrot.slane %v5589_v32, 5 }
 0x16e   : > { %v3006_v40 = vsel %vm6244_vm7, %v3004_v7, %v3005_v26  ;;  %v3878_v41 = vrot.slane %v3876_v44, 4 }
 0x16f   : > { %v1714_v47 = vpop.f32.mrf.mxu2  ;;  %v6997_v0 = vrot.slane %v3885_v29, 5  ;;  %v5785_v29 = vld [vmem:[%s6181_s30 + $0x54] sm:$0xf] }
 0x170   : > { %v1766_v8 = vadd.f32 %v1714_v47, %v1269_v12  ;;  %v2068_v17 = vpop.f32.mrf.mxu3  ;;  %v3874_v47 = vsel %vm6238_vm6, %v3869_v54, %v3873_v23  ;;  %v5848_v23 = vld [vmem:[%s6181_s30 + $0x4c] sm:$0xf] }
 0x171   : > { %v1220_v14 = vpop.f32.mrf.mxu1 }
 0x172   : > { %v2120_v27 = vadd.f32 %v2068_v17, %v1766_v8  ;;  %v2789_v16 = vpop.f32.mrf.mxu0  ;;  %v1270_v49 = vadd.f32 %v1220_v14, %v6488_v19  ;;  %v4569_v19 = vsel %vm6244_vm7, %v5886_v34, %v4568_v31  ;;  %v3889_v8 = vshrl.u32 %v5783_v18, 16 }
 0x173   : > { %v4204_v14 = vunpack.c.l.b16 %v3874_v47  ;;  %v4698_v31 = vunpack.c.l.b16 %v4572_v3  ;;  %v5590_v47 = vld [vmem:[%s6181_s30 + $0x44] sm:$0x1]  ;;  %v5847_v3 = vld [vmem:[%s6181_s30 + $0x48] sm:$0xe] }
 0x174   : > { %5643 = vmatmul.msk.bf16.gmra.mxu1 %vm387_vm1, %v3159_v39  ;;  %5756 = vmatmul.msk.bf16.gmra.mxu2 %vm387_vm1, %v5952_v13  ;;  %v6974_v22 = vadd.f32 %v2786_v63, %v2120_v27  ;;  %v3864_v63 = vsel %vm6238_vm6, %v3859_v42, %v6959_v58  ;;  %v3131_v39 = vunpack.c.l.b16 %v3003_v60  ;;  %v3132_v13 = vunpack.c.l.b16 %v3006_v40  ;;  %v5784_v42 = vld [vmem:[%s6181_s30 + $0x50] sm:$0x1]  ;;  %v5588_v60 = vld [vmem:[%s6181_s30 + $0x3c] sm:$0xe] }
 0x175   : > { %5821 = vmatmul.msk.bf16.gmra.mxu3 %vm387_vm1, %v4231_v48  ;;  %5902 = vmatmul.msk.bf16.gmra.mxu0 %vm387_vm1, %v4725_v38  ;;  %v4203_v51 = vunpack.c.l.b16 %v3864_v63  ;;  %v4697_v48 = vunpack.c.l.b16 %v4569_v19  ;;  %v3881_v27 = vrot.slane %v3879_v6, 5  ;;  %v3891_v7 = vrot.slane %v3889_v8, 4  ;;  %v5786_v8 = vld [vmem:[%s6181_s30 + $0x58] sm:$0xf] }
 0x176   : > { %v3160_v62 = vpack.c.b16 %v3132_v13, %v3131_v39  ;;  %v3895_v63 = vshll.u32 %v5784_v42, 16  ;;  %v4575_v19 = vrot.slane %v5848_v23, 5  ;;  %v5628_v44 = vrot.slane %v5588_v60, 9 }
 0x177   : > { %v1717_v53 = vpop.f32.mrf.mxu2  ;;  %v3882_v40 = vor.u32 %v3881_v27, %v3878_v41  ;;  %v3011_v6 = vrot.slane %v3009_v36, 4  ;;  %v3012_v39 = vrot.slane %v5590_v47, 5  ;;  %v3909_v42 = vshll.u32 %v5786_v8, 16 }
 0x178   : > { %v1767_v28 = vadd.f32 %v1717_v53, %v1270_v49  ;;  %v2071_v12 = vpop.f32.mrf.mxu3  ;;  %v4232_v49 = vpack.c.b16 %v4204_v14, %v4203_v51  ;;  %v4726_v53 = vpack.c.b16 %v4698_v31, %v4697_v48  ;;  %v3897_v14 = vrot.slane %v3895_v63, 5 }
 0x179   : > { %v1222_v20 = vpop.f32.mrf.mxu1  ;;  %v3883_v13 = vrot.slane %v3882_v40, 4  ;;  %v5887_v31 = vrot.slane %v5847_v3, 9  ;;  %v4577_v32 = vrot.slane %v4575_v19, 4  ;;  %v7031_v63 = vrot.slane %v3909_v42, 5  ;;  %v5787_v3 = vld [vmem:[%s6181_s30 + $0x5c] sm:$0x1] }
 0x17a   : > { %v2121_v17 = vadd.f32 %v2071_v12, %v1767_v28  ;;  %v2791_v58 = vpop.f32.mrf.mxu0  ;;  %v1271_v26 = vadd.f32 %v1222_v20, %v6520_v10  ;;  %v3892_v10 = vor.u32 %v3891_v7, %v6997_v0  ;;  %v5849_v20 = vld [vmem:[%s6181_s30 + $0x50] sm:$0x1]  ;;  %v3900_v7 = vshrl.u32 %v5785_v29, 16 }
 0x17b   : > { %v4578_v41 = vrot.slane %v5849_v20, 5 }
 0x17c   : > { %v6994_v38 = vadd.f32 %v2789_v16, %v2121_v17  ;;  %v5953_v16 = vld [vmem:[%s6181_s30 + $0x3c] sm:$0xff]  ;;  %v3893_v51 = vrot.slane %v3892_v10, 4  ;;  %v3902_v40 = vrot.slane %v3900_v7, 4  ;;  %v5954_v7 = vld [vmem:[%s6181_s30 + $0x48] sm:$0xff] }
 0x17d   : > { %v4579_v60 = vsel %vm6244_vm7, %v4577_v32, %v4578_v41  ;;  %v3919_v32 = vshll.u32 %v5787_v3, 16  ;;  %v5788_v3 = vld [vmem:[%s6181_s30 + $0x60] sm:$0xf] }
 0x17f   : > { %v1719_v54 = vpop.f32.mrf.mxu2 }
 0x180   : > { %v1768_v34 = vadd.f32 %v1719_v54, %v1271_v26  ;;  %v2073_v30 = vpop.f32.mrf.mxu3  ;;  %v3903_v26 = vshll.u32 %v5785_v29, 16  ;;  %v4700_v29 = vunpack.c.l.b16 %v4579_v60 }
 0x181   : > { %v1225_v18 = vpop.f32.mrf.mxu1 }
 0x182   : > { %v2122_v28 = vadd.f32 %v2073_v30, %v1768_v34  ;;  %v2794_v12 = vpop.f32.mrf.mxu0  ;;  %v1272_v48 = vadd.f32 %v1225_v18, %v6545_v59  ;;  %v3010_v30 = vsel %vm6244_vm7, %v5628_v44, %v3009_v36  ;;  %v3888_v59 = vsel %vm6238_vm6, %v3883_v13, %v6997_v0  ;;  %v5592_v36 = vld [vmem:[%s6181_s30 + $0x4c] sm:$0xf] }
 0x183   : > { %v3898_v18 = vsel %vm6238_vm6, %v3893_v51, %v3897_v14  ;;  %v3905_v10 = vrot.slane %v3903_v26, 5  ;;  %v3133_v0 = vunpack.c.l.b16 %v3010_v30  ;;  %v4205_v44 = vunpack.c.l.b16 %v3888_v59  ;;  %v5591_v14 = vld [vmem:[%s6181_s30 + $0x48] sm:$0xe]  ;;  %v5593_v26 = vld [vmem:[%s6181_s30 + $0x50] sm:$0x1] }
 0x184   : > { %5644 = vmatmul.msk.bf16.gmra.mxu1 %vm387_vm1, %v3160_v62  ;;  %5757 = vmatmul.msk.bf16.gmra.mxu2 %vm387_vm1, %v5953_v16  ;;  %v7012_v17 = vadd.f32 %v2791_v58, %v2122_v28  ;;  %v3913_v58 = vshrl.u32 %v5786_v8, 16  ;;  %v3013_v62 = vsel %vm6244_vm7, %v3011_v6, %v3012_v39  ;;  %v4206_v6 = vunpack.c.l.b16 %v3898_v18  ;;  %v5851_v8 = vld [vmem:[%s6181_s30 + $0x58] sm:$0xf]  ;;  %v5850_v30 = vld [vmem:[%s6181_s30 + $0x54] sm:$0xe] }
 0x185   : > { %5822 = vmatmul.msk.bf16.gmra.mxu3 %vm387_vm1, %v4232_v49  ;;  %5903 = vmatmul.msk.bf16.gmra.mxu0 %vm387_vm1, %v4726_v53  ;;  %v4576_v53 = vsel %vm6244_vm7, %v5887_v31, %v4575_v19  ;;  %v3134_v47 = vunpack.c.l.b16 %v3013_v62  ;;  %v3016_v13 = vrot.slane %v5592_v36, 5  ;;  %v4582_v42 = vrot.slane %v5851_v8, 5 }
 0x186   : > { %v3915_v28 = vrot.slane %v3913_v58, 4  ;;  %v4699_v19 = vunpack.c.l.b16 %v4576_v53  ;;  %v5629_v59 = vrot.slane %v5591_v14, 9  ;;  %v3019_v18 = vrot.slane %v5593_v26, 5 }
 0x187   : > { %v1722_v27 = vpop.f32.mrf.mxu2  ;;  %v3921_v36 = vrot.slane %v3919_v32, 5 }
 0x188   : > { %v1769_v54 = vadd.f32 %v1722_v27, %v1272_v48  ;;  %v2076_v23 = vpop.f32.mrf.mxu3  ;;  %v3906_v48 = vor.u32 %v3905_v10, %v3902_v40  ;;  %v3916_v31 = vor.u32 %v3915_v28, %v7031_v63  ;;  %v3161_v27 = vpack.c.b16 %v3134_v47, %v3133_v0 }
 0x189   : > { %v1227_v34 = vpop.f32.mrf.mxu1  ;;  %v5888_v40 = vrot.slane %v5850_v30, 9  ;;  %v4584_v10 = vrot.slane %v4582_v42, 4  ;;  %v5595_v30 = vld [vmem:[%s6181_s30 + $0x58] sm:$0xf] }
 0x18a   : > { %v2123_v16 = vadd.f32 %v2076_v23, %v1769_v54  ;;  %v2796_v49 = vpop.f32.mrf.mxu0  ;;  %v1273_v39 = vadd.f32 %v1227_v34, %v6569_v55  ;;  %v4233_v54 = vpack.c.b16 %v4206_v6, %v4205_v44  ;;  %v4727_v23 = vpack.c.b16 %v4700_v29, %v4699_v19  ;;  %v5852_v55 = vld [vmem:[%s6181_s30 + $0x5c] sm:$0x1]  ;;  %v5789_v44 = vld [vmem:[%s6181_s30 + $0x64] sm:$0xf] }
 0x18b   : > { %v3907_v53 = vrot.slane %v3906_v48, 4  ;;  %v3917_v60 = vrot.slane %v3916_v31, 4  ;;  %v4585_v28 = vrot.slane %v5852_v55, 5  ;;  %v3017_v19 = vsel %vm6244_vm7, %v5629_v59, %v3016_v13 }
 0x18c   : > { %v7034_v20 = vadd.f32 %v2794_v12, %v2123_v16  ;;  %v3018_v16 = vrot.slane %v3016_v13, 4  ;;  %v3924_v48 = vshrl.u32 %v5788_v3, 16  ;;  %v3927_v31 = vshll.u32 %v5788_v3, 16 }
 0x18d   : > { %v4586_v14 = vsel %vm6244_vm7, %v4584_v10, %v4585_v28  ;;  %v3933_v32 = vshll.u32 %v5789_v44, 16  ;;  %v3023_v3 = vrot.slane %v5595_v30, 5 }
 0x18e   : > { %v3020_v29 = vsel %vm6244_vm7, %v3018_v16, %v3019_v18  ;;  %v3926_v55 = vrot.slane %v3924_v48, 4 }
 0x18f   : > { %v1724_v51 = vpop.f32.mrf.mxu2  ;;  %v7069_v59 = vrot.slane %v3933_v32, 5  ;;  %v5791_v32 = vld [vmem:[%s6181_s30 + $0x6c] sm:$0xf] }
 0x190   : > { %v1770_v12 = vadd.f32 %v1724_v51, %v1273_v39  ;;  %v2078_v41 = vpop.f32.mrf.mxu3  ;;  %v3922_v51 = vsel %vm6238_vm6, %v3917_v60, %v3921_v36  ;;  %v5854_v36 = vld [vmem:[%s6181_s30 + $0x64] sm:$0xf] }
 0x191   : > { %v1230_v58 = vpop.f32.mrf.mxu1 }
 0x192   : > { %v2124_v34 = vadd.f32 %v2078_v41, %v1770_v12  ;;  %v2799_v62 = vpop.f32.mrf.mxu0  ;;  %v1274_v47 = vadd.f32 %v1230_v58, %v6405_v1  ;;  %v4583_v1 = vsel %vm6244_vm7, %v5888_v40, %v4582_v42  ;;  %v3937_v12 = vshrl.u32 %v5789_v44, 16 }
 0x193   : > { %v4208_v58 = vunpack.c.l.b16 %v3922_v51  ;;  %v4702_v42 = vunpack.c.l.b16 %v4586_v14  ;;  %v5596_v51 = vld [vmem:[%s6181_s30 + $0x5c] sm:$0x1]  ;;  %v5853_v14 = vld [vmem:[%s6181_s30 + $0x60] sm:$0xe] }
 0x194   : > { %5645 = vmatmul.msk.bf16.gmra.mxu1 %vm387_vm1, %v3161_v27  ;;  %5758 = vmatmul.msk.bf16.gmra.mxu2 %vm387_vm1, %v5954_v7  ;;  %v7046_v0 = vadd.f32 %v2796_v49, %v2124_v34  ;;  %v3912_v49 = vsel %vm6238_vm6, %v3907_v53, %v7031_v63  ;;  %v3135_v27 = vunpack.c.l.b16 %v3017_v19  ;;  %v3136_v7 = vunpack.c.l.b16 %v3020_v29  ;;  %v5790_v53 = vld [vmem:[%s6181_s30 + $0x68] sm:$0x1]  ;;  %v5594_v19 = vld [vmem:[%s6181_s30 + $0x54] sm:$0xe] }
 0x195   : > { %5823 = vmatmul.msk.bf16.gmra.mxu3 %vm387_vm1, %v4233_v54  ;;  %5904 = vmatmul.msk.bf16.gmra.mxu0 %vm387_vm1, %v4727_v23  ;;  %v4207_v26 = vunpack.c.l.b16 %v3912_v49  ;;  %v4701_v54 = vunpack.c.l.b16 %v4583_v1  ;;  %v3929_v34 = vrot.slane %v3927_v31, 5  ;;  %v3939_v16 = vrot.slane %v3937_v12, 4  ;;  %v5792_v12 = vld [vmem:[%s6181_s30 + $0x70] sm:$0xf] }
 0x196   : > { %v3162_v28 = vpack.c.b16 %v3136_v7, %v3135_v27  ;;  %v3943_v49 = vshll.u32 %v5790_v53, 16  ;;  %v4589_v1 = vrot.slane %v5854_v36, 5  ;;  %v5630_v48 = vrot.slane %v5594_v19, 9 }
 0x197   : > { %v1727_v6 = vpop.f32.mrf.mxu2  ;;  %v3930_v29 = vor.u32 %v3929_v34, %v3926_v55  ;;  %v3025_v31 = vrot.slane %v3023_v3, 4  ;;  %v3026_v27 = vrot.slane %v5596_v51, 5  ;;  %v5889_v30 = vrot.slane %v5853_v14, 9 }
 0x198   : > { %v1771_v8 = vadd.f32 %v1727_v6, %v1274_v47  ;;  %v2081_v39 = vpop.f32.mrf.mxu3  ;;  %v4234_v47 = vpack.c.b16 %v4208_v58, %v4207_v26  ;;  %v4728_v6 = vpack.c.b16 %v4702_v42, %v4701_v54  ;;  %v3945_v58 = vrot.slane %v3943_v49, 5  ;;  %v7483_v54 = vld [vmem:[#allocation3_spill] sm:$0xff] }
 0x199   : > { %v1232_v13 = vpop.f32.mrf.mxu1  ;;  %v3931_v7 = vrot.slane %v3930_v29, 4  ;;  %v4591_v55 = vrot.slane %v4589_v1, 4  ;;  %v3951_v53 = vshll.u32 %v5791_v32, 16  ;;  %v4590_v29 = vsel %vm6244_vm7, %v5889_v30, %v4589_v1  ;;  %v5597_v30 = vld [vmem:[%s6181_s30 + $0x60] sm:$0xe] }
 0x19a   : > { %v2125_v41 = vadd.f32 %v2081_v39, %v1771_v8  ;;  %v2801_v63 = vpop.f32.mrf.mxu0  ;;  %v1275_v18 = vadd.f32 %v1232_v13, %v6424_v37  ;;  %v3940_v37 = vor.u32 %v3939_v16, %v7069_v59  ;;  %v5855_v13 = vld [vmem:[%s6181_s30 + $0x68] sm:$0x1]  ;;  %v4703_v1 = vunpack.c.l.b16 %v4590_v29 }
 0x19b   : > { %v4592_v34 = vrot.slane %v5855_v13, 5  ;;  %v5631_v29 = vrot.slane %v5597_v30, 9 }
 0x19c   : > { %v7066_v23 = vadd.f32 %v2799_v62, %v2125_v41  ;;  %v5955_v62 = vld [vmem:[%s6181_s30 + $0x54] sm:$0xff]  ;;  %v3941_v26 = vrot.slane %v3940_v37, 4 }
 0x19d   : > { %v4593_v37 = vsel %vm6244_vm7, %v4591_v55, %v4592_v34 }
 0x19e   : > { %v3946_v19 = vsel %vm6238_vm6, %v3941_v26, %v3945_v58  ;;  %v7484_v26 = vld [vmem:[#allocation4_spill] sm:$0xff] }
 0x19f   : > { %v1729_v60 = vpop.f32.mrf.mxu2 }
 0x1a0   : > { %v1772_v40 = vadd.f32 %v1729_v60, %v1275_v18  ;;  %v2083_v10 = vpop.f32.mrf.mxu3  ;;  %v3948_v18 = vshrl.u32 %v5791_v32, 16  ;;  %v3957_v60 = vshll.u32 %v5792_v12, 16 }
 0x1a1   : > { %v1235_v44 = vpop.f32.mrf.mxu1 }
 0x1a2   : > { %v2126_v8 = vadd.f32 %v2083_v10, %v1772_v40  ;;  %v2804_v39 = vpop.f32.mrf.mxu0  ;;  %v1276_v42 = vadd.f32 %v1235_v44, %v7483_v54  ;;  %v3950_v49 = vrot.slane %v3948_v18, 4  ;;  %v7103_v51 = vrot.slane %v3957_v60, 5  ;;  %v5956_v60 = vld [vmem:[%s6181_s30 + $0x60] sm:$0xff] }
 0x1a4   : > { %5646 = vmatmul.msk.bf16.gmra.mxu1 %vm387_vm1, %v3162_v28  ;;  %5759 = vmatmul.msk.bf16.gmra.mxu2 %vm387_vm1, %v5955_v62  ;;  %v7084_v41 = vadd.f32 %v2801_v63, %v2126_v8  ;;  %v3961_v63 = vshrl.u32 %v5792_v12, 16  ;;  %v3024_v28 = vsel %vm6244_vm7, %v5630_v48, %v3023_v3  ;;  %v3027_v62 = vsel %vm6244_vm7, %v3025_v31, %v3026_v27  ;;  %v5598_v3 = vld [vmem:[%s6181_s30 + $0x64] sm:$0xf]  ;;  %v5793_v48 = vld [vmem:[%s6181_s30 + $0x74] sm:$0x1] }
 0x1a5   : > { %5824 = vmatmul.msk.bf16.gmra.mxu3 %vm387_vm1, %v4234_v47  ;;  %5905 = vmatmul.msk.bf16.gmra.mxu0 %vm387_vm1, %v4728_v6  ;;  %v3936_v47 = vsel %vm6238_vm6, %v3931_v7, %v7069_v59  ;;  %v3953_v8 = vrot.slane %v3951_v53, 5  ;;  %v3137_v59 = vunpack.c.l.b16 %v3024_v28  ;;  %v3138_v13 = vunpack.c.l.b16 %v3027_v62  ;;  %v5857_v7 = vld [vmem:[%s6181_s30 + $0x70] sm:$0xf] }
 0x1a6   : > { %v3963_v14 = vrot.slane %v3961_v63, 4  ;;  %v4209_v32 = vunpack.c.l.b16 %v3936_v47  ;;  %v4210_v12 = vunpack.c.l.b16 %v3946_v19  ;;  %v4704_v27 = vunpack.c.l.b16 %v4593_v37  ;;  %v5599_v63 = vld [vmem:[%s6181_s30 + $0x68] sm:$0x1]  ;;  %v5856_v47 = vld [vmem:[%s6181_s30 + $0x6c] sm:$0xe] }
 0x1a7   : > { %v1732_v16 = vpop.f32.mrf.mxu2  ;;  %v3030_v54 = vrot.slane %v5598_v3, 5  ;;  %v3954_v55 = vor.u32 %v3953_v8, %v3950_v49  ;;  %v3163_v53 = vpack.c.b16 %v3138_v13, %v3137_v59  ;;  %v3033_v3 = vrot.slane %v5599_v63, 5 }
 0x1a8   : > { %v1773_v36 = vadd.f32 %v1732_v16, %v1276_v42  ;;  %v2086_v40 = vpop.f32.mrf.mxu3  ;;  %v3964_v34 = vor.u32 %v3963_v14, %v7103_v51  ;;  %v3967_v16 = vshll.u32 %v5793_v48, 16  ;;  %v4235_v28 = vpack.c.b16 %v4210_v12, %v4209_v32  ;;  %v7485_v12 = vld [vmem:[#allocation5_spill] sm:$0xff] }
 0x1a9   : > { %v1237_v10 = vpop.f32.mrf.mxu1  ;;  %v4729_v62 = vpack.c.b16 %v4704_v27, %v4703_v1  ;;  %v3032_v37 = vrot.slane %v3030_v54, 4  ;;  %v3955_v49 = vrot.slane %v3954_v55, 4  ;;  %v5890_v59 = vrot.slane %v5856_v47, 9  ;;  %v5794_v27 = vld [vmem:[%s6181_s30 + $0x78] sm:$0xf] }
 0x1aa   : > { %v2127_v44 = vadd.f32 %v2086_v40, %v1773_v36  ;;  %v2806_v6 = vpop.f32.mrf.mxu0  ;;  %v1277_v58 = vadd.f32 %v1237_v10, %v7484_v26  ;;  %v4596_v36 = vrot.slane %v5857_v7, 5  ;;  %v5858_v10 = vld [vmem:[%s6181_s30 + $0x74] sm:$0x1]  ;;  %v3965_v8 = vrot.slane %v3964_v34, 4  ;;  %v5795_v7 = vld [vmem:[%s6181_s30 + $0x7c] sm:$0xf] }
 0x1ab   : > { %v3969_v14 = vrot.slane %v3967_v16, 5  ;;  %v4599_v48 = vrot.slane %v5858_v10, 5  ;;  %v3985_v63 = vshrl.u32 %v5795_v7, 16 }
 0x1ac   : > { %v7106_v31 = vadd.f32 %v2804_v39, %v2127_v44  ;;  %v4598_v13 = vrot.slane %v4596_v36, 4  ;;  %v4597_v16 = vsel %vm6244_vm7, %v5890_v59, %v4596_v36  ;;  %v7486_v59 = vld [vmem:[#allocation6_spill] sm:$0xff] }
 0x1ad   : > { %v3970_v34 = vsel %vm6238_vm6, %v3965_v8, %v3969_v14  ;;  %v3987_v14 = vrot.slane %v3985_v63, 4  ;;  %v5859_v63 = vld [vmem:[%s6181_s30 + $0x78] sm:$0xe] }
 0x1ae   : > { %v4212_v10 = vunpack.c.l.b16 %v3970_v34  ;;  %v5602_v34 = vld [vmem:[%s6181_s30 + $0x74] sm:$0x1] }
 0x1af   : > { %v1734_v42 = vpop.f32.mrf.mxu2 }
 0x1b0   : > { %v1774_v39 = vadd.f32 %v1734_v42, %v1277_v58  ;;  %v2088_v18 = vpop.f32.mrf.mxu3  ;;  %v3031_v58 = vsel %vm6244_vm7, %v5631_v29, %v3030_v54  ;;  %v3034_v42 = vsel %vm6244_vm7, %v3032_v37, %v3033_v3  ;;  %v5601_v37 = vld [vmem:[%s6181_s30 + $0x70] sm:$0xf] }
 0x1b1   : > { %v1240_v40 = vpop.f32.mrf.mxu1 }
 0x1b2   : > { %v2128_v44 = vadd.f32 %v2088_v18, %v1774_v39  ;;  %v2809_v19 = vpop.f32.mrf.mxu0  ;;  %v1278_v1 = vadd.f32 %v1240_v40, %v7485_v12  ;;  %v4600_v39 = vsel %vm6244_vm7, %v4598_v13, %v4599_v48  ;;  %v3972_v18 = vshrl.u32 %v5794_v27, 16  ;;  %v5796_v48 = vld [vmem:[%s6181_s30 + $0x80] sm:$0x1] }
 0x1b3   : > { %v4706_v36 = vunpack.c.l.b16 %v4600_v39 }
 0x1b4   : > { %5647 = vmatmul.msk.bf16.gmra.mxu1 %vm387_vm1, %v3163_v53  ;;  %5760 = vmatmul.msk.bf16.gmra.mxu2 %vm387_vm1, %v5956_v60  ;;  %v7118_v32 = vadd.f32 %v2806_v6, %v2128_v44  ;;  %v3960_v6 = vsel %vm6238_vm6, %v3955_v49, %v7103_v51  ;;  %v3975_v53 = vshll.u32 %v5794_v27, 16  ;;  %v3981_v60 = vshll.u32 %v5795_v7, 16 }
 0x1b5   : > { %5825 = vmatmul.msk.bf16.gmra.mxu3 %vm387_vm1, %v4235_v28  ;;  %5906 = vmatmul.msk.bf16.gmra.mxu0 %vm387_vm1, %v4729_v62  ;;  %v3139_v28 = vunpack.c.l.b16 %v3031_v58  ;;  %v3140_v62 = vunpack.c.l.b16 %v3034_v42  ;;  %v4211_v47 = vunpack.c.l.b16 %v3960_v6  ;;  %v4705_v44 = vunpack.c.l.b16 %v4597_v16  ;;  %v5957_v58 = vld [vmem:[%s6181_s30 + $0x6c] sm:$0xff] }
 0x1b6   : > { %v3974_v3 = vrot.slane %v3972_v18, 4  ;;  %v3977_v49 = vrot.slane %v3975_v53, 5  ;;  %v3983_v8 = vrot.slane %v3981_v60, 5  ;;  %v3037_v42 = vrot.slane %v5601_v37, 5 }
 0x1b7   : > { %v1737_v26 = vpop.f32.mrf.mxu2  ;;  %v3991_v18 = vshll.u32 %v5796_v48, 16 }
 0x1b8   : > { %v1775_v30 = vadd.f32 %v1737_v26, %v1278_v1  ;;  %v2091_v55 = vpop.f32.mrf.mxu3  ;;  %v5860_v1 = vld [vmem:[%s6181_s30 + $0x7c] sm:$0xf]  ;;  %v3164_v26 = vpack.c.b16 %v3140_v62, %v3139_v28  ;;  %v3978_v16 = vor.u32 %v3977_v49, %v3974_v3  ;;  %v3988_v39 = vor.u32 %v3987_v14, %v3983_v8  ;;  %v7488_v49 = vld [vmem:[#allocation7_spill] sm:$0xff] }
 0x1b9   : > { %v1242_v54 = vpop.f32.mrf.mxu1  ;;  %v4603_v60 = vrot.slane %v5860_v1, 5  ;;  %v3039_v62 = vrot.slane %v3037_v42, 4  ;;  %v3993_v3 = vrot.slane %v3991_v18, 5 }
 0x1ba   : > { %v2129_v40 = vadd.f32 %v2091_v55, %v1775_v30  ;;  %v2811_v51 = vpop.f32.mrf.mxu0  ;;  %v1279_v13 = vadd.f32 %v1242_v54, %v7486_v59  ;;  %v4730_v30 = vpack.c.b16 %v4706_v36, %v4705_v44  ;;  %v5600_v55 = vld [vmem:[%s6181_s30 + $0x6c] sm:$0xe]  ;;  %v3979_v36 = vrot.slane %v3978_v16, 4 }
 0x1bb   : > { %v5632_v28 = vrot.slane %v5600_v55, 9  ;;  %v3989_v37 = vrot.slane %v3988_v39, 4  ;;  %v5891_v59 = vrot.slane %v5859_v63, 9 }
 0x1bc   : > { %v7138_v29 = vadd.f32 %v2809_v19, %v2129_v40  ;;  %v4236_v19 = vpack.c.b16 %v4212_v10, %v4211_v47  ;;  %v5861_v40 = vld [vmem:[%s6181_s30 + $0x80] sm:$0x1]  ;;  %v3040_v47 = vrot.slane %v5602_v34, 5  ;;  %v5797_v10 = vld [vmem:[%s6181_s30 + $0x84] sm:$0xf] }
 0x1bd   : > { %v4606_v48 = vrot.slane %v5861_v40, 5  ;;  %v3994_v55 = vsel %vm6238_vm6, %v3989_v37, %v3993_v3  ;;  %v5604_v40 = vld [vmem:[%s6181_s30 + $0x7c] sm:$0xf] }
 0x1bf   : > { %v1739_v12 = vpop.f32.mrf.mxu2 }
 0x1c0   : > { %v1776_v27 = vadd.f32 %v1739_v12, %v1279_v13  ;;  %v2093_v7 = vpop.f32.mrf.mxu3  ;;  %v4605_v13 = vrot.slane %v4603_v60, 4  ;;  %v5798_v12 = vld [vmem:[%s6181_s30 + $0x88] sm:$0xf] }
 0x1c1   : > { %v1245_v6 = vpop.f32.mrf.mxu1  ;;  %v4005_v34 = vshll.u32 %v5798_v12, 16  ;;  %v4009_v16 = vshrl.u32 %v5798_v12, 16 }
 0x1c2   : > { %v2130_v54 = vadd.f32 %v2093_v7, %v1776_v27  ;;  %v2814_v53 = vpop.f32.mrf.mxu0  ;;  %v1280_v14 = vadd.f32 %v1245_v6, %v7488_v49  ;;  %v3996_v27 = vshrl.u32 %v5797_v10, 16  ;;  %v3999_v7 = vshll.u32 %v5797_v10, 16 }
 0x1c3   : > { %v3984_v6 = vsel %vm6238_vm6, %v3979_v36, %v3983_v8  ;;  %v4214_v10 = vunpack.c.l.b16 %v3994_v55  ;;  %v4011_v49 = vrot.slane %v4009_v16, 4 }
 0x1c4   : > { %5648 = vmatmul.msk.bf16.gmra.mxu1 %vm387_vm1, %v3164_v26  ;;  %5761 = vmatmul.msk.bf16.gmra.mxu2 %vm387_vm1, %v5957_v58  ;;  %v7152_v44 = vadd.f32 %v2811_v51, %v2130_v54  ;;  %v3038_v58 = vsel %vm6244_vm7, %v5632_v28, %v3037_v42  ;;  %v4604_v54 = vsel %vm6244_vm7, %v5891_v59, %v4603_v60  ;;  %v3998_v28 = vrot.slane %v3996_v27, 4 }
 0x1c5   : > { %5826 = vmatmul.msk.bf16.gmra.mxu3 %vm387_vm1, %v4236_v19  ;;  %5907 = vmatmul.msk.bf16.gmra.mxu0 %vm387_vm1, %v4730_v30  ;;  %v3041_v19 = vsel %vm6244_vm7, %v3039_v62, %v3040_v47  ;;  %v4607_v42 = vsel %vm6244_vm7, %v4605_v13, %v4606_v48  ;;  %v3141_v63 = vunpack.c.l.b16 %v3038_v58  ;;  %v4001_v8 = vrot.slane %v3999_v7, 5  ;;  %v5799_v48 = vld [vmem:[%s6181_s30 + $0x8c] sm:$0x1] }
 0x1c6   : > { %7487 = vst [vmem:[#allocation3_spill] sm:$0xff] %v7152_v44  ;;  %v3142_v62 = vunpack.c.l.b16 %v3041_v19  ;;  %v4213_v47 = vunpack.c.l.b16 %v3984_v6  ;;  %v4707_v37 = vunpack.c.l.b16 %v4604_v54  ;;  %v4708_v3 = vunpack.c.l.b16 %v4607_v42  ;;  %v5605_v19 = vld [vmem:[%s6181_s30 + $0x80] sm:$0x1] }
 0x1c7   : > { %v1742_v1 = vpop.f32.mrf.mxu2  ;;  %v4007_v60 = vrot.slane %v4005_v34, 5  ;;  %v3044_v13 = vrot.slane %v5604_v40, 5  ;;  %v4002_v27 = vor.u32 %v4001_v8, %v3998_v28  ;;  %v4015_v16 = vshll.u32 %v5799_v48, 16 }
 0x1c8   : > { %v1777_v26 = vadd.f32 %v1742_v1, %v1280_v14  ;;  %v2096_v51 = vpop.f32.mrf.mxu3  ;;  %v7490_v14 = vld [vmem:[#allocation8_spill] sm:$0xff]  ;;  %v5603_v1 = vld [vmem:[%s6181_s30 + $0x78] sm:$0xe]  ;;  %v3165_v58 = vpack.c.b16 %v3142_v62, %v3141_v63  ;;  %v4237_v55 = vpack.c.b16 %v4214_v10, %v4213_v47  ;;  %v3047_v8 = vrot.slane %v5605_v19, 5  ;;  %v5800_v10 = vld [vmem:[%s6181_s30 + $0x90] sm:$0xf] }
 0x1c9   : > { %v1247_v30 = vpop.f32.mrf.mxu1  ;;  %v4012_v34 = vor.u32 %v4011_v49, %v4007_v60  ;;  %v5633_v42 = vrot.slane %v5603_v1, 9  ;;  %v3046_v40 = vrot.slane %v3044_v13, 4  ;;  %v5864_v63 = vld [vmem:[%s6181_s30 + $0x8c] sm:$0x1]  ;;  %v7492_v1 = vld [vmem:[#allocation9_spill] sm:$0xff]  ;;  %v4023_v19 = vshll.u32 %v5800_v10, 16 }
 0x1ca   : > { %v2131_v39 = vadd.f32 %v2096_v51, %v1777_v26  ;;  %v2816_v18 = vpop.f32.mrf.mxu0  ;;  %v1281_v59 = vadd.f32 %v1247_v30, %v7490_v14  ;;  %v5863_v26 = vld [vmem:[%s6181_s30 + $0x88] sm:$0xf]  ;;  %v4003_v14 = vrot.slane %v4002_v27, 4 }
 0x1cb   : > { %v4610_v28 = vrot.slane %v5863_v26, 5  ;;  %v4013_v47 = vrot.slane %v4012_v34, 4 }
 0x1cc   : > { %v7171_v36 = vadd.f32 %v2814_v53, %v2131_v39  ;;  %v5958_v53 = vld [vmem:[%s6181_s30 + $0x78] sm:$0xff]  ;;  %v4731_v39 = vpack.c.b16 %v4708_v3, %v4707_v37  ;;  %v5801_v37 = vld [vmem:[%s6181_s30 + $0x94] sm:$0xf]  ;;  %v4017_v3 = vrot.slane %v4015_v16, 5 }
 0x1cd   : > { %v4612_v48 = vrot.slane %v4610_v28, 4 }
 0x1ce   : > { %7489 = vst [vmem:[#allocation4_spill] sm:$0xff] %v7171_v36 }
 0x1cf   : > { %v1744_v12 = vpop.f32.mrf.mxu2 }
 0x1d0   : > { %v1778_v7 = vadd.f32 %v1744_v12, %v1281_v59  ;;  %v2098_v51 = vpop.f32.mrf.mxu3  ;;  %v5862_v59 = vld [vmem:[%s6181_s30 + $0x84] sm:$0xe]  ;;  %v4613_v12 = vrot.slane %v5864_v63, 5  ;;  %v4025_v63 = vrot.slane %v4023_v19, 5 }
 0x1d1   : > { %v3233_v6 = vpop.f32.mrf.mxu1  ;;  %v5892_v49 = vrot.slane %v5862_v59, 9  ;;  %v5606_v19 = vld [vmem:[%s6181_s30 + $0x84] sm:$0xe] }
 0x1d2   : > { %v2132_v30 = vadd.f32 %v2098_v51, %v1778_v7  ;;  %v7179_v54 = vpop.f32.mrf.mxu0  ;;  %v3313_v27 = vadd.f32 %v3233_v6, %v7492_v1  ;;  %v3048_v7 = vsel %vm6244_vm7, %v3046_v40, %v3047_v8  ;;  %v4008_v51 = vsel %vm6238_vm6, %v4003_v14, %v4007_v60  ;;  %v5607_v14 = vld [vmem:[%s6181_s30 + $0x88] sm:$0xf]  ;;  %v5802_v1 = vld [vmem:[%s6181_s30 + $0x98] sm:$0x1] }
 0x1d3   : > { %v4611_v60 = vsel %vm6244_vm7, %v5892_v49, %v4610_v28  ;;  %v3144_v40 = vunpack.c.l.b16 %v3048_v7  ;;  %v4215_v8 = vunpack.c.l.b16 %v4008_v51  ;;  %v3051_v7 = vrot.slane %v5607_v14, 5  ;;  %v5865_v14 = vld [vmem:[%s6181_s30 + $0x90] sm:$0xe] }
 0x1d4   : > { %5649 = vmatmul.msk.bf16.gmra.mxu1 %vm387_vm1, %v3165_v58  ;;  %5762 = vmatmul.msk.bf16.gmra.mxu2 %vm387_vm1, %v5958_v53  ;;  %v7185_v62 = vadd.f32 %v2816_v18, %v2132_v30  ;;  %v3045_v18 = vsel %vm6244_vm7, %v5633_v42, %v3044_v13  ;;  %v4020_v53 = vshrl.u32 %v5800_v10, 16  ;;  %v4018_v13 = vsel %vm6238_vm6, %v4013_v47, %v4017_v3 }
 0x1d5   : > { %5827 = vmatmul.msk.bf16.gmra.mxu3 %vm387_vm1, %v4237_v55  ;;  %5908 = vmatmul.msk.bf16.gmra.mxu0 %vm387_vm1, %v4731_v39  ;;  %v4029_v55 = vshll.u32 %v5801_v37, 16  ;;  %v4033_v39 = vshrl.u32 %v5801_v37, 16  ;;  %v4614_v30 = vsel %vm6244_vm7, %v4612_v48, %v4613_v12  ;;  %v3143_v42 = vunpack.c.l.b16 %v3045_v18  ;;  %v5866_v12 = vld [vmem:[%s6181_s30 + $0x94] sm:$0xf] }
 0x1d6   : > { %7491 = vst [vmem:[#allocation5_spill] sm:$0xff] %v7185_v62  ;;  %v4022_v59 = vrot.slane %v4020_v53, 4  ;;  %v4216_v28 = vunpack.c.l.b16 %v4018_v13  ;;  %v4709_v3 = vunpack.c.l.b16 %v4611_v60  ;;  %v4710_v49 = vunpack.c.l.b16 %v4614_v30 }
 0x1d7   : > { %v3587_v26 = vpop.f32.mrf.mxu2  ;;  %v7212_v10 = vrot.slane %v4029_v55, 5  ;;  %v4035_v47 = vrot.slane %v4033_v39, 4  ;;  %v3166_v18 = vpack.c.b16 %v3144_v40, %v3143_v42  ;;  %v5608_v55 = vld [vmem:[%s6181_s30 + $0x8c] sm:$0x1]  ;;  %v4617_v62 = vrot.slane %v5866_v12, 5 }
 0x1d8   : > { %v4305_v58 = vpop.f32.mrf.mxu3  ;;  %v3667_v34 = vadd.f32 %v3587_v26, %v3313_v27  ;;  %v7494_v27 = vld [vmem:[#allocation10_spill] sm:$0xff]  ;;  %v4026_v39 = vor.u32 %v4025_v63, %v4022_v59  ;;  %v4238_v30 = vpack.c.b16 %v4216_v28, %v4215_v8  ;;  %v3053_v36 = vrot.slane %v3051_v7, 4 }
 0x1d9   : > { %v3235_v16 = vpop.f32.mrf.mxu1  ;;  %v3054_v44 = vrot.slane %v5608_v55, 5  ;;  %v4619_v28 = vrot.slane %v4617_v62, 4 }
 0x1da   : > { %v4801_v6 = vpop.f32.mrf.mxu0  ;;  %v4385_v37 = vadd.f32 %v4305_v58, %v3667_v34  ;;  %v3314_v48 = vadd.f32 %v3235_v16, %v7494_v27  ;;  %v5959_v58 = vld [vmem:[%s6181_s30 + $0x84] sm:$0xff]  ;;  %v4036_v34 = vor.u32 %v4035_v47, %v7212_v10  ;;  %v4039_v16 = vshll.u32 %v5802_v1, 16  ;;  %v5803_v47 = vld [vmem:[%s6181_s30 + $0x9c] sm:$0xf] }
 0x1db   : > { %v4732_v27 = vpack.c.b16 %v4710_v49, %v4709_v3  ;;  %v5804_v49 = vld [vmem:[%s6181_s30 + $0xa0] sm:$0xf]  ;;  %v4044_v55 = vshrl.u32 %v5803_v47, 16 }
 0x1dc   : > { %v4879_v13 = vadd.f32 %v7179_v54, %v4385_v37  ;;  %v4027_v54 = vrot.slane %v4026_v39, 4  ;;  %v4037_v63 = vrot.slane %v4036_v34, 4  ;;  %v4041_v8 = vrot.slane %v4039_v16, 5 }
 0x1dd   : > { %v4047_v39 = vshll.u32 %v5803_v47, 16 }
 0x1de   : > { %v5077_v37 = vmul.f32 %v4879_v13, %v4879_v13 }
 0x1df   : > { %v3589_v26 = vpop.f32.mrf.mxu2 }
 0x1e0   : > { %v3668_v51 = vadd.f32 %v3589_v26, %v3314_v48  ;;  %v4307_v53 = vpop.f32.mrf.mxu3  ;;  %v5867_v48 = vld [vmem:[%s6181_s30 + $0x98] sm:$0x1]  ;;  %v5634_v26 = vrot.slane %v5606_v19, 9  ;;  %v3055_v19 = vsel %vm6244_vm7, %v3053_v36, %v3054_v44 }
 0x1e1   : > { %v3238_v60 = vpop.f32.mrf.mxu1  ;;  %v4620_v3 = vrot.slane %v5867_v48, 5 }
 0x1e2   : > { %v4386_v42 = vadd.f32 %v4307_v53, %v3668_v51  ;;  %v4804_v40 = vpop.f32.mrf.mxu0  ;;  %v3315_v51 = vadd.f32 %v3238_v60, %v6667_v52  ;;  %v4032_v52 = vsel %vm6238_vm6, %v4027_v54, %v7212_v10 }
 0x1e3   : > { %v4621_v36 = vsel %vm6244_vm7, %v4619_v28, %v4620_v3 }
 0x1e4   : > { %v4880_v59 = vadd.f32 %v4801_v6, %v4386_v42  ;;  %5650 = vmatmul.msk.bf16.gmra.mxu1 %vm387_vm1, %v3166_v18  ;;  %5763 = vmatmul.msk.bf16.gmra.mxu2 %vm387_vm1, %v5959_v58  ;;  %v5893_v6 = vrot.slane %v5865_v14, 9  ;;  %v3052_v58 = vsel %vm6244_vm7, %v5634_v26, %v3051_v7  ;;  %v4057_v42 = vshrl.u32 %v5804_v49, 16 }
 0x1e5   : > { %5828 = vmatmul.msk.bf16.gmra.mxu3 %vm387_vm1, %v4238_v30  ;;  %5909 = vmatmul.msk.bf16.gmra.mxu0 %vm387_vm1, %v4732_v27  ;;  %v4053_v27 = vshll.u32 %v5804_v49, 16  ;;  %v4042_v7 = vsel %vm6238_vm6, %v4037_v63, %v4041_v8  ;;  %v3145_v48 = vunpack.c.l.b16 %v3052_v58  ;;  %v3146_v26 = vunpack.c.l.b16 %v3055_v19 }
 0x1e6   : > { %v5969_v1 = vpack.c.bf16 %v4880_v59, %v4879_v13  ;;  %v5039_v12 = vadd.f32 %v4880_v59, %v4879_v13  ;;  %v5078_v18 = vmul.f32 %v4880_v59, %v4880_v59  ;;  %v4618_v44 = vsel %vm6244_vm7, %v5893_v6, %v4617_v62 }
 0x1e7   : > { %v3592_v53 = vpop.f32.mrf.mxu2  ;;  %v4046_v59 = vrot.slane %v4044_v55, 4  ;;  %v4049_v49 = vrot.slane %v4047_v39, 5  ;;  %v7258_v10 = vrot.slane %v4053_v27, 5  ;;  %v4059_v54 = vrot.slane %v4057_v42, 4  ;;  %v5611_v27 = vld [vmem:[%s6181_s30 + $0x98] sm:$0x1] }
 0x1e8   : > { %5970 = vst [vmem:[%s7237_s20] sm:$0xff] %v5969_v1   ;;  %v5109_v34 = vadd.f32 %v5078_v18, %v5077_v37  ;;  %v3669_v16 = vadd.f32 %v3592_v53, %v3315_v51  ;;  %v4310_v30 = vpop.f32.mrf.mxu3  ;;  %v5610_v37 = vld [vmem:[%s6181_s30 + $0x94] sm:$0xf]  ;;  %v4217_v1 = vunpack.c.l.b16 %v4032_v52  ;;  %v4218_v63 = vunpack.c.l.b16 %v4042_v7  ;;  %v5805_v18 = vld [vmem:[%s6181_s30 + $0xa4] sm:$0x1]  ;;  %v5869_v51 = vld [vmem:[%s6181_s30 + $0xa0] sm:$0xf] }
 0x1e9   : > { %v3240_v13 = vpop.f32.mrf.mxu1  ;;  %v4711_v62 = vunpack.c.l.b16 %v4618_v44  ;;  %v4712_v8 = vunpack.c.l.b16 %v4621_v36  ;;  %v3058_v58 = vrot.slane %v5610_v37, 5  ;;  %v4050_v42 = vor.u32 %v4049_v49, %v4046_v59 }
 0x1ea   : > { %v4387_v60 = vadd.f32 %v4310_v30, %v3669_v16  ;;  %v4806_v14 = vpop.f32.mrf.mxu0  ;;  %v3316_v3 = vadd.f32 %v3240_v13, %v6669_v61  ;;  %v5960_v16 = vld [vmem:[%s6181_s30 + $0x90] sm:$0xff]  ;;  %v4060_v52 = vor.u32 %v4059_v54, %v7258_v10  ;;  %v4063_v13 = vshll.u32 %v5805_v18, 16  ;;  %v5806_v54 = vld [vmem:[%s6181_s30 + $0xa8] sm:$0xf]  ;;  %v5807_v18 = vld [vmem:[%s6181_s30 + $0xac] sm:$0xf] }
 0x1eb   : > { %v5609_v30 = vld [vmem:[%s6181_s30 + $0x90] sm:$0xe]  ;;  %v4733_v61 = vpack.c.b16 %v4712_v8, %v4711_v62  ;;  %v4624_v7 = vrot.slane %v5869_v51, 5  ;;  %v3060_v37 = vrot.slane %v3058_v58, 4  ;;  %v4051_v59 = vrot.slane %v4050_v42, 4 }
 0x1ec   : > { %v4881_v47 = vadd.f32 %v4804_v40, %v4387_v60  ;;  %v3167_v40 = vpack.c.b16 %v3146_v26, %v3145_v48  ;;  %v4239_v60 = vpack.c.b16 %v4218_v63, %v4217_v1  ;;  %v5868_v48 = vld [vmem:[%s6181_s30 + $0x9c] sm:$0xe]  ;;  %v5870_v26 = vld [vmem:[%s6181_s30 + $0xa4] sm:$0x1]  ;;  %v4061_v49 = vrot.slane %v4060_v52, 4 }
 0x1ed   : > { %v4065_v1 = vrot.slane %v4063_v13, 5  ;;  %v5894_v63 = vrot.slane %v5868_v48, 9  ;;  %v4626_v62 = vrot.slane %v4624_v7, 4  ;;  %v4627_v8 = vrot.slane %v5870_v26, 5 }
 0x1ee   : > { %v5040_v6 = vadd.f32 %v5039_v12, %v4881_v47  ;;  %v5079_v28 = vmul.f32 %v4881_v47, %v4881_v47 }
 0x1ef   : > { %v3594_v53 = vpop.f32.mrf.mxu2 }
 0x1f0   : > { %v5110_v19 = vadd.f32 %v5109_v34, %v5079_v28  ;;  %v3670_v55 = vadd.f32 %v3594_v53, %v3316_v3  ;;  %v4312_v39 = vpop.f32.mrf.mxu3  ;;  %v5635_v34 = vrot.slane %v5609_v30, 9  ;;  %v3061_v28 = vrot.slane %v5611_v27, 5 }
 0x1f1   : > { %v3243_v12 = vpop.f32.mrf.mxu1  ;;  %v4068_v30 = vshrl.u32 %v5806_v54, 16  ;;  %v4071_v27 = vshll.u32 %v5806_v54, 16 }
 0x1f2   : > { %v4388_v44 = vadd.f32 %v4312_v39, %v3670_v55  ;;  %v4809_v36 = vpop.f32.mrf.mxu0  ;;  %v3059_v39 = vsel %vm6244_vm7, %v5635_v34, %v3058_v58  ;;  %v4066_v58 = vsel %vm6238_vm6, %v4061_v49, %v4065_v1 }
 0x1f3   : > { %v3147_v48 = vunpack.c.l.b16 %v3059_v39  ;;  %v4070_v34 = vrot.slane %v4068_v30, 4  ;;  %v4220_v49 = vunpack.c.l.b16 %v4066_v58  ;;  %v5961_v30 = vld [vmem:[%s6181_s30 + $0x9c] sm:$0xff] }
 0x1f4   : > { %v4882_v3 = vadd.f32 %v4806_v14, %v4388_v44  ;;  %5651 = vmatmul.msk.bf16.gmra.mxu1 %vm387_vm1, %v3167_v40  ;;  %5764 = vmatmul.msk.bf16.gmra.mxu2 %vm387_vm1, %v5960_v16  ;;  %v3317_v40 = vadd.f32 %v3243_v12, %v6711_v4  ;;  %v3062_v16 = vsel %vm6244_vm7, %v3060_v37, %v3061_v28  ;;  %v5613_v28 = vld [vmem:[%s6181_s30 + $0xa0] sm:$0xf] }
 0x1f5   : > { %5829 = vmatmul.msk.bf16.gmra.mxu3 %vm387_vm1, %v4239_v60  ;;  %5910 = vmatmul.msk.bf16.gmra.mxu0 %vm387_vm1, %v4733_v61  ;;  %v4077_v61 = vshll.u32 %v5807_v18, 16  ;;  %v4056_v4 = vsel %vm6238_vm6, %v4051_v59, %v7258_v10  ;;  %v4625_v44 = vsel %vm6244_vm7, %v5894_v63, %v4624_v7  ;;  %v3148_v26 = vunpack.c.l.b16 %v3062_v16 }
 0x1f6   : > { %v5974_v51 = vpack.c.bf16 %v4882_v3, %v4881_v47  ;;  %v5041_v53 = vadd.f32 %v5040_v6, %v4882_v3  ;;  %v5080_v14 = vmul.f32 %v4882_v3, %v4882_v3  ;;  %v4081_v47 = vshrl.u32 %v5807_v18, 16  ;;  %v5808_v18 = vld [vmem:[%s6181_s30 + $0xb0] sm:$0x1] }
 0x1f7   : > { %v3597_v55 = vpop.f32.mrf.mxu2  ;;  %v4073_v3 = vrot.slane %v4071_v27, 5  ;;  %v7291_v10 = vrot.slane %v4077_v61, 5  ;;  %v4219_v54 = vunpack.c.l.b16 %v4056_v4  ;;  %v4713_v7 = vunpack.c.l.b16 %v4625_v44  ;;  %v5612_v27 = vld [vmem:[%s6181_s30 + $0x9c] sm:$0xe]  ;;  %v5871_v44 = vld [vmem:[%s6181_s30 + $0xa8] sm:$0xe] }
 0x1f8   : > { %6046 = vst [vmem:[%s7237_s20 + $0x8] sm:$0xff] %v5974_v51   ;;  %v5111_v42 = vadd.f32 %v5110_v19, %v5080_v14  ;;  %v3671_v52 = vadd.f32 %v3597_v55, %v3317_v40  ;;  %v4315_v60 = vpop.f32.mrf.mxu3  ;;  %v4628_v19 = vsel %vm6244_vm7, %v4626_v62, %v4627_v8  ;;  %v4083_v59 = vrot.slane %v4081_v47, 4  ;;  %v5872_v51 = vld [vmem:[%s6181_s30 + $0xac] sm:$0xf] }
 0x1f9   : > { %v3245_v6 = vpop.f32.mrf.mxu1  ;;  %v4714_v1 = vunpack.c.l.b16 %v4628_v19  ;;  %v3065_v40 = vrot.slane %v5613_v28, 5  ;;  %v4240_v47 = vpack.c.b16 %v4220_v49, %v4219_v54  ;;  %v4631_v4 = vrot.slane %v5872_v51, 5  ;;  %v5873_v19 = vld [vmem:[%s6181_s30 + $0xb0] sm:$0x1] }
 0x1fa   : > { %v4389_v12 = vadd.f32 %v4315_v60, %v3671_v52  ;;  %v4811_v13 = vpop.f32.mrf.mxu0  ;;  %v3318_v8 = vadd.f32 %v3245_v6, %v6713_v21  ;;  %v5614_v52 = vld [vmem:[%s6181_s30 + $0xa4] sm:$0x1]  ;;  %v4074_v60 = vor.u32 %v4073_v3, %v4070_v34  ;;  %v4084_v61 = vor.u32 %v4083_v59, %v7291_v10  ;;  %v5809_v59 = vld [vmem:[%s6181_s30 + $0xb4] sm:$0xf] }
 0x1fb   : > { %v4734_v21 = vpack.c.b16 %v4714_v1, %v4713_v7  ;;  %v4087_v6 = vshll.u32 %v5808_v18, 16  ;;  %v5895_v49 = vrot.slane %v5871_v44, 9  ;;  %v4633_v7 = vrot.slane %v4631_v4, 4 }
 0x1fc   : > { %v4883_v37 = vadd.f32 %v4809_v36, %v4389_v12  ;;  %v3168_v36 = vpack.c.b16 %v3148_v26, %v3147_v48  ;;  %v3067_v48 = vrot.slane %v3065_v40, 4  ;;  %v3068_v26 = vrot.slane %v5614_v52, 5 }
 0x1fd   : > { %v4075_v34 = vrot.slane %v4074_v60, 4  ;;  %v4085_v3 = vrot.slane %v4084_v61, 4  ;;  %v4089_v54 = vrot.slane %v4087_v6, 5  ;;  %v4634_v1 = vrot.slane %v5873_v19, 5 }
 0x1fe   : > { %v5042_v63 = vadd.f32 %v5041_v53, %v4883_v37  ;;  %v5081_v62 = vmul.f32 %v4883_v37, %v4883_v37 }
 0x1ff   : > { %v3599_v14 = vpop.f32.mrf.mxu2 }
 0x200   : > { %v5112_v55 = vadd.f32 %v5111_v42, %v5081_v62  ;;  %v3672_v39 = vadd.f32 %v3599_v14, %v3318_v8  ;;  %v4317_v16 = vpop.f32.mrf.mxu3  ;;  %v5636_v42 = vrot.slane %v5612_v27, 9  ;;  %v5810_v62 = vld [vmem:[%s6181_s30 + $0xb8] sm:$0xf] }
 0x201   : > { %v3248_v53 = vpop.f32.mrf.mxu1  ;;  %v4101_v61 = vshll.u32 %v5810_v62, 16 }
 0x202   : > { %v4390_v12 = vadd.f32 %v4317_v16, %v3672_v39  ;;  %v4814_v58 = vpop.f32.mrf.mxu0  ;;  %v3319_v51 = vadd.f32 %v3248_v53, %v6752_v46  ;;  %v3069_v39 = vsel %vm6244_vm7, %v3067_v48, %v3068_v26  ;;  %v4092_v16 = vshrl.u32 %v5809_v59, 16 }
 0x203   : > { %v4080_v46 = vsel %vm6238_vm6, %v4075_v34, %v7291_v10  ;;  %v7324_v10 = vrot.slane %v4101_v61, 5 }
 0x204   : > { %v4884_v28 = vadd.f32 %v4811_v13, %v4390_v12  ;;  %5652 = vmatmul.msk.bf16.gmra.mxu1 %vm387_vm1, %v3168_v36  ;;  %5765 = vmatmul.msk.bf16.gmra.mxu2 %vm387_vm1, %v5961_v30  ;;  %v3066_v36 = vsel %vm6244_vm7, %v5636_v42, %v3065_v40  ;;  %v4095_v30 = vshll.u32 %v5809_v59, 16  ;;  %v4090_v40 = vsel %vm6238_vm6, %v4085_v3, %v4089_v54  ;;  %v5616_v42 = vld [vmem:[%s6181_s30 + $0xac] sm:$0xf] }
 0x205   : > { %5830 = vmatmul.msk.bf16.gmra.mxu3 %vm387_vm1, %v4240_v47  ;;  %5911 = vmatmul.msk.bf16.gmra.mxu0 %vm387_vm1, %v4734_v21  ;;  %v4632_v21 = vsel %vm6244_vm7, %v5895_v49, %v4631_v4  ;;  %v3149_v6 = vunpack.c.l.b16 %v3066_v36  ;;  %v3150_v12 = vunpack.c.l.b16 %v3069_v39  ;;  %v4094_v44 = vrot.slane %v4092_v16, 4  ;;  %v5962_v36 = vld [vmem:[%s6181_s30 + $0xa8] sm:$0xff]  ;;  %v5617_v16 = vld [vmem:[%s6181_s30 + $0xb0] sm:$0x1] }
 0x206   : > { %v5979_v8 = vpack.c.bf16 %v4884_v28, %v4883_v37  ;;  %v5043_v18 = vadd.f32 %v5042_v63, %v4884_v28  ;;  %v5082_v13 = vmul.f32 %v4884_v28, %v4884_v28  ;;  %v4105_v37 = vshrl.u32 %v5810_v62, 16  ;;  %v5615_v39 = vld [vmem:[%s6181_s30 + $0xa8] sm:$0xe] }
 0x207   : > { %v3602_v14 = vpop.f32.mrf.mxu2  ;;  %v4097_v48 = vrot.slane %v4095_v30, 5  ;;  %v4221_v28 = vunpack.c.l.b16 %v4080_v46  ;;  %v4222_v34 = vunpack.c.l.b16 %v4090_v40  ;;  %v4715_v4 = vunpack.c.l.b16 %v4632_v21  ;;  %v5876_v40 = vld [vmem:[%s6181_s30 + $0xbc] sm:$0x1] }
 0x208   : > { %6047 = vst [vmem:[%s7237_s20 + $0x10] sm:$0xff] %v5979_v8   ;;  %v5113_v27 = vadd.f32 %v5112_v55, %v5082_v13  ;;  %v3673_v52 = vadd.f32 %v3602_v14, %v3319_v51  ;;  %v4320_v60 = vpop.f32.mrf.mxu3  ;;  %v4635_v55 = vsel %vm6244_vm7, %v4633_v7, %v4634_v1  ;;  %v4107_v26 = vrot.slane %v4105_v37, 4  ;;  %v5811_v7 = vld [vmem:[%s6181_s30 + $0xbc] sm:$0x1]  ;;  %v5875_v1 = vld [vmem:[%s6181_s30 + $0xb8] sm:$0xf] }
 0x209   : > { %v3250_v63 = vpop.f32.mrf.mxu1  ;;  %v4716_v3 = vunpack.c.l.b16 %v4635_v55  ;;  %v3072_v8 = vrot.slane %v5616_v42, 5  ;;  %v4098_v30 = vor.u32 %v4097_v48, %v4094_v44  ;;  %v4111_v61 = vshll.u32 %v5811_v7, 16  ;;  %v5812_v42 = vld [vmem:[%s6181_s30 + $0xc0] sm:$0xf] }
 0x20a   : > { %v4391_v53 = vadd.f32 %v4320_v60, %v3673_v52  ;;  %v4816_v47 = vpop.f32.mrf.mxu0  ;;  %v3320_v49 = vadd.f32 %v3250_v63, %v6754_v25  ;;  %v4108_v52 = vor.u32 %v4107_v26, %v7324_v10  ;;  %v4241_v60 = vpack.c.b16 %v4222_v34, %v4221_v28 }
 0x20b   : > { %v4735_v25 = vpack.c.b16 %v4716_v3, %v4715_v4  ;;  %v4638_v37 = vrot.slane %v5875_v1, 5  ;;  %v3074_v21 = vrot.slane %v3072_v8, 4  ;;  %v3075_v55 = vrot.slane %v5617_v16, 5  ;;  %v5813_v4 = vld [vmem:[%s6181_s30 + $0xc4] sm:$0xf] }
 0x20c   : > { %v4885_v19 = vadd.f32 %v4814_v58, %v4391_v53  ;;  %v3169_v58 = vpack.c.b16 %v3150_v12, %v3149_v6  ;;  %v5874_v53 = vld [vmem:[%s6181_s30 + $0xb4] sm:$0xe]  ;;  %v4099_v12 = vrot.slane %v4098_v30, 4  ;;  %v4109_v44 = vrot.slane %v4108_v52, 4 }
 0x20d   : > { %v4113_v48 = vrot.slane %v4111_v61, 5  ;;  %v5896_v26 = vrot.slane %v5874_v53, 9  ;;  %v4640_v28 = vrot.slane %v4638_v37, 4  ;;  %v4641_v34 = vrot.slane %v5876_v40, 5  ;;  %v5619_v53 = vld [vmem:[%s6181_s30 + $0xb8] sm:$0xf] }
 0x20e   : > { %v5044_v59 = vadd.f32 %v5043_v18, %v4885_v19  ;;  %v5083_v54 = vmul.f32 %v4885_v19, %v4885_v19  ;;  %v4125_v16 = vshll.u32 %v5813_v4, 16 }
 0x20f   : > { %v3604_v62 = vpop.f32.mrf.mxu2 }
 0x210   : > { %v5114_v13 = vadd.f32 %v5113_v27, %v5083_v54  ;;  %v3674_v51 = vadd.f32 %v3604_v62, %v3320_v49  ;;  %v4322_v14 = vpop.f32.mrf.mxu3  ;;  %v5637_v27 = vrot.slane %v5615_v39, 9  ;;  %v3076_v62 = vsel %vm6244_vm7, %v3074_v21, %v3075_v55 }
 0x211   : > { %v3253_v18 = vpop.f32.mrf.mxu1 }
 0x212   : > { %v4392_v63 = vadd.f32 %v4322_v14, %v3674_v51  ;;  %v4819_v46 = vpop.f32.mrf.mxu0  ;;  %v3321_v49 = vadd.f32 %v3253_v18, %v6793_v11  ;;  %v3073_v1 = vsel %vm6244_vm7, %v5637_v27, %v3072_v8  ;;  %v4119_v51 = vshll.u32 %v5812_v42, 16 }
 0x213   : > { %v4104_v11 = vsel %vm6238_vm6, %v4099_v12, %v7324_v10  ;;  %v4114_v8 = vsel %vm6238_vm6, %v4109_v44, %v4113_v48  ;;  %v4639_v18 = vsel %vm6244_vm7, %v5896_v26, %v4638_v37  ;;  %v7357_v10 = vrot.slane %v4125_v16, 5  ;;  %v5814_v48 = vld [vmem:[%s6181_s30 + $0xc8] sm:$0x1]  ;;  %v5878_v26 = vld [vmem:[%s6181_s30 + $0xc4] sm:$0xf] }
 0x214   : > { %v4886_v6 = vadd.f32 %v4816_v47, %v4392_v63  ;;  %5653 = vmatmul.msk.bf16.gmra.mxu1 %vm387_vm1, %v3169_v58  ;;  %5766 = vmatmul.msk.bf16.gmra.mxu2 %vm387_vm1, %v5962_v36  ;;  %v4116_v58 = vshrl.u32 %v5812_v42, 16  ;;  %v4121_v40 = vrot.slane %v4119_v51, 5  ;;  %v4223_v21 = vunpack.c.l.b16 %v4104_v11  ;;  %v5879_v11 = vld [vmem:[%s6181_s30 + $0xc8] sm:$0x1] }
 0x215   : > { %5831 = vmatmul.msk.bf16.gmra.mxu3 %vm387_vm1, %v4241_v60  ;;  %5912 = vmatmul.msk.bf16.gmra.mxu0 %vm387_vm1, %v4735_v25  ;;  %v3151_v60 = vunpack.c.l.b16 %v3073_v1  ;;  %v3152_v25 = vunpack.c.l.b16 %v3076_v62  ;;  %v4224_v55 = vunpack.c.l.b16 %v4114_v8  ;;  %v4717_v37 = vunpack.c.l.b16 %v4639_v18  ;;  %v5620_v1 = vld [vmem:[%s6181_s30 + $0xbc] sm:$0x1] }
 0x216   : > { %v5984_v3 = vpack.c.bf16 %v4886_v6, %v4885_v19  ;;  %v5045_v54 = vadd.f32 %v5044_v59, %v4886_v6  ;;  %v5084_v47 = vmul.f32 %v4886_v6, %v4886_v6  ;;  %v4129_v19 = vshrl.u32 %v5813_v4, 16 }
 0x217   : > { %v3607_v7 = vpop.f32.mrf.mxu2  ;;  %v4118_v61 = vrot.slane %v4116_v58, 4  ;;  %v4242_v51 = vpack.c.b16 %v4224_v55, %v4223_v21  ;;  %v3082_v8 = vrot.slane %v5620_v1, 5  ;;  %v5816_v21 = vld [vmem:[%s6181_s30 + $0xd0] sm:$0xf] }
 0x218   : > { %6048 = vst [vmem:[%s7237_s20 + $0x18] sm:$0xff] %v5984_v3   ;;  %v5115_v14 = vadd.f32 %v5114_v13, %v5084_v47  ;;  %v3675_v36 = vadd.f32 %v3607_v7, %v3321_v49  ;;  %v4325_v39 = vpop.f32.mrf.mxu3  ;;  %v4642_v13 = vsel %vm6244_vm7, %v4640_v28, %v4641_v34  ;;  %v4131_v27 = vrot.slane %v4129_v19, 4  ;;  %v5963_v49 = vld [vmem:[%s6181_s30 + $0xb4] sm:$0xff] }
 0x219   : > { %v3255_v59 = vpop.f32.mrf.mxu1  ;;  %v4718_v6 = vunpack.c.l.b16 %v4642_v13  ;;  %v3079_v34 = vrot.slane %v5619_v53, 5  ;;  %v5618_v7 = vld [vmem:[%s6181_s30 + $0xb4] sm:$0xe]  ;;  %v4122_v62 = vor.u32 %v4121_v40, %v4118_v61 }
 0x21a   : > { %v4393_v30 = vadd.f32 %v4325_v39, %v3675_v36  ;;  %v4821_v52 = vpop.f32.mrf.mxu0  ;;  %v3322_v42 = vadd.f32 %v3255_v59, %v6795_v2  ;;  %v4132_v58 = vor.u32 %v4131_v27, %v7357_v10  ;;  %v4135_v36 = vshll.u32 %v5814_v48, 16  ;;  %v5877_v59 = vld [vmem:[%s6181_s30 + $0xc0] sm:$0xe] }
 0x21b   : > { %v4736_v2 = vpack.c.b16 %v4718_v6, %v4717_v37  ;;  %v4645_v39 = vrot.slane %v5878_v26, 5  ;;  %v4123_v13 = vrot.slane %v4122_v62, 4  ;;  %v5897_v53 = vrot.slane %v5877_v59, 9 }
 0x21c   : > { %v4887_v63 = vadd.f32 %v4819_v46, %v4393_v30  ;;  %v3170_v46 = vpack.c.b16 %v3152_v25, %v3151_v60  ;;  %v3081_v30 = vrot.slane %v3079_v34, 4  ;;  %v4133_v60 = vrot.slane %v4132_v58, 4  ;;  %v5815_v25 = vld [vmem:[%s6181_s30 + $0xcc] sm:$0xf] }
 0x21d   : > { %v4137_v61 = vrot.slane %v4135_v36, 5  ;;  %v4647_v40 = vrot.slane %v4645_v39, 4  ;;  %v4648_v27 = vrot.slane %v5879_v11, 5  ;;  %v4140_v26 = vshrl.u32 %v5815_v25, 16  ;;  %v5622_v36 = vld [vmem:[%s6181_s30 + $0xc4] sm:$0xf] }
 0x21e   : > { %v5046_v12 = vadd.f32 %v5045_v54, %v4887_v63  ;;  %v5085_v44 = vmul.f32 %v4887_v63, %v4887_v63  ;;  %v3083_v48 = vsel %vm6244_vm7, %v3081_v30, %v3082_v8  ;;  %v4646_v62 = vsel %vm6244_vm7, %v5897_v53, %v4645_v39 }
 0x21f   : > { %v3609_v28 = vpop.f32.mrf.mxu2  ;;  %v4719_v30 = vunpack.c.l.b16 %v4646_v62  ;;  %v3086_v53 = vrot.slane %v5622_v36, 5 }
 0x220   : > { %v5116_v4 = vadd.f32 %v5115_v14, %v5085_v44  ;;  %v3676_v3 = vadd.f32 %v3609_v28, %v3322_v42  ;;  %v4327_v47 = vpop.f32.mrf.mxu3  ;;  %v5638_v14 = vrot.slane %v5618_v7, 9  ;;  %v4143_v28 = vshll.u32 %v5815_v25, 16  ;;  %v5881_v25 = vld [vmem:[%s6181_s30 + $0xd0] sm:$0xf] }
 0x221   : > { %v3258_v54 = vpop.f32.mrf.mxu1 }
 0x222   : > { %v4394_v16 = vadd.f32 %v4327_v47, %v3676_v3  ;;  %v4824_v19 = vpop.f32.mrf.mxu0  ;;  %v3323_v6 = vadd.f32 %v3258_v54, %v6820_v56  ;;  %v3080_v42 = vsel %vm6244_vm7, %v5638_v14, %v3079_v34  ;;  %v4128_v56 = vsel %vm6238_vm6, %v4123_v13, %v7357_v10 }
 0x223   : > { %v4138_v34 = vsel %vm6238_vm6, %v4133_v60, %v4137_v61  ;;  %v3153_v58 = vunpack.c.l.b16 %v3080_v42  ;;  %v3154_v54 = vunpack.c.l.b16 %v3083_v48  ;;  %v4225_v11 = vunpack.c.l.b16 %v4128_v56  ;;  %v5817_v60 = vld [vmem:[%s6181_s30 + $0xd4] sm:$0x1] }
 0x224   : > { %v4888_v18 = vadd.f32 %v4821_v52, %v4394_v16  ;;  %5654 = vmatmul.msk.bf16.gmra.mxu1 %vm387_vm1, %v3170_v46  ;;  %5767 = vmatmul.msk.bf16.gmra.mxu2 %vm387_vm1, %v5963_v49  ;;  %v4149_v49 = vshll.u32 %v5816_v21, 16  ;;  %v4145_v16 = vrot.slane %v4143_v28, 5  ;;  %v4226_v14 = vunpack.c.l.b16 %v4138_v34 }
 0x225   : > { %5832 = vmatmul.msk.bf16.gmra.mxu3 %vm387_vm1, %v4242_v51  ;;  %5913 = vmatmul.msk.bf16.gmra.mxu0 %vm387_vm1, %v4736_v2  ;;  %v4142_v51 = vrot.slane %v4140_v26, 4  ;;  %v4159_v26 = vshll.u32 %v5817_v60, 16  ;;  %v4652_v28 = vrot.slane %v5881_v25, 5 }
 0x226   : > { %v5989_v55 = vpack.c.bf16 %v4888_v18, %v4887_v63  ;;  %v5047_v37 = vadd.f32 %v5046_v12, %v4888_v18  ;;  %v5086_v52 = vmul.f32 %v4888_v18, %v4888_v18  ;;  %v4153_v63 = vshrl.u32 %v5816_v21, 16 }
 0x227   : > { %v3612_v44 = vpop.f32.mrf.mxu2  ;;  %v7390_v10 = vrot.slane %v4149_v49, 5  ;;  %v4243_v42 = vpack.c.b16 %v4226_v14, %v4225_v11  ;;  %v5880_v49 = vld [vmem:[%s6181_s30 + $0xcc] sm:$0xe] }
 0x228   : > { %6049 = vst [vmem:[%s7237_s20 + $0x20] sm:$0xff] %v5989_v55   ;;  %v5117_v46 = vadd.f32 %v5116_v4, %v5086_v52  ;;  %v3677_v3 = vadd.f32 %v3612_v44, %v3323_v6  ;;  %v4330_v47 = vpop.f32.mrf.mxu3  ;;  %v4649_v4 = vsel %vm6244_vm7, %v4647_v40, %v4648_v27  ;;  %v4155_v59 = vrot.slane %v4153_v63, 4  ;;  %v5964_v55 = vld [vmem:[%s6181_s30 + $0xc0] sm:$0xff]  ;;  %v5882_v63 = vld [vmem:[%s6181_s30 + $0xd4] sm:$0x1] }
 0x229   : > { %v3260_v12 = vpop.f32.mrf.mxu1  ;;  %v4720_v39 = vunpack.c.l.b16 %v4649_v4  ;;  %v5621_v52 = vld [vmem:[%s6181_s30 + $0xc0] sm:$0xe]  ;;  %v4146_v6 = vor.u32 %v4145_v16, %v4142_v51  ;;  %v4161_v4 = vrot.slane %v4159_v26, 5  ;;  %v4655_v51 = vrot.slane %v5882_v63, 5 }
 0x22a   : > { %v4395_v7 = vadd.f32 %v4330_v47, %v3677_v3  ;;  %v4826_v1 = vpop.f32.mrf.mxu0  ;;  %v3324_v13 = vadd.f32 %v3260_v12, %v6830_v33  ;;  %v4156_v44 = vor.u32 %v4155_v59, %v7390_v10  ;;  %v5623_v33 = vld [vmem:[%s6181_s30 + $0xc8] sm:$0x1]  ;;  %v5639_v12 = vrot.slane %v5621_v52, 9 }
 0x22b   : > { %v4737_v48 = vpack.c.b16 %v4720_v39, %v4719_v30  ;;  %v4147_v34 = vrot.slane %v4146_v6, 4 }
 0x22c   : > { %v4889_v2 = vadd.f32 %v4824_v19, %v4395_v7  ;;  %v3171_v19 = vpack.c.b16 %v3154_v54, %v3153_v58  ;;  %v3089_v7 = vrot.slane %v5623_v33, 5  ;;  %v4157_v62 = vrot.slane %v4156_v44, 4 }
 0x22d   : > { %v5898_v58 = vrot.slane %v5880_v49, 9  ;;  %v4654_v54 = vrot.slane %v4652_v28, 4 }
 0x22e   : > { %v5048_v8 = vadd.f32 %v5047_v37, %v4889_v2  ;;  %v5087_v18 = vmul.f32 %v4889_v2, %v4889_v2 }
 0x22f   : > { %v3614_v61 = vpop.f32.mrf.mxu2 }
 0x230   : > { %v5118_v40 = vadd.f32 %v5117_v46, %v5087_v18  ;;  %v3678_v27 = vadd.f32 %v3614_v61, %v3324_v13  ;;  %v4332_v21 = vpop.f32.mrf.mxu3  ;;  %v3088_v46 = vrot.slane %v3086_v53, 4  ;;  %v3087_v13 = vsel %vm6244_vm7, %v5639_v12, %v3086_v53 }
 0x231   : > { %v3263_v37 = vpop.f32.mrf.mxu1  ;;  %v4653_v61 = vsel %vm6244_vm7, %v5898_v58, %v4652_v28  ;;  %v5965_v28 = vld [vmem:[%s6181_s30 + $0xcc] sm:$0xff] }
 0x232   : > { %v4396_v3 = vadd.f32 %v4332_v21, %v3678_v27  ;;  %v4829_v47 = vpop.f32.mrf.mxu0  ;;  %v3090_v60 = vsel %vm6244_vm7, %v3088_v46, %v3089_v7  ;;  %v4721_v52 = vunpack.c.l.b16 %v4653_v61 }
 0x233   : > { %v3156_v27 = vunpack.c.l.b16 %v3090_v60 }
 0x234   : > { %v4890_v56 = vadd.f32 %v4826_v1, %v4396_v3  ;;  %5655 = vmatmul.msk.bf16.gmra.mxu1 %vm387_vm1, %v3171_v19  ;;  %5768 = vmatmul.msk.bf16.gmra.mxu2 %vm387_vm1, %v5964_v55  ;;  %v3325_v1 = vadd.f32 %v3263_v37, %v6850_v35  ;;  %v4162_v35 = vsel %vm6238_vm6, %v4157_v62, %v4161_v4 }
 0x235   : > { %5833 = vmatmul.msk.bf16.gmra.mxu3 %vm387_vm1, %v4243_v42  ;;  %5914 = vmatmul.msk.bf16.gmra.mxu0 %vm387_vm1, %v4737_v48  ;;  %v4656_v19 = vsel %vm6244_vm7, %v4654_v54, %v4655_v51  ;;  %v4228_v55 = vunpack.c.l.b16 %v4162_v35 }
 0x236   : > { %v5994_v36 = vpack.c.bf16 %v4890_v56, %v4889_v2  ;;  %v5049_v16 = vadd.f32 %v5048_v8, %v4890_v56  ;;  %v5088_v59 = vmul.f32 %v4890_v56, %v4890_v56  ;;  %v4152_v2 = vsel %vm6238_vm6, %v4147_v34, %v7390_v10 }
 0x237   : > { %v3617_v11 = vpop.f32.mrf.mxu2  ;;  %v4227_v21 = vunpack.c.l.b16 %v4152_v2  ;;  %v4722_v6 = vunpack.c.l.b16 %v4656_v19 }
 0x238   : > { %6050 = vst [vmem:[%s7237_s20 + $0x28] sm:$0xff] %v5994_v36   ;;  %v5119_v14 = vadd.f32 %v5118_v40, %v5088_v59  ;;  %v3679_v30 = vadd.f32 %v3617_v11, %v3325_v1  ;;  %v4335_v39 = vpop.f32.mrf.mxu3  ;;  %v3155_v40 = vunpack.c.l.b16 %v3087_v13 }
 0x239   : > { %v3265_v18 = vpop.f32.mrf.mxu1  ;;  %v4244_v3 = vpack.c.b16 %v4228_v55, %v4227_v21 }
 0x23a   : > { %v4397_v8 = vadd.f32 %v4335_v39, %v3679_v30  ;;  %v4831_v25 = vpop.f32.mrf.mxu0  ;;  %v3326_v37 = vadd.f32 %v3265_v18, %v6868_v50  ;;  %v3172_v26 = vpack.c.b16 %v3156_v27, %v3155_v40 }
 0x23c   : > { %v4891_v53 = vadd.f32 %v4829_v47, %v4397_v8  ;;  %v4738_v47 = vpack.c.b16 %v4722_v6, %v4721_v52 }
 0x23e   : > { %v5050_v10 = vadd.f32 %v5049_v16, %v4891_v53  ;;  %v5089_v44 = vmul.f32 %v4891_v53, %v4891_v53 }
 0x23f   : > { %v3619_v5 = vpop.f32.mrf.mxu2 }
 0x240   : > { %v5120_v42 = vadd.f32 %v5119_v14, %v5089_v44  ;;  %v3680_v48 = vadd.f32 %v3619_v5, %v3326_v37  ;;  %v4337_v33 = vpop.f32.mrf.mxu3 }
 0x241   : > { %v3268_v9 = vpop.f32.mrf.mxu1 }
 0x242   : > { %v4398_v49 = vadd.f32 %v4337_v33, %v3680_v48  ;;  %v4834_v63 = vpop.f32.mrf.mxu0  ;;  %v3327_v7 = vadd.f32 %v3268_v9, %v6890_v57 }
 0x244   : > { %v4892_v12 = vadd.f32 %v4831_v25, %v4398_v49  ;;  %5656 = vmatmul.msk.bf16.gmra.mxu1 %vm387_vm1, %v3172_v26  ;;  %5769 = vmatmul.msk.bf16.gmra.mxu2 %vm387_vm1, %v5965_v28 }
 0x245   : > { %5834 = vmatmul.msk.bf16.gmra.mxu3 %vm387_vm1, %v4244_v3  ;;  %5915 = vmatmul.msk.bf16.gmra.mxu0 %vm387_vm1, %v4738_v47 }
 0x246   : > { %v5999_v50 = vpack.c.bf16 %v4892_v12, %v4891_v53  ;;  %v5051_v46 = vadd.f32 %v5050_v10, %v4892_v12  ;;  %v5090_v56 = vmul.f32 %v4892_v12, %v4892_v12 }
 0x247   : > { %v3622_v34 = vpop.f32.mrf.mxu2 }
 0x248   : > { %6051 = vst [vmem:[%s7237_s20 + $0x30] sm:$0xff] %v5999_v50   ;;  %v5121_v62 = vadd.f32 %v5120_v42, %v5090_v56  ;;  %v3681_v4 = vadd.f32 %v3622_v34, %v3327_v7  ;;  %v4340_v58 = vpop.f32.mrf.mxu3 }
 0x249   : > { %v3270_v54 = vpop.f32.mrf.mxu1 }
 0x24a   : > { %v4399_v51 = vadd.f32 %v4340_v58, %v3681_v4  ;;  %v4836_v36 = vpop.f32.mrf.mxu0  ;;  %v3328_v11 = vadd.f32 %v3270_v54, %v6902_v24 }
 0x24c   : > { %v4893_v16 = vadd.f32 %v4834_v63, %v4399_v51 }
 0x24e   : > { %v5052_v59 = vadd.f32 %v5051_v46, %v4893_v16  ;;  %v5091_v1 = vmul.f32 %v4893_v16, %v4893_v16 }
 0x24f   : > { %v3624_v14 = vpop.f32.mrf.mxu2 }
 0x250   : > { %v5122_v30 = vadd.f32 %v5121_v62, %v5091_v1  ;;  %v3682_v39 = vadd.f32 %v3624_v14, %v3328_v11  ;;  %v4342_v18 = vpop.f32.mrf.mxu3 }
 0x251   : > { %v3273_v13 = vpop.f32.mrf.mxu1 }
 0x252   : > { %v4400_v57 = vadd.f32 %v4342_v18, %v3682_v39  ;;  %v4839_v60 = vpop.f32.mrf.mxu0  ;;  %v3329_v61 = vadd.f32 %v3273_v13, %v6922_v45 }
 0x254   : > { %v4894_v2 = vadd.f32 %v4836_v36, %v4400_v57 }
 0x256   : > { %v6004_v8 = vpack.c.bf16 %v4894_v2, %v4893_v16  ;;  %v5053_v25 = vadd.f32 %v5052_v59, %v4894_v2  ;;  %v5092_v35 = vmul.f32 %v4894_v2, %v4894_v2 }
 0x257   : > { %v3627_v19 = vpop.f32.mrf.mxu2 }
 0x258   : > { %6052 = vst [vmem:[%s7237_s20 + $0x38] sm:$0xff] %v6004_v8   ;;  %v5123_v53 = vadd.f32 %v5122_v30, %v5092_v35  ;;  %v3683_v40 = vadd.f32 %v3627_v19, %v3329_v61  ;;  %v4345_v27 = vpop.f32.mrf.mxu3 }
 0x259   : > { %v3275_v21 = vpop.f32.mrf.mxu1 }
 0x25a   : > { %v4401_v24 = vadd.f32 %v4345_v27, %v3683_v40  ;;  %v4841_v55 = vpop.f32.mrf.mxu0  ;;  %v3330_v44 = vadd.f32 %v3275_v21, %v6940_v15 }
 0x25c   : > { %v4895_v52 = vadd.f32 %v4839_v60, %v4401_v24 }
 0x25e   : > { %v5054_v6 = vadd.f32 %v5053_v25, %v4895_v52  ;;  %v5093_v10 = vmul.f32 %v4895_v52, %v4895_v52 }
 0x25f   : > { %v3629_v37 = vpop.f32.mrf.mxu2 }
 0x260   : > { %v5124_v5 = vadd.f32 %v5123_v53, %v5093_v10  ;;  %v3684_v42 = vadd.f32 %v3629_v37, %v3330_v44  ;;  %v4347_v48 = vpop.f32.mrf.mxu3 }
 0x261   : > { %v3278_v33 = vpop.f32.mrf.mxu1 }
 0x262   : > { %v4402_v45 = vadd.f32 %v4347_v48, %v3684_v42  ;;  %v4844_v26 = vpop.f32.mrf.mxu0  ;;  %v3331_v49 = vadd.f32 %v3278_v33, %v6962_v43 }
 0x264   : > { %v4896_v28 = vadd.f32 %v4841_v55, %v4402_v45 }
 0x266   : > { %v6009_v9 = vpack.c.bf16 %v4896_v28, %v4895_v52  ;;  %v5055_v3 = vadd.f32 %v5054_v6, %v4896_v28  ;;  %v5094_v47 = vmul.f32 %v4896_v28, %v4896_v28 }
 0x267   : > { %v3632_v63 = vpop.f32.mrf.mxu2 }
 0x268   : > { %6053 = vst [vmem:[%s7237_s20 + $0x40] sm:$0xff] %v6009_v9   ;;  %v5125_v12 = vadd.f32 %v5124_v5, %v5094_v47  ;;  %v3685_v50 = vadd.f32 %v3632_v63, %v3331_v49  ;;  %v4350_v46 = vpop.f32.mrf.mxu3 }
 0x269   : > { %v3280_v56 = vpop.f32.mrf.mxu1 }
 0x26a   : > { %v4403_v15 = vadd.f32 %v4350_v46, %v3685_v50  ;;  %v4846_v7 = vpop.f32.mrf.mxu0  ;;  %v3332_v58 = vadd.f32 %v3280_v56, %v6974_v22 }
 0x26c   : > { %v4897_v34 = vadd.f32 %v4844_v26, %v4403_v15 }
 0x26e   : > { %v5056_v62 = vadd.f32 %v5055_v3, %v4897_v34  ;;  %v5095_v4 = vmul.f32 %v4897_v34, %v4897_v34 }
 0x26f   : > { %v3634_v54 = vpop.f32.mrf.mxu2 }
 0x270   : > { %v5126_v51 = vadd.f32 %v5125_v12, %v5095_v4  ;;  %v3686_v36 = vadd.f32 %v3634_v54, %v3332_v58  ;;  %v4352_v16 = vpop.f32.mrf.mxu3 }
 0x271   : > { %v3283_v59 = vpop.f32.mrf.mxu1 }
 0x272   : > { %v4404_v43 = vadd.f32 %v4352_v16, %v3686_v36  ;;  %v4849_v1 = vpop.f32.mrf.mxu0  ;;  %v3333_v18 = vadd.f32 %v3283_v59, %v6994_v38 }
 0x274   : > { %v4898_v11 = vadd.f32 %v4846_v7, %v4404_v43 }
 0x276   : > { %v6014_v14 = vpack.c.bf16 %v4898_v11, %v4897_v34  ;;  %v5057_v30 = vadd.f32 %v5056_v62, %v4898_v11  ;;  %v5096_v39 = vmul.f32 %v4898_v11, %v4898_v11 }
 0x277   : > { %v3637_v13 = vpop.f32.mrf.mxu2 }
 0x278   : > { %6054 = vst [vmem:[%s7237_s20 + $0x48] sm:$0xff] %v6014_v14   ;;  %v5127_v57 = vadd.f32 %v5126_v51, %v5096_v39  ;;  %v3687_v60 = vadd.f32 %v3637_v13, %v3333_v18  ;;  %v4355_v2 = vpop.f32.mrf.mxu3 }
 0x279   : > { %v3285_v8 = vpop.f32.mrf.mxu1 }
 0x27a   : > { %v4405_v22 = vadd.f32 %v4355_v2, %v3687_v60  ;;  %v4851_v25 = vpop.f32.mrf.mxu0  ;;  %v3334_v53 = vadd.f32 %v3285_v8, %v7012_v17 }
 0x27c   : > { %v4899_v35 = vadd.f32 %v4849_v1, %v4405_v22 }
 0x27e   : > { %v5058_v61 = vadd.f32 %v5057_v30, %v4899_v35  ;;  %v5097_v19 = vmul.f32 %v4899_v35, %v4899_v35 }
 0x27f   : > { %v3639_v40 = vpop.f32.mrf.mxu2 }
 0x280   : > { %v5128_v27 = vadd.f32 %v5127_v57, %v5097_v19  ;;  %v3688_v21 = vadd.f32 %v3639_v40, %v3334_v53  ;;  %v4357_v24 = vpop.f32.mrf.mxu3 }
 0x281   : > { %v3288_v55 = vpop.f32.mrf.mxu1 }
 0x282   : > { %v4406_v38 = vadd.f32 %v4357_v24, %v3688_v21  ;;  %v4854_v52 = vpop.f32.mrf.mxu0  ;;  %v3335_v5 = vadd.f32 %v3288_v55, %v7034_v20 }
 0x284   : > { %v4900_v6 = vadd.f32 %v4851_v25, %v4406_v38 }
 0x286   : > { %v6019_v10 = vpack.c.bf16 %v4900_v6, %v4899_v35  ;;  %v5059_v44 = vadd.f32 %v5058_v61, %v4900_v6  ;;  %v5098_v37 = vmul.f32 %v4900_v6, %v4900_v6 }
 0x287   : > { %v3642_v42 = vpop.f32.mrf.mxu2 }
 0x288   : > { %6055 = vst [vmem:[%s7237_s20 + $0x50] sm:$0xff] %v6019_v10   ;;  %v5129_v48 = vadd.f32 %v5128_v27, %v5098_v37  ;;  %v3689_v33 = vadd.f32 %v3642_v42, %v3335_v5  ;;  %v4360_v45 = vpop.f32.mrf.mxu3 }
 0x289   : > { %v3290_v26 = vpop.f32.mrf.mxu1 }
 0x28a   : > { %v4407_v17 = vadd.f32 %v4360_v45, %v3689_v33  ;;  %v4856_v28 = vpop.f32.mrf.mxu0  ;;  %v3336_v49 = vadd.f32 %v3290_v26, %v7046_v0 }
 0x28c   : > { %v4901_v9 = vadd.f32 %v4854_v52, %v4407_v17 }
 0x28e   : > { %v5060_v3 = vadd.f32 %v5059_v44, %v4901_v9  ;;  %v5099_v47 = vmul.f32 %v4901_v9, %v4901_v9 }
 0x28f   : > { %v3644_v63 = vpop.f32.mrf.mxu2 }
 0x290   : > { %v5130_v12 = vadd.f32 %v5129_v48, %v5099_v47  ;;  %v3690_v50 = vadd.f32 %v3644_v63, %v3336_v49  ;;  %v4362_v46 = vpop.f32.mrf.mxu3 }
 0x291   : > { %v3293_v56 = vpop.f32.mrf.mxu1 }
 0x292   : > { %v4408_v20 = vadd.f32 %v4362_v46, %v3690_v50  ;;  %v4859_v15 = vpop.f32.mrf.mxu0  ;;  %v3337_v58 = vadd.f32 %v3293_v56, %v7066_v23  ;;  %v7495_v56 = vld [vmem:[#allocation3_spill] sm:$0xff] }
 0x294   : > { %v4902_v7 = vadd.f32 %v4856_v28, %v4408_v20 }
 0x296   : > { %v6024_v34 = vpack.c.bf16 %v4902_v7, %v4901_v9  ;;  %v5061_v62 = vadd.f32 %v5060_v3, %v4902_v7  ;;  %v5100_v4 = vmul.f32 %v4902_v7, %v4902_v7 }
 0x297   : > { %v3647_v54 = vpop.f32.mrf.mxu2 }
 0x298   : > { %6056 = vst [vmem:[%s7237_s20 + $0x58] sm:$0xff] %v6024_v34   ;;  %v5131_v51 = vadd.f32 %v5130_v12, %v5100_v4  ;;  %v3691_v36 = vadd.f32 %v3647_v54, %v3337_v58  ;;  %v4365_v16 = vpop.f32.mrf.mxu3 }
 0x299   : > { %v3295_v59 = vpop.f32.mrf.mxu1 }
 0x29a   : > { %v4409_v0 = vadd.f32 %v4365_v16, %v3691_v36  ;;  %v4861_v43 = vpop.f32.mrf.mxu0  ;;  %v3338_v30 = vadd.f32 %v3295_v59, %v7084_v41  ;;  %v7496_v59 = vld [vmem:[#allocation4_spill] sm:$0xff] }
 0x29c   : > { %v4903_v1 = vadd.f32 %v4859_v15, %v4409_v0 }
 0x29e   : > { %v5062_v11 = vadd.f32 %v5061_v62, %v4903_v1  ;;  %v5101_v14 = vmul.f32 %v4903_v1, %v4903_v1 }
 0x29f   : > { %v3649_v39 = vpop.f32.mrf.mxu2 }
 0x2a0   : > { %v5132_v18 = vadd.f32 %v5131_v51, %v5101_v14  ;;  %v3692_v13 = vadd.f32 %v3649_v39, %v3338_v30  ;;  %v4367_v57 = vpop.f32.mrf.mxu3 }
 0x2a1   : > { %v3298_v60 = vpop.f32.mrf.mxu1 }
 0x2a2   : > { %v4410_v23 = vadd.f32 %v4367_v57, %v3692_v13  ;;  %v4864_v2 = vpop.f32.mrf.mxu0  ;;  %v3339_v61 = vadd.f32 %v3298_v60, %v7106_v31 }
 0x2a4   : > { %v4904_v8 = vadd.f32 %v4861_v43, %v4410_v23  ;;  %v7497_v23 = vld [vmem:[#allocation5_spill] sm:$0xff] }
 0x2a6   : > { %v6029_v22 = vpack.c.bf16 %v4904_v8, %v4903_v1  ;;  %v5063_v25 = vadd.f32 %v5062_v11, %v4904_v8  ;;  %v5102_v35 = vmul.f32 %v4904_v8, %v4904_v8 }
 0x2a7   : > { %v3652_v19 = vpop.f32.mrf.mxu2 }
 0x2a8   : > { %6057 = vst [vmem:[%s7237_s20 + $0x60] sm:$0xff] %v6029_v22   ;;  %v5133_v53 = vadd.f32 %v5132_v18, %v5102_v35  ;;  %v3693_v40 = vadd.f32 %v3652_v19, %v3339_v61  ;;  %v4370_v27 = vpop.f32.mrf.mxu3 }
 0x2a9   : > { %v3300_v21 = vpop.f32.mrf.mxu1 }
 0x2aa   : > { %v4411_v41 = vadd.f32 %v4370_v27, %v3693_v40  ;;  %v4866_v24 = vpop.f32.mrf.mxu0  ;;  %v3340_v6 = vadd.f32 %v3300_v21, %v7118_v32 }
 0x2ac   : > { %v4905_v55 = vadd.f32 %v4864_v2, %v4411_v41 }
 0x2ae   : > { %v5064_v38 = vadd.f32 %v5063_v25, %v4905_v55  ;;  %v5103_v52 = vmul.f32 %v4905_v55, %v4905_v55 }
 0x2af   : > { %v3654_v10 = vpop.f32.mrf.mxu2 }
 0x2b0   : > { %v5134_v44 = vadd.f32 %v5133_v53, %v5103_v52  ;;  %v3694_v37 = vadd.f32 %v3654_v10, %v3340_v6  ;;  %v4372_v5 = vpop.f32.mrf.mxu3 }
 0x2b1   : > { %v3303_v42 = vpop.f32.mrf.mxu1 }
 0x2b2   : > { %v4412_v31 = vadd.f32 %v4372_v5, %v3694_v37  ;;  %v4869_v33 = vpop.f32.mrf.mxu0  ;;  %v3341_v28 = vadd.f32 %v3303_v42, %v7138_v29 }
 0x2b4   : > { %v4906_v48 = vadd.f32 %v4866_v24, %v4412_v31 }
 0x2b6   : > { %v6034_v45 = vpack.c.bf16 %v4906_v48, %v4905_v55  ;;  %v5065_v26 = vadd.f32 %v5064_v38, %v4906_v48  ;;  %v5104_v17 = vmul.f32 %v4906_v48, %v4906_v48 }
 0x2b7   : > { %v3657_v9 = vpop.f32.mrf.mxu2 }
 0x2b8   : > { %6058 = vst [vmem:[%s7237_s20 + $0x68] sm:$0xff] %v6034_v45   ;;  %v5135_v3 = vadd.f32 %v5134_v44, %v5104_v17  ;;  %v3695_v47 = vadd.f32 %v3657_v9, %v3341_v28  ;;  %v4375_v49 = vpop.f32.mrf.mxu3 }
 0x2b9   : > { %v3305_v63 = vpop.f32.mrf.mxu1 }
 0x2ba   : > { %v4413_v32 = vadd.f32 %v4375_v49, %v3695_v47  ;;  %v3342_v20 = vadd.f32 %v3305_v63, %v7495_v56  ;;  %v4871_v15 = vpop.f32.mrf.mxu0 }
 0x2bc   : > { %v4907_v12 = vadd.f32 %v4869_v33, %v4413_v32 }
 0x2be   : > { %v5066_v50 = vadd.f32 %v5065_v26, %v4907_v12  ;;  %v5105_v46 = vmul.f32 %v4907_v12, %v4907_v12 }
 0x2bf   : > { %v3659_v7 = vpop.f32.mrf.mxu2 }
 0x2c0   : > { %v5136_v34 = vadd.f32 %v5135_v3, %v5105_v46  ;;  %v3696_v62 = vadd.f32 %v3659_v7, %v3342_v20  ;;  %v4377_v4 = vpop.f32.mrf.mxu3 }
 0x2c1   : > { %v3308_v58 = vpop.f32.mrf.mxu1 }
 0x2c2   : > { %v4414_v29 = vadd.f32 %v4377_v4, %v3696_v62  ;;  %v3343_v0 = vadd.f32 %v3308_v58, %v7496_v59  ;;  %v4874_v30 = vpop.f32.mrf.mxu0 }
 0x2c4   : > { %v4908_v54 = vadd.f32 %v4871_v15, %v4414_v29 }
 0x2c6   : > { %v6039_v51 = vpack.c.bf16 %v4908_v54, %v4907_v12  ;;  %v5067_v36 = vadd.f32 %v5066_v50, %v4908_v54  ;;  %v5106_v16 = vmul.f32 %v4908_v54, %v4908_v54 }
 0x2c7   : > { %v3662_v43 = vpop.f32.mrf.mxu2 }
 0x2c8   : > { %6059 = vst [vmem:[%s7237_s20 + $0x70] sm:$0xff] %v6039_v51   ;;  %v5137_v1 = vadd.f32 %v5136_v34, %v5106_v16  ;;  %v3697_v11 = vadd.f32 %v3662_v43, %v3343_v0  ;;  %v4380_v14 = vpop.f32.mrf.mxu3 }
 0x2c9   : > { %v3310_v18 = vpop.f32.mrf.mxu1 }
 0x2ca   : > { %v4415_v39 = vadd.f32 %v4380_v14, %v3697_v11  ;;  %v3344_v2 = vadd.f32 %v3310_v18, %v7497_v23  ;;  %v4876_v19 = vpop.f32.mrf.mxu0 }
 0x2cc   : > { %v4909_v13 = vadd.f32 %v4874_v30, %v4415_v39 }
 0x2ce   : > { %v5068_v57 = vadd.f32 %v5067_v36, %v4909_v13  ;;  %v5107_v60 = vmul.f32 %v4909_v13, %v4909_v13 }
 0x2cf   : > { %v3664_v8 = vpop.f32.mrf.mxu2 }
 0x2d0   : > { %v5138_v22 = vadd.f32 %v5137_v1, %v5107_v60  ;;  %v3698_v25 = vadd.f32 %v3664_v8, %v3344_v2  ;;  %v4382_v35 = vpop.f32.mrf.mxu3 }
 0x2d2   : > { %v4416_v61 = vadd.f32 %v4382_v35, %v3698_v25 }
 0x2d4   : > { %v4910_v53 = vadd.f32 %v4876_v19, %v4416_v61 }
 0x2d6   : > { %v6044_v40 = vpack.c.bf16 %v4910_v53, %v4909_v13  ;;  %v5069_v27 = vadd.f32 %v5068_v57, %v4910_v53  ;;  %v5108_v21 = vmul.f32 %v4910_v53, %v4910_v53 }
 0x2d8   : > { %6060 = vst [vmem:[%s7237_s20 + $0x78] sm:$0xff] %v6044_v40   ;;  %v5070_v41 = vrot.slane %v5069_v27, 4  ;;  %v5139_v24 = vadd.f32 %v5138_v22, %v5108_v21 }
 0x2da   : > { %v5071_v55 = vadd.f32 %v5070_v41, %v5069_v27  ;;  %v5140_v38 = vrot.slane %v5139_v24, 4 }
 0x2dc   : > { %v5072_v52 = vrot.slane %v5071_v55, 2  ;;  %v5141_v6 = vadd.f32 %v5140_v38, %v5139_v24 }
 0x2de   : > { %v5073_v10 = vadd.f32 %v5072_v52, %v5071_v55  ;;  %v5142_v44 = vrot.slane %v5141_v6, 2 }
 0x2e0   : > { %v5074_v37 = vrot.slane %v5073_v10, 1  ;;  %v5143_v5 = vadd.f32 %v5142_v44, %v5141_v6 }
 0x2e2   : > { %v5075_v42 = vadd.f32 %v5074_v37, %v5073_v10  ;;  %v5144_v31 = vrot.slane %v5143_v5, 1 }
 0x2e4   : > { %5076 = vst [vmem:[%s203_s25] sm:$0x1] %v5075_v42  ;;  %v5145_v48 = vadd.f32 %v5144_v31, %v5143_v5 }
 0x2e6   : > { %5146 = vst [vmem:[%s203_s25 + $0x1] sm:$0x1] %v5145_v48 }
 0x2e7 PF: > { %s14_s14 = sadd.s32 1, %s6111_s14   ;;  %s7498_s12 = smov %s6107_s13 }
 0x2e8   : > { %p11_p6 = scmp.ge.s32.totalorder %s14_s14, 4   ;;  %s7499_s13 = smov %s7501_s15 }
 0x2ea   :  { %13 = sbr.rel (!%p11_p6) target bundleno = 2 (0x2), region = 81 }

</bundles_post_ra>
